<compile_context>
chip_gen: v5e
topology: v5e:2x2
jax: 0.10.0
libtpu: 0.0.40
codegen_flags: <defaults>
</compile_context>

<pallas_src>
import math
import functools

import jax
import jax.numpy as jnp
from jax.experimental import pallas as pl
from jax.experimental.pallas import tpu as pltpu


# ----------------------------------------------------------------------------
# In-kernel helpers (operate on traced values inside Pallas kernels)
# ----------------------------------------------------------------------------

def _layer_norm(x, gamma, beta, eps=1e-12):
    """LayerNorm over last dim, biased variance, eps=1e-12 (matches reference)."""
    mu = jnp.mean(x, axis=-1, keepdims=True)
    var = jnp.mean((x - mu) ** 2, axis=-1, keepdims=True)   # unbiased=False
    return (x - mu) * jax.lax.rsqrt(var + eps) * gamma + beta


def _multi_head_attend(q, k, v, mask, scale, num_head):
    """q: (Sq, D), k/v: (Sk, D), mask: (1|Sq, Sk) float 1/0 -> (Sq, D).

    All heads of one batch element are computed in this single grid step;
    heads live side-by-side in the lane dimension (static slices), so no
    head split/merge transpose ever touches HBM.
    """
    d_model = q.shape[-1]
    dh = d_model // num_head
    outs = []
    for h in range(num_head):                              # static unroll
        sl = slice(h * dh, (h + 1) * dh)
        s = jnp.dot(q[:, sl], k[:, sl].T,
                    preferred_element_type=jnp.float32) * scale
        s = jnp.where(mask == 0.0, -10000.0, s)            # masked_fill(mask==0)
        smax = jnp.max(s, axis=-1, keepdims=True)
        e = jnp.exp(s - smax)
        inv = pl.reciprocal(jnp.sum(e, axis=-1, keepdims=True), approx=True)
        p = e * inv
        outs.append(jnp.dot(p, v[:, sl], preferred_element_type=jnp.float32))
    return jnp.concatenate(outs, axis=-1)                  # (Sq, D)


# ----------------------------------------------------------------------------
# Fused encoder *stack* kernel (one grid step == one batch element,
# all layers unrolled inside the body; weights carry a leading L axis)
# ----------------------------------------------------------------------------

def _encoder_stack_kernel(x_ref, mask_ref,
                          wqkv_ref, bqkv_ref, wo_ref, bo_ref,
                          ln1_g_ref, ln1_b_ref,
                          w1_ref, b1_ref, w2_ref, b2_ref,
                          ln2_g_ref, ln2_b_ref,
                          o_ref, *, num_head, num_layers):
    x = x_ref[0]                                           # (S, D)
    mask = mask_ref[0]                                     # (1, S) float 1/0
    d_model = x.shape[-1]
    scale = 1.0 / math.sqrt(d_model // num_head)

    for l in range(num_layers):                            # static unroll
        # fused Q|K|V projection: one (S,D)x(D,3D) MXU matmul
        qkv = jnp.dot(x, wqkv_ref[l],
                      preferred_element_type=jnp.float32) + bqkv_ref[l]
        q = qkv[:, :d_model]
        k = qkv[:, d_model:2 * d_model]
        v = qkv[:, 2 * d_model:]

        attn = _multi_head_attend(q, k, v, mask, scale, num_head)
        attn = jnp.dot(attn, wo_ref[l],
                       preferred_element_type=jnp.float32) + bo_ref[l]

        # residual + LayerNorm 1 (fused)
        x = _layer_norm(attn + x, ln1_g_ref[l], ln1_b_ref[l])

        # FFN (w1 + bias + ReLU + w2 + bias) — hidden never leaves VMEM
        h = jnp.maximum(
            jnp.dot(x, w1_ref[l], preferred_element_type=jnp.float32)
            + b1_ref[l], 0.0)
        f = jnp.dot(h, w2_ref[l],
                    preferred_element_type=jnp.float32) + b2_ref[l]

        # residual + LayerNorm 2 (fused)
        x = _layer_norm(f + x, ln2_g_ref[l], ln2_b_ref[l])

    o_ref[0] = x


# ----------------------------------------------------------------------------
# Fused decoder *stack* kernel (one grid step == one batch element)
# ----------------------------------------------------------------------------

def _decoder_stack_kernel(y_ref, mem_ref, tmask_ref, smask_ref,
                          sa_wqkv_ref, sa_bqkv_ref, sa_wo_ref, sa_bo_ref,
                          ln1_g_ref, ln1_b_ref,
                          ca_wq_ref, ca_bq_ref, ca_wkv_ref, ca_bkv_ref,
                          ca_wo_ref, ca_bo_ref,
                          ln2_g_ref, ln2_b_ref,
                          w1_ref, b1_ref, w2_ref, b2_ref,
                          ln3_g_ref, ln3_b_ref,
                          o_ref, *, num_head, num_layers):
    x = y_ref[0]                                           # (St, D)
    mem = mem_ref[0]                                       # (Ss, D)
    tmask = tmask_ref[0]                                   # (St, St)
    smask = smask_ref[0]                                   # (1, Ss)
    d_model = x.shape[-1]
    scale = 1.0 / math.sqrt(d_model // num_head)

    for l in range(num_layers):                            # static unroll
        # --- masked self-attention ---
        qkv = jnp.dot(x, sa_wqkv_ref[l],
                      preferred_element_type=jnp.float32) + sa_bqkv_ref[l]
        q = qkv[:, :d_model]
        k = qkv[:, d_model:2 * d_model]
        v = qkv[:, 2 * d_model:]
        attn = _multi_head_attend(q, k, v, tmask, scale, num_head)
        attn = jnp.dot(attn, sa_wo_ref[l],
                       preferred_element_type=jnp.float32) + sa_bo_ref[l]
        x = _layer_norm(attn + x, ln1_g_ref[l], ln1_b_ref[l])

        # --- encoder-decoder (cross) attention ---
        q = jnp.dot(x, ca_wq_ref[l],
                    preferred_element_type=jnp.float32) + ca_bq_ref[l]
        kv = jnp.dot(mem, ca_wkv_ref[l],
                     preferred_element_type=jnp.float32) + ca_bkv_ref[l]
        k = kv[:, :d_model]
        v = kv[:, d_model:]
        attn = _multi_head_attend(q, k, v, smask, scale, num_head)
        attn = jnp.dot(attn, ca_wo_ref[l],
                       preferred_element_type=jnp.float32) + ca_bo_ref[l]
        x = _layer_norm(attn + x, ln2_g_ref[l], ln2_b_ref[l])

        # --- FFN ---
        h = jnp.maximum(
            jnp.dot(x, w1_ref[l], preferred_element_type=jnp.float32)
            + b1_ref[l], 0.0)
        f = jnp.dot(h, w2_ref[l],
                    preferred_element_type=jnp.float32) + b2_ref[l]
        x = _layer_norm(f + x, ln3_g_ref[l], ln3_b_ref[l])

    o_ref[0] = x


# ----------------------------------------------------------------------------
# Lane-dense tiled linear (used only for the final vocab projection)
# ----------------------------------------------------------------------------

def _linear_kernel(x_ref, w_ref, b_ref, o_ref):
    o_ref[...] = (jnp.dot(x_ref[...], w_ref[...],
                          preferred_element_type=jnp.float32) + b_ref[...])


def linear_pallas(x2d, w, b2d, *, tm=256):
    """x2d: (M, K) @ w: (K, N) + b2d: (1, N) -> (M, N). N should be 128-aligned."""
    M, K = x2d.shape
    N = w.shape[1]
    tm = min(tm, M)
    grid = (pl.cdiv(M, tm),)
    ce = pl.CostEstimate(flops=int(2 * M * K * N), transcendentals=0,
                         bytes_accessed=int(4 * (M * K + K * N + M * N)))
    return pl.pallas_call(
        _linear_kernel,
        grid=grid,
        out_shape=jax.ShapeDtypeStruct((M, N), jnp.float32),
        in_specs=[
            pl.BlockSpec((tm, K), lambda i: (i, 0)),
            pl.BlockSpec((K, N), lambda i: (0, 0)),
            pl.BlockSpec((1, N), lambda i: (0, 0)),
        ],
        out_specs=pl.BlockSpec((tm, N), lambda i: (i, 0)),
        compiler_params=pltpu.CompilerParams(
            dimension_semantics=("parallel",)),
        cost_estimate=ce,
    )(x2d, w, b2d)


# ----------------------------------------------------------------------------
# Stack wrappers
# ----------------------------------------------------------------------------

def _rep(shape):
    """BlockSpec for an array replicated across the batch grid axis."""
    return pl.BlockSpec(shape, lambda b, _n=len(shape): (0,) * _n)


def encoder_stack_pallas(x, src_mask_f, p, num_head, num_layers):
    B, S, D = x.shape
    Sk = src_mask_f.shape[-1]
    Hf = p["w1"].shape[-1]
    L = num_layers
    dh = D // num_head

    param_bytes = 4 * sum(int(v.size) for v in jax.tree_util.tree_leaves(p))
    flops = int(L * (2 * B * S * (3 * D * D + D * D + 2 * D * Hf)
                     + 4 * B * num_head * S * Sk * dh))
    trans = int(L * (B * num_head * S * (Sk + 1) + 2 * B * S))
    bytes_acc = int(param_bytes + 4 * (2 * B * S * D + B * Sk))

    return pl.pallas_call(
        functools.partial(_encoder_stack_kernel,
                          num_head=num_head, num_layers=L),
        grid=(B,),
        out_shape=jax.ShapeDtypeStruct((B, S, D), jnp.float32),
        in_specs=[
            pl.BlockSpec((1, S, D), lambda b: (b, 0, 0)),      # x
            pl.BlockSpec((1, 1, Sk), lambda b: (b, 0, 0)),     # src mask
            _rep((L, D, 3 * D)), _rep((L, 1, 3 * D)),          # wqkv, bqkv
            _rep((L, D, D)), _rep((L, 1, D)),                  # wo, bo
            _rep((L, 1, D)), _rep((L, 1, D)),                  # ln1 g, b
            _rep((L, D, Hf)), _rep((L, 1, Hf)),                # w1, b1
            _rep((L, Hf, D)), _rep((L, 1, D)),                 # w2, b2
            _rep((L, 1, D)), _rep((L, 1, D)),                  # ln2 g, b
        ],
        out_specs=pl.BlockSpec((1, S, D), lambda b: (b, 0, 0)),
        compiler_params=pltpu.CompilerParams(
            dimension_semantics=("parallel",)),
        cost_estimate=pl.CostEstimate(flops=flops, transcendentals=trans,
                                      bytes_accessed=bytes_acc),
    )(x, src_mask_f,
      p["wqkv"], p["bqkv"], p["wo"], p["bo"],
      p["ln1_g"], p["ln1_b"],
      p["w1"], p["b1"], p["w2"], p["b2"],
      p["ln2_g"], p["ln2_b"])


def decoder_stack_pallas(y, mem, trg_mask_f, src_mask_f, p, num_head,
                         num_layers):
    B, St, D = y.shape
    Ss = mem.shape[1]
    Hf = p["w1"].shape[-1]
    L = num_layers
    dh = D // num_head

    param_bytes = 4 * sum(int(v.size) for v in jax.tree_util.tree_leaves(p))
    flops = int(L * (2 * B * St * (3 * D * D + 2 * D * D + 2 * D * Hf)
                     + 2 * B * Ss * 2 * D * D
                     + 4 * B * num_head * St * (St + Ss) * dh))
    trans = int(L * (B * num_head * (St * St + St * Ss + 2 * St) + 3 * B * St))
    bytes_acc = int(param_bytes
                    + 4 * (2 * B * St * D + B * Ss * D + B * St * St + B * Ss))

    return pl.pallas_call(
        functools.partial(_decoder_stack_kernel,
                          num_head=num_head, num_layers=L),
        grid=(B,),
        out_shape=jax.ShapeDtypeStruct((B, St, D), jnp.float32),
        in_specs=[
            pl.BlockSpec((1, St, D), lambda b: (b, 0, 0)),     # decoder input
            pl.BlockSpec((1, Ss, D), lambda b: (b, 0, 0)),     # encoder memory
            pl.BlockSpec((1, St, St), lambda b: (b, 0, 0)),    # trg mask
            pl.BlockSpec((1, 1, Ss), lambda b: (b, 0, 0)),     # src mask
            _rep((L, D, 3 * D)), _rep((L, 1, 3 * D)),          # self wqkv, bqkv
            _rep((L, D, D)), _rep((L, 1, D)),                  # self wo, bo
            _rep((L, 1, D)), _rep((L, 1, D)),                  # ln1 g, b
            _rep((L, D, D)), _rep((L, 1, D)),                  # cross wq, bq
            _rep((L, D, 2 * D)), _rep((L, 1, 2 * D)),          # cross wkv, bkv
            _rep((L, D, D)), _rep((L, 1, D)),                  # cross wo, bo
            _rep((L, 1, D)), _rep((L, 1, D)),                  # ln2 g, b
            _rep((L, D, Hf)), _rep((L, 1, Hf)),                # w1, b1
            _rep((L, Hf, D)), _rep((L, 1, D)),                 # w2, b2
            _rep((L, 1, D)), _rep((L, 1, D)),                  # ln3 g, b
        ],
        out_specs=pl.BlockSpec((1, St, D), lambda b: (b, 0, 0)),
        compiler_params=pltpu.CompilerParams(
            dimension_semantics=("parallel",)),
        cost_estimate=pl.CostEstimate(flops=flops, transcendentals=trans,
                                      bytes_accessed=bytes_acc),
    )(y, mem, trg_mask_f, src_mask_f,
      p["sa_wqkv"], p["sa_bqkv"], p["sa_wo"], p["sa_bo"],
      p["ln1_g"], p["ln1_b"],
      p["ca_wq"], p["ca_bq"], p["ca_wkv"], p["ca_bkv"],
      p["ca_wo"], p["ca_bo"],
      p["ln2_g"], p["ln2_b"],
      p["w1"], p["b1"], p["w2"], p["b2"],
      p["ln3_g"], p["ln3_b"])


# ----------------------------------------------------------------------------
# Model glue (plain JAX around the Pallas kernels)
# ----------------------------------------------------------------------------

def sinusoid_encoding(max_len, d_model):
    pos = jnp.arange(max_len, dtype=jnp.float32)[:, None]
    two_i = jnp.arange(0, d_model, 2, dtype=jnp.float32)
    angle = pos / jnp.power(10000.0, two_i / d_model)
    enc = jnp.zeros((max_len, d_model), jnp.float32)
    enc = enc.at[:, 0::2].set(jnp.sin(angle))
    enc = enc.at[:, 1::2].set(jnp.cos(angle))
    return enc


def transformer_forward(params, src, trg, *, src_pad_idx, trg_pad_idx,
                        num_head, num_layers, dec_voc):
    B, Ss = src.shape
    _, St = trg.shape

    # masks (same semantics as make_src_mask / make_trg_mask), kept compact
    # (no per-head broadcast): (B,1,Ss) and (B,St,St) floats.
    src_mask_f = (src != src_pad_idx).astype(jnp.float32)[:, None, :]
    trg_pad = (trg != trg_pad_idx)
    causal = jnp.tril(jnp.ones((St, St), dtype=jnp.bool_))
    trg_mask_f = (trg_pad[:, :, None] & causal[None, :, :]).astype(jnp.float32)

    pos = params["pos_enc"]

    # encoder (embedding gather + positional encoding stay in plain JAX)
    x = jnp.take(params["enc_tok_emb"], src, axis=0) + pos[None, :Ss, :]
    enc_src = encoder_stack_pallas(x, src_mask_f, params["enc"], num_head,
                                   num_layers)

    # decoder
    y = jnp.take(params["dec_tok_emb"], trg, axis=0) + pos[None, :St, :]
    y = decoder_stack_pallas(y, enc_src, trg_mask_f, src_mask_f,
                             params["dec"], num_head, num_layers)

    # final (lane-dense, 128-padded) vocab projection; slice padding off in JAX
    B_, S_, D = y.shape
    logits = linear_pallas(y.reshape(-1, D), params["out_w"], params["out_b"])
    logits = logits[:, :dec_voc]
    return logits.reshape(B_, S_, dec_voc)


# ----------------------------------------------------------------------------
# Deterministic parameter initialization (weights pre-fused & layer-stacked)
# ----------------------------------------------------------------------------

def _init_linear(key, fan_in, fan_out):
    k1, k2 = jax.random.split(key)
    w = jax.random.normal(k1, (fan_in, fan_out), jnp.float32) * 0.05
    b = jax.random.normal(k2, (fan_out,), jnp.float32) * 0.05
    return w, b


def _init_attn_self(key, d_model):
    ks = jax.random.split(key, 4)
    wq, bq = _init_linear(ks[0], d_model, d_model)
    wk, bk = _init_linear(ks[1], d_model, d_model)
    wv, bv = _init_linear(ks[2], d_model, d_model)
    wo, bo = _init_linear(ks[3], d_model, d_model)
    return dict(
        wqkv=jnp.concatenate([wq, wk, wv], axis=1),        # (D, 3D)
        bqkv=jnp.concatenate([bq, bk, bv])[None, :],       # (1, 3D)
        wo=wo, bo=bo[None, :])


def _init_attn_cross(key, d_model):
    ks = jax.random.split(key, 4)
    wq, bq = _init_linear(ks[0], d_model, d_model)
    wk, bk = _init_linear(ks[1], d_model, d_model)
    wv, bv = _init_linear(ks[2], d_model, d_model)
    wo, bo = _init_linear(ks[3], d_model, d_model)
    return dict(
        wq=wq, bq=bq[None, :],
        wkv=jnp.concatenate([wk, wv], axis=1),             # (D, 2D)
        bkv=jnp.concatenate([bk, bv])[None, :],            # (1, 2D)
        wo=wo, bo=bo[None, :])


def _init_ffn(key, d_model, ffn_hidden):
    k1, k2 = jax.random.split(key)
    w1, b1 = _init_linear(k1, d_model, ffn_hidden)
    w2, b2 = _init_linear(k2, ffn_hidden, d_model)
    return dict(w1=w1, b1=b1[None, :], w2=w2, b2=b2[None, :])


def _stack(list_of_dicts):
    """Stack a list of per-layer dicts along a new leading L axis."""
    out = {}
    for k in list_of_dicts[0]:
        out[k] = jnp.stack([d[k] for d in list_of_dicts], axis=0)
    return out


def init_params(key, *, enc_voc, dec_voc, d_model, ffn_hidden, num_layers,
                max_len):
    keys = jax.random.split(key, 8)
    params = {
        "enc_tok_emb": jax.random.normal(keys[0], (enc_voc, d_model)) * 0.05,
        "dec_tok_emb": jax.random.normal(keys[1], (dec_voc, d_model)) * 0.05,
        "pos_enc": sinusoid_encoding(max_len, d_model),
    }
    # Pad vocab projection to a multiple of 128 output columns (lane-dense).
    dec_voc_pad = ((dec_voc + 127) // 128) * 128
    ow, ob = _init_linear(keys[2], d_model, dec_voc)
    params["out_w"] = jnp.pad(ow, ((0, 0), (0, dec_voc_pad - dec_voc)))
    params["out_b"] = jnp.pad(ob, (0, dec_voc_pad - dec_voc))[None, :]

    ones = jnp.ones((1, d_model), jnp.float32)
    zeros = jnp.zeros((1, d_model), jnp.float32)

    enc_layers = []
    for lk in jax.random.split(keys[3], num_layers):
        k1, k2 = jax.random.split(lk)
        a = _init_attn_self(k1, d_model)
        f = _init_ffn(k2, d_model, ffn_hidden)
        enc_layers.append(dict(
            wqkv=a["wqkv"], bqkv=a["bqkv"], wo=a["wo"], bo=a["bo"],
            ln1_g=ones, ln1_b=zeros,
            w1=f["w1"], b1=f["b1"], w2=f["w2"], b2=f["b2"],
            ln2_g=ones, ln2_b=zeros,
        ))
    params["enc"] = _stack(enc_layers)

    dec_layers = []
    for lk in jax.random.split(keys[4], num_layers):
        k1, k2, k3 = jax.random.split(lk, 3)
        sa = _init_attn_self(k1, d_model)
        ca = _init_attn_cross(k2, d_model)
        f = _init_ffn(k3, d_model, ffn_hidden)
        dec_layers.append(dict(
            sa_wqkv=sa["wqkv"], sa_bqkv=sa["bqkv"],
            sa_wo=sa["wo"], sa_bo=sa["bo"],
            ln1_g=ones, ln1_b=zeros,
            ca_wq=ca["wq"], ca_bq=ca["bq"],
            ca_wkv=ca["wkv"], ca_bkv=ca["bkv"],
            ca_wo=ca["wo"], ca_bo=ca["bo"],
            ln2_g=ones, ln2_b=zeros,
            w1=f["w1"], b1=f["b1"], w2=f["w2"], b2=f["b2"],
            ln3_g=ones, ln3_b=zeros,
        ))
    params["dec"] = _stack(dec_layers)
    return params


# ----------------------------------------------------------------------------
# Main
# ----------------------------------------------------------------------------

if __name__ == "__main__":
    # small hyperparameters consistent with the module's __init__
    src_pad_idx, trg_pad_idx, trg_sos_idx = 1, 1, 2
    enc_voc, dec_voc = 37, 41
    d_model, num_head = 32, 4
    max_len, ffn_hidden, num_layers = 16, 64, 2
    B, S_src, S_trg = 2, 8, 8

    key = jax.random.PRNGKey(0)
    kp, ks, kt = jax.random.split(key, 3)

    params = init_params(kp, enc_voc=enc_voc, dec_voc=dec_voc,
                         d_model=d_model, ffn_hidden=ffn_hidden,
                         num_layers=num_layers, max_len=max_len)

    src = jax.random.randint(ks, (B, S_src), 0, enc_voc, dtype=jnp.int32)
    trg = jax.random.randint(kt, (B, S_trg), 0, dec_voc, dtype=jnp.int32)
    # exercise the padding masks
    src = src.at[:, -2:].set(src_pad_idx)
    trg = trg.at[:, -1:].set(trg_pad_idx)

    fwd = jax.jit(functools.partial(
        transformer_forward,
        src_pad_idx=src_pad_idx, trg_pad_idx=trg_pad_idx,
        num_head=num_head, num_layers=num_layers, dec_voc=dec_voc))

    out = fwd(params, src, trg)
    out = jax.block_until_ready(out)

    assert out.shape == (B, S_trg, dec_voc), out.shape
    assert jnp.all(jnp.isfinite(out))
    print("KERNEL_OK")
</pallas_src>

<mosaic_0001>
module attributes {stable_mosaic.version = 11 : i64} {
  func.func @_linear_kernel(%arg0: i32, %arg1: memref<16x32xf32, #tpu.memory_space<vmem>>, %arg2: memref<32x128xf32, #tpu.memory_space<vmem>>, %arg3: memref<1x128xf32, #tpu.memory_space<vmem>>, %arg4: memref<16x128xf32, #tpu.memory_space<vmem>>) attributes {dimension_semantics = [#tpu.dimension_semantics<parallel>], iteration_bounds = array<i64: 1>, scalar_prefetch = 0 : i64, scratch_operands = 0 : i64, tpu.core_type = #tpu.core_type<tc>, window_params = [{transform_indices = @transform_0, window_bounds = array<i64: 16, 32>}, {pipeline_mode = #tpu.pipeline_mode<synchronous>, transform_indices = @transform_1, window_bounds = array<i64: 32, 128>}, {pipeline_mode = #tpu.pipeline_mode<synchronous>, transform_indices = @transform_2, window_bounds = array<i64: 1, 128>}, {transform_indices = @transform_3, window_bounds = array<i64: 16, 128>}]} {
    %c0 = arith.constant 0 : index
    %c0_0 = arith.constant 0 : index
    %0 = vector.load %arg1[%c0, %c0_0] : memref<16x32xf32, #tpu.memory_space<vmem>>, vector<16x32xf32>
    %c0_1 = arith.constant 0 : index
    %c0_2 = arith.constant 0 : index
    %1 = vector.load %arg2[%c0_1, %c0_2] : memref<32x128xf32, #tpu.memory_space<vmem>>, vector<32x128xf32>
    %cst = arith.constant dense<0.000000e+00> : vector<16x128xf32>
    %2 = tpu.matmul %0, %1, %cst {dimension_numbers = #tpu.dot_dimension_numbers<[1], [0], [0], [1], [0, 0, 1, 1], [], []>} : vector<16x32xf32>, vector<32x128xf32>, vector<16x128xf32> -> vector<16x128xf32>
    %c0_3 = arith.constant 0 : index
    %c0_4 = arith.constant 0 : index
    %3 = vector.load %arg3[%c0_3, %c0_4] : memref<1x128xf32, #tpu.memory_space<vmem>>, vector<1x128xf32>
    %4 = vector.broadcast %3 : vector<1x128xf32> to vector<16x128xf32>
    %5 = arith.addf %2, %4 : vector<16x128xf32>
    %c0_5 = arith.constant 0 : index
    %c0_6 = arith.constant 0 : index
    %6 = vector.load %arg4[%c0_5, %c0_6] : memref<16x128xf32, #tpu.memory_space<vmem>>, vector<16x128xf32>
    tpu.vector_store %arg4[%c0_5, %c0_6], %5 {strides = array<i32>} : memref<16x128xf32, #tpu.memory_space<vmem>>, vector<16x128xf32>,
    return
  }
  func.func @transform_0(%arg0: i32) -> (i32, i32) {
    %c0_i32 = arith.constant 0 : i32
    %c0_i32_0 = arith.constant 0 : i32
    return %arg0, %c0_i32 : i32, i32
  }
  func.func @transform_1(%arg0: i32) -> (i32, i32) {
    %c0_i32 = arith.constant 0 : i32
    %c0_i32_0 = arith.constant 0 : i32
    %c0_i32_1 = arith.constant 0 : i32
    return %c0_i32, %c0_i32_0 : i32, i32
  }
  func.func @transform_2(%arg0: i32) -> (i32, i32) {
    %c0_i32 = arith.constant 0 : i32
    %c0_i32_0 = arith.constant 0 : i32
    %c0_i32_1 = arith.constant 0 : i32
    return %c0_i32, %c0_i32_0 : i32, i32
  }
  func.func @transform_3(%arg0: i32) -> (i32, i32) {
    %c0_i32 = arith.constant 0 : i32
    %c0_i32_0 = arith.constant 0 : i32
    return %arg0, %c0_i32 : i32, i32
  }
}

module attributes {stable_mosaic.version = 11 : i64} {
  func.func @_encoder_stack_kernel(%arg0: i32, %arg1: memref<1x8x32xf32, #tpu.memory_space<vmem>>, %arg2: memref<1x1x8xf32, #tpu.memory_space<vmem>>, %arg3: memref<2x32x96xf32, #tpu.memory_space<vmem>>, %arg4: memref<2x1x96xf32, #tpu.memory_space<vmem>>, %arg5: memref<2x32x32xf32, #tpu.memory_space<vmem>>, %arg6: memref<2x1x32xf32, #tpu.memory_space<vmem>>, %arg7: memref<2x1x32xf32, #tpu.memory_space<vmem>>, %arg8: memref<2x1x32xf32, #tpu.memory_space<vmem>>, %arg9: memref<2x32x64xf32, #tpu.memory_space<vmem>>, %arg10: memref<2x1x64xf32, #tpu.memory_space<vmem>>, %arg11: memref<2x64x32xf32, #tpu.memory_space<vmem>>, %arg12: memref<2x1x32xf32, #tpu.memory_space<vmem>>, %arg13: memref<2x1x32xf32, #tpu.memory_space<vmem>>, %arg14: memref<2x1x32xf32, #tpu.memory_space<vmem>>, %arg15: memref<1x8x32xf32, #tpu.memory_space<vmem>>) attributes {dimension_semantics = [#tpu.dimension_semantics<parallel>], iteration_bounds = array<i64: 2>, scalar_prefetch = 0 : i64, scratch_operands = 0 : i64, tpu.core_type = #tpu.core_type<tc>, window_params = [{transform_indices = @transform_0, window_bounds = array<i64: 1, 8, 32>}, {transform_indices = @transform_1, window_bounds = array<i64: 1, 1, 8>}, {pipeline_mode = #tpu.pipeline_mode<synchronous>, transform_indices = @transform_2, window_bounds = array<i64: 2, 32, 96>}, {pipeline_mode = #tpu.pipeline_mode<synchronous>, transform_indices = @transform_3, window_bounds = array<i64: 2, 1, 96>}, {pipeline_mode = #tpu.pipeline_mode<synchronous>, transform_indices = @transform_4, window_bounds = array<i64: 2, 32, 32>}, {pipeline_mode = #tpu.pipeline_mode<synchronous>, transform_indices = @transform_5, window_bounds = array<i64: 2, 1, 32>}, {pipeline_mode = #tpu.pipeline_mode<synchronous>, transform_indices = @transform_6, window_bounds = array<i64: 2, 1, 32>}, {pipeline_mode = #tpu.pipeline_mode<synchronous>, transform_indices = @transform_7, window_bounds = array<i64: 2, 1, 32>}, {pipeline_mode = #tpu.pipeline_mode<synchronous>, transform_indices = @transform_8, window_bounds = array<i64: 2, 32, 64>}, {pipeline_mode = #tpu.pipeline_mode<synchronous>, transform_indices = @transform_9, window_bounds = array<i64: 2, 1, 64>}, {pipeline_mode = #tpu.pipeline_mode<synchronous>, transform_indices = @transform_10, window_bounds = array<i64: 2, 64, 32>}, {pipeline_mode = #tpu.pipeline_mode<synchronous>, transform_indices = @transform_11, window_bounds = array<i64: 2, 1, 32>}, {pipeline_mode = #tpu.pipeline_mode<synchronous>, transform_indices = @transform_12, window_bounds = array<i64: 2, 1, 32>}, {pipeline_mode = #tpu.pipeline_mode<synchronous>, transform_indices = @transform_13, window_bounds = array<i64: 2, 1, 32>}, {transform_indices = @transform_14, window_bounds = array<i64: 1, 8, 32>}]} {
    %c0 = arith.constant 0 : index
    %c0_0 = arith.constant 0 : index
    %c0_1 = arith.constant 0 : index
    %0 = vector.load %arg1[%c0, %c0_0, %c0_1] : memref<1x8x32xf32, #tpu.memory_space<vmem>>, vector<1x8x32xf32>
    %1 = vector.shape_cast %0 : vector<1x8x32xf32> to vector<8x32xf32>
    %c0_2 = arith.constant 0 : index
    %c0_3 = arith.constant 0 : index
    %c0_4 = arith.constant 0 : index
    %2 = vector.load %arg2[%c0_2, %c0_3, %c0_4] : memref<1x1x8xf32, #tpu.memory_space<vmem>>, vector<1x1x8xf32>
    %3 = vector.shape_cast %2 : vector<1x1x8xf32> to vector<1x8xf32>
    %c0_5 = arith.constant 0 : index
    %c0_6 = arith.constant 0 : index
    %c0_7 = arith.constant 0 : index
    %4 = vector.load %arg3[%c0_5, %c0_6, %c0_7] : memref<2x32x96xf32, #tpu.memory_space<vmem>>, vector<1x32x96xf32>
    %5 = vector.shape_cast %4 : vector<1x32x96xf32> to vector<32x96xf32>
    %cst = arith.constant dense<0.000000e+00> : vector<8x96xf32>
    %6 = tpu.matmul %1, %5, %cst {dimension_numbers = #tpu.dot_dimension_numbers<[1], [0], [0], [1], [0, 0, 1, 1], [], []>} : vector<8x32xf32>, vector<32x96xf32>, vector<8x96xf32> -> vector<8x96xf32>
    %c0_8 = arith.constant 0 : index
    %c0_9 = arith.constant 0 : index
    %c0_10 = arith.constant 0 : index
    %7 = vector.load %arg4[%c0_8, %c0_9, %c0_10] : memref<2x1x96xf32, #tpu.memory_space<vmem>>, vector<1x1x96xf32>
    %8 = vector.shape_cast %7 : vector<1x1x96xf32> to vector<1x96xf32>
    %9 = vector.broadcast %8 : vector<1x96xf32> to vector<8x96xf32>
    %10 = arith.addf %6, %9 : vector<8x96xf32>
    %11 = vector.extract_strided_slice %10 {offsets = [0, 0], sizes = [8, 32], strides = [1, 1]} : vector<8x96xf32> to vector<8x32xf32>
    %12 = vector.extract_strided_slice %10 {offsets = [0, 32], sizes = [8, 32], strides = [1, 1]} : vector<8x96xf32> to vector<8x32xf32>
    %13 = vector.extract_strided_slice %10 {offsets = [0, 64], sizes = [8, 32], strides = [1, 1]} : vector<8x96xf32> to vector<8x32xf32>
    %14 = vector.extract_strided_slice %11 {offsets = [0, 0], sizes = [8, 8], strides = [1, 1]} : vector<8x32xf32> to vector<8x8xf32>
    %15 = vector.extract_strided_slice %12 {offsets = [0, 0], sizes = [8, 8], strides = [1, 1]} : vector<8x32xf32> to vector<8x8xf32>
    %16 = tpu.transpose %15, [1, 0] : vector<8x8xf32> -> vector<8x8xf32>
    %cst_11 = arith.constant dense<0.000000e+00> : vector<8x8xf32>
    %17 = tpu.matmul %14, %16, %cst_11 {dimension_numbers = #tpu.dot_dimension_numbers<[1], [0], [0], [1], [0, 0, 1, 1], [], []>} : vector<8x8xf32>, vector<8x8xf32>, vector<8x8xf32> -> vector<8x8xf32>
    %cst_12 = arith.constant 0.353553385 : f32
    %18 = vector.broadcast %cst_12 : f32 to vector<8x8xf32>
    %19 = arith.mulf %17, %18 : vector<8x8xf32>
    %cst_13 = arith.constant 0.000000e+00 : f32
    %20 = vector.broadcast %cst_13 : f32 to vector<1x8xf32>
    %21 = arith.cmpf oeq, %3, %20 : vector<1x8xf32>
    %cst_14 = arith.constant -1.000000e+04 : f32
    %22 = vector.shape_cast %21 : vector<1x8xi1> to vector<1x8xi1>
    %23 = vector.broadcast %22 : vector<1x8xi1> to vector<8x8xi1>
    %24 = vector.broadcast %cst_14 : f32 to vector<8x8xf32>
    %25 = arith.select %23, %24, %19 : vector<8x8xi1>, vector<8x8xf32>
    %cst_15 = arith.constant dense<0xFF800000> : vector<8xf32>
    %26 = vector.multi_reduction <maximumf>, %25, %cst_15 [1] : vector<8x8xf32> to vector<8xf32>
    %27 = vector.shape_cast %26 : vector<8xf32> to vector<8x1xf32>
    %28 = vector.broadcast %27 : vector<8x1xf32> to vector<8x8xf32>
    %29 = arith.subf %25, %28 : vector<8x8xf32>
    %30 = math.exp %29 : vector<8x8xf32>
    %cst_16 = arith.constant dense<0.000000e+00> : vector<8xf32>
    %31 = vector.multi_reduction <add>, %30, %cst_16 [1] : vector<8x8xf32> to vector<8xf32>
    %32 = vector.shape_cast %31 : vector<8xf32> to vector<8x1xf32>
    %33 = tpu.reciprocal %32 {approx = true} : vector<8x1xf32> -> vector<8x1xf32>
    %34 = vector.broadcast %33 : vector<8x1xf32> to vector<8x8xf32>
    %35 = arith.mulf %30, %34 : vector<8x8xf32>
    %36 = vector.extract_strided_slice %13 {offsets = [0, 0], sizes = [8, 8], strides = [1, 1]} : vector<8x32xf32> to vector<8x8xf32>
    %cst_17 = arith.constant dense<0.000000e+00> : vector<8x8xf32>
    %37 = tpu.matmul %35, %36, %cst_17 {dimension_numbers = #tpu.dot_dimension_numbers<[1], [0], [0], [1], [0, 0, 1, 1], [], []>} : vector<8x8xf32>, vector<8x8xf32>, vector<8x8xf32> -> vector<8x8xf32>
    %38 = vector.extract_strided_slice %11 {offsets = [0, 8], sizes = [8, 8], strides = [1, 1]} : vector<8x32xf32> to vector<8x8xf32>
    %39 = vector.extract_strided_slice %12 {offsets = [0, 8], sizes = [8, 8], strides = [1, 1]} : vector<8x32xf32> to vector<8x8xf32>
    %40 = tpu.transpose %39, [1, 0] : vector<8x8xf32> -> vector<8x8xf32>
    %cst_18 = arith.constant dense<0.000000e+00> : vector<8x8xf32>
    %41 = tpu.matmul %38, %40, %cst_18 {dimension_numbers = #tpu.dot_dimension_numbers<[1], [0], [0], [1], [0, 0, 1, 1], [], []>} : vector<8x8xf32>, vector<8x8xf32>, vector<8x8xf32> -> vector<8x8xf32>
    %cst_19 = arith.constant 0.353553385 : f32
    %42 = vector.broadcast %cst_19 : f32 to vector<8x8xf32>
    %43 = arith.mulf %41, %42 : vector<8x8xf32>
    %cst_20 = arith.constant 0.000000e+00 : f32
    %44 = vector.broadcast %cst_20 : f32 to vector<1x8xf32>
    %45 = arith.cmpf oeq, %3, %44 : vector<1x8xf32>
    %cst_21 = arith.constant -1.000000e+04 : f32
    %46 = vector.shape_cast %45 : vector<1x8xi1> to vector<1x8xi1>
    %47 = vector.broadcast %46 : vector<1x8xi1> to vector<8x8xi1>
    %48 = vector.broadcast %cst_21 : f32 to vector<8x8xf32>
    %49 = arith.select %47, %48, %43 : vector<8x8xi1>, vector<8x8xf32>
    %cst_22 = arith.constant dense<0xFF800000> : vector<8xf32>
    %50 = vector.multi_reduction <maximumf>, %49, %cst_22 [1] : vector<8x8xf32> to vector<8xf32>
    %51 = vector.shape_cast %50 : vector<8xf32> to vector<8x1xf32>
    %52 = vector.broadcast %51 : vector<8x1xf32> to vector<8x8xf32>
    %53 = arith.subf %49, %52 : vector<8x8xf32>
    %54 = math.exp %53 : vector<8x8xf32>
    %cst_23 = arith.constant dense<0.000000e+00> : vector<8xf32>
    %55 = vector.multi_reduction <add>, %54, %cst_23 [1] : vector<8x8xf32> to vector<8xf32>
    %56 = vector.shape_cast %55 : vector<8xf32> to vector<8x1xf32>
    %57 = tpu.reciprocal %56 {approx = true} : vector<8x1xf32> -> vector<8x1xf32>
    %58 = vector.broadcast %57 : vector<8x1xf32> to vector<8x8xf32>
    %59 = arith.mulf %54, %58 : vector<8x8xf32>
    %60 = vector.extract_strided_slice %13 {offsets = [0, 8], sizes = [8, 8], strides = [1, 1]} : vector<8x32xf32> to vector<8x8xf32>
    %cst_24 = arith.constant dense<0.000000e+00> : vector<8x8xf32>
    %61 = tpu.matmul %59, %60, %cst_24 {dimension_numbers = #tpu.dot_dimension_numbers<[1], [0], [0], [1], [0, 0, 1, 1], [], []>} : vector<8x8xf32>, vector<8x8xf32>, vector<8x8xf32> -> vector<8x8xf32>
    %62 = vector.extract_strided_slice %11 {offsets = [0, 16], sizes = [8, 8], strides = [1, 1]} : vector<8x32xf32> to vector<8x8xf32>
    %63 = vector.extract_strided_slice %12 {offsets = [0, 16], sizes = [8, 8], strides = [1, 1]} : vector<8x32xf32> to vector<8x8xf32>
    %64 = tpu.transpose %63, [1, 0] : vector<8x8xf32> -> vector<8x8xf32>
    %cst_25 = arith.constant dense<0.000000e+00> : vector<8x8xf32>
    %65 = tpu.matmul %62, %64, %cst_25 {dimension_numbers = #tpu.dot_dimension_numbers<[1], [0], [0], [1], [0, 0, 1, 1], [], []>} : vector<8x8xf32>, vector<8x8xf32>, vector<8x8xf32> -> vector<8x8xf32>
    %cst_26 = arith.constant 0.353553385 : f32
    %66 = vector.broadcast %cst_26 : f32 to vector<8x8xf32>
    %67 = arith.mulf %65, %66 : vector<8x8xf32>
    %cst_27 = arith.constant 0.000000e+00 : f32
    %68 = vector.broadcast %cst_27 : f32 to vector<1x8xf32>
    %69 = arith.cmpf oeq, %3, %68 : vector<1x8xf32>
    %cst_28 = arith.constant -1.000000e+04 : f32
    %70 = vector.shape_cast %69 : vector<1x8xi1> to vector<1x8xi1>
    %71 = vector.broadcast %70 : vector<1x8xi1> to vector<8x8xi1>
    %72 = vector.broadcast %cst_28 : f32 to vector<8x8xf32>
    %73 = arith.select %71, %72, %67 : vector<8x8xi1>, vector<8x8xf32>
    %cst_29 = arith.constant dense<0xFF800000> : vector<8xf32>
    %74 = vector.multi_reduction <maximumf>, %73, %cst_29 [1] : vector<8x8xf32> to vector<8xf32>
    %75 = vector.shape_cast %74 : vector<8xf32> to vector<8x1xf32>
    %76 = vector.broadcast %75 : vector<8x1xf32> to vector<8x8xf32>
    %77 = arith.subf %73, %76 : vector<8x8xf32>
    %78 = math.exp %77 : vector<8x8xf32>
    %cst_30 = arith.constant dense<0.000000e+00> : vector<8xf32>
    %79 = vector.multi_reduction <add>, %78, %cst_30 [1] : vector<8x8xf32> to vector<8xf32>
    %80 = vector.shape_cast %79 : vector<8xf32> to vector<8x1xf32>
    %81 = tpu.reciprocal %80 {approx = true} : vector<8x1xf32> -> vector<8x1xf32>
    %82 = vector.broadcast %81 : vector<8x1xf32> to vector<8x8xf32>
    %83 = arith.mulf %78, %82 : vector<8x8xf32>
    %84 = vector.extract_strided_slice %13 {offsets = [0, 16], sizes = [8, 8], strides = [1, 1]} : vector<8x32xf32> to vector<8x8xf32>
    %cst_31 = arith.constant dense<0.000000e+00> : vector<8x8xf32>
    %85 = tpu.matmul %83, %84, %cst_31 {dimension_numbers = #tpu.dot_dimension_numbers<[1], [0], [0], [1], [0, 0, 1, 1], [], []>} : vector<8x8xf32>, vector<8x8xf32>, vector<8x8xf32> -> vector<8x8xf32>
    %86 = vector.extract_strided_slice %11 {offsets = [0, 24], sizes = [8, 8], strides = [1, 1]} : vector<8x32xf32> to vector<8x8xf32>
    %87 = vector.extract_strided_slice %12 {offsets = [0, 24], sizes = [8, 8], strides = [1, 1]} : vector<8x32xf32> to vector<8x8xf32>
    %88 = tpu.transpose %87, [1, 0] : vector<8x8xf32> -> vector<8x8xf32>
    %cst_32 = arith.constant dense<0.000000e+00> : vector<8x8xf32>
    %89 = tpu.matmul %86, %88, %cst_32 {dimension_numbers = #tpu.dot_dimension_numbers<[1], [0], [0], [1], [0, 0, 1, 1], [], []>} : vector<8x8xf32>, vector<8x8xf32>, vector<8x8xf32> -> vector<8x8xf32>
    %cst_33 = arith.constant 0.353553385 : f32
    %90 = vector.broadcast %cst_33 : f32 to vector<8x8xf32>
    %91 = arith.mulf %89, %90 : vector<8x8xf32>
    %cst_34 = arith.constant 0.000000e+00 : f32
    %92 = vector.broadcast %cst_34 : f32 to vector<1x8xf32>
    %93 = arith.cmpf oeq, %3, %92 : vector<1x8xf32>
    %cst_35 = arith.constant -1.000000e+04 : f32
    %94 = vector.shape_cast %93 : vector<1x8xi1> to vector<1x8xi1>
    %95 = vector.broadcast %94 : vector<1x8xi1> to vector<8x8xi1>
    %96 = vector.broadcast %cst_35 : f32 to vector<8x8xf32>
    %97 = arith.select %95, %96, %91 : vector<8x8xi1>, vector<8x8xf32>
    %cst_36 = arith.constant dense<0xFF800000> : vector<8xf32>
    %98 = vector.multi_reduction <maximumf>, %97, %cst_36 [1] : vector<8x8xf32> to vector<8xf32>
    %99 = vector.shape_cast %98 : vector<8xf32> to vector<8x1xf32>
    %100 = vector.broadcast %99 : vector<8x1xf32> to vector<8x8xf32>
    %101 = arith.subf %97, %100 : vector<8x8xf32>
    %102 = math.exp %101 : vector<8x8xf32>
    %cst_37 = arith.constant dense<0.000000e+00> : vector<8xf32>
    %103 = vector.multi_reduction <add>, %102, %cst_37 [1] : vector<8x8xf32> to vector<8xf32>
    %104 = vector.shape_cast %103 : vector<8xf32> to vector<8x1xf32>
    %105 = tpu.reciprocal %104 {approx = true} : vector<8x1xf32> -> vector<8x1xf32>
    %106 = vector.broadcast %105 : vector<8x1xf32> to vector<8x8xf32>
    %107 = arith.mulf %102, %106 : vector<8x8xf32>
    %108 = vector.extract_strided_slice %13 {offsets = [0, 24], sizes = [8, 8], strides = [1, 1]} : vector<8x32xf32> to vector<8x8xf32>
    %cst_38 = arith.constant dense<0.000000e+00> : vector<8x8xf32>
    %109 = tpu.matmul %107, %108, %cst_38 {dimension_numbers = #tpu.dot_dimension_numbers<[1], [0], [0], [1], [0, 0, 1, 1], [], []>} : vector<8x8xf32>, vector<8x8xf32>, vector<8x8xf32> -> vector<8x8xf32>
    %110 = tpu.concatenate %37, %61, %85, %109 in 1 : vector<8x8xf32>, vector<8x8xf32>, vector<8x8xf32>, vector<8x8xf32> -> vector<8x32xf32>
    %c0_39 = arith.constant 0 : index
    %c0_40 = arith.constant 0 : index
    %c0_41 = arith.constant 0 : index
    %111 = vector.load %arg5[%c0_39, %c0_40, %c0_41] : memref<2x32x32xf32, #tpu.memory_space<vmem>>, vector<1x32x32xf32>
    %112 = vector.shape_cast %111 : vector<1x32x32xf32> to vector<32x32xf32>
    %cst_42 = arith.constant dense<0.000000e+00> : vector<8x32xf32>
    %113 = tpu.matmul %110, %112, %cst_42 {dimension_numbers = #tpu.dot_dimension_numbers<[1], [0], [0], [1], [0, 0, 1, 1], [], []>} : vector<8x32xf32>, vector<32x32xf32>, vector<8x32xf32> -> vector<8x32xf32>
    %c0_43 = arith.constant 0 : index
    %c0_44 = arith.constant 0 : index
    %c0_45 = arith.constant 0 : index
    %114 = vector.load %arg6[%c0_43, %c0_44, %c0_45] : memref<2x1x32xf32, #tpu.memory_space<vmem>>, vector<1x1x32xf32>
    %115 = vector.shape_cast %114 : vector<1x1x32xf32> to vector<1x32xf32>
    %116 = vector.broadcast %115 : vector<1x32xf32> to vector<8x32xf32>
    %117 = arith.addf %113, %116 : vector<8x32xf32>
    %118 = arith.addf %117, %1 : vector<8x32xf32>
    %c0_46 = arith.constant 0 : index
    %c0_47 = arith.constant 0 : index
    %c0_48 = arith.constant 0 : index
    %119 = vector.load %arg7[%c0_46, %c0_47, %c0_48] : memref<2x1x32xf32, #tpu.memory_space<vmem>>, vector<1x1x32xf32>
    %120 = vector.shape_cast %119 : vector<1x1x32xf32> to vector<1x32xf32>
    %c0_49 = arith.constant 0 : index
    %c0_50 = arith.constant 0 : index
    %c0_51 = arith.constant 0 : index
    %121 = vector.load %arg8[%c0_49, %c0_50, %c0_51] : memref<2x1x32xf32, #tpu.memory_space<vmem>>, vector<1x1x32xf32>
    %122 = vector.shape_cast %121 : vector<1x1x32xf32> to vector<1x32xf32>
    %cst_52 = arith.constant dense<0.000000e+00> : vector<8xf32>
    %123 = vector.multi_reduction <add>, %118, %cst_52 [1] : vector<8x32xf32> to vector<8xf32>
    %124 = vector.shape_cast %123 : vector<8xf32> to vector<8x1xf32>
    %cst_53 = arith.constant 3.200000e+01 : f32
    %125 = vector.broadcast %cst_53 : f32 to vector<8x1xf32>
    %126 = arith.divf %124, %125 : vector<8x1xf32>
    %127 = vector.broadcast %126 : vector<8x1xf32> to vector<8x32xf32>
    %128 = arith.subf %118, %127 : vector<8x32xf32>
    %129 = arith.mulf %128, %128 : vector<8x32xf32>
    %cst_54 = arith.constant dense<0.000000e+00> : vector<8xf32>
    %130 = vector.multi_reduction <add>, %129, %cst_54 [1] : vector<8x32xf32> to vector<8xf32>
    %131 = vector.shape_cast %130 : vector<8xf32> to vector<8x1xf32>
    %cst_55 = arith.constant 3.200000e+01 : f32
    %132 = vector.broadcast %cst_55 : f32 to vector<8x1xf32>
    %133 = arith.divf %131, %132 : vector<8x1xf32>
    %134 = vector.broadcast %126 : vector<8x1xf32> to vector<8x32xf32>
    %135 = arith.subf %118, %134 : vector<8x32xf32>
    %cst_56 = arith.constant 9.99999996E-13 : f32
    %136 = vector.broadcast %cst_56 : f32 to vector<8x1xf32>
    %137 = arith.addf %133, %136 : vector<8x1xf32>
    %138 = math.rsqrt %137 : vector<8x1xf32>
    %139 = vector.broadcast %138 : vector<8x1xf32> to vector<8x32xf32>
    %140 = arith.mulf %135, %139 : vector<8x32xf32>
    %141 = vector.broadcast %120 : vector<1x32xf32> to vector<8x32xf32>
    %142 = arith.mulf %140, %141 : vector<8x32xf32>
    %143 = vector.broadcast %122 : vector<1x32xf32> to vector<8x32xf32>
    %144 = arith.addf %142, %143 : vector<8x32xf32>
    %c0_57 = arith.constant 0 : index
    %c0_58 = arith.constant 0 : index
    %c0_59 = arith.constant 0 : index
    %145 = vector.load %arg9[%c0_57, %c0_58, %c0_59] : memref<2x32x64xf32, #tpu.memory_space<vmem>>, vector<1x32x64xf32>
    %146 = vector.shape_cast %145 : vector<1x32x64xf32> to vector<32x64xf32>
    %cst_60 = arith.constant dense<0.000000e+00> : vector<8x64xf32>
    %147 = tpu.matmul %144, %146, %cst_60 {dimension_numbers = #tpu.dot_dimension_numbers<[1], [0], [0], [1], [0, 0, 1, 1], [], []>} : vector<8x32xf32>, vector<32x64xf32>, vector<8x64xf32> -> vector<8x64xf32>
    %c0_61 = arith.constant 0 : index
    %c0_62 = arith.constant 0 : index
    %c0_63 = arith.constant 0 : index
    %148 = vector.load %arg10[%c0_61, %c0_62, %c0_63] : memref<2x1x64xf32, #tpu.memory_space<vmem>>, vector<1x1x64xf32>
    %149 = vector.shape_cast %148 : vector<1x1x64xf32> to vector<1x64xf32>
    %150 = vector.broadcast %149 : vector<1x64xf32> to vector<8x64xf32>
    %151 = arith.addf %147, %150 : vector<8x64xf32>
    %cst_64 = arith.constant 0.000000e+00 : f32
    %152 = vector.broadcast %cst_64 : f32 to vector<8x64xf32>
    %153 = arith.maximumf %151, %152 : vector<8x64xf32>
    %c0_65 = arith.constant 0 : index
    %c0_66 = arith.constant 0 : index
    %c0_67 = arith.constant 0 : index
    %154 = vector.load %arg11[%c0_65, %c0_66, %c0_67] : memref<2x64x32xf32, #tpu.memory_space<vmem>>, vector<1x64x32xf32>
    %155 = vector.shape_cast %154 : vector<1x64x32xf32> to vector<64x32xf32>
    %cst_68 = arith.constant dense<0.000000e+00> : vector<8x32xf32>
    %156 = tpu.matmul %153, %155, %cst_68 {dimension_numbers = #tpu.dot_dimension_numbers<[1], [0], [0], [1], [0, 0, 1, 1], [], []>} : vector<8x64xf32>, vector<64x32xf32>, vector<8x32xf32> -> vector<8x32xf32>
    %c0_69 = arith.constant 0 : index
    %c0_70 = arith.constant 0 : index
    %c0_71 = arith.constant 0 : index
    %157 = vector.load %arg12[%c0_69, %c0_70, %c0_71] : memref<2x1x32xf32, #tpu.memory_space<vmem>>, vector<1x1x32xf32>
    %158 = vector.shape_cast %157 : vector<1x1x32xf32> to vector<1x32xf32>
    %159 = vector.broadcast %158 : vector<1x32xf32> to vector<8x32xf32>
    %160 = arith.addf %156, %159 : vector<8x32xf32>
    %161 = arith.addf %160, %144 : vector<8x32xf32>
    %c0_72 = arith.constant 0 : index
    %c0_73 = arith.constant 0 : index
    %c0_74 = arith.constant 0 : index
    %162 = vector.load %arg13[%c0_72, %c0_73, %c0_74] : memref<2x1x32xf32, #tpu.memory_space<vmem>>, vector<1x1x32xf32>
    %163 = vector.shape_cast %162 : vector<1x1x32xf32> to vector<1x32xf32>
    %c0_75 = arith.constant 0 : index
    %c0_76 = arith.constant 0 : index
    %c0_77 = arith.constant 0 : index
    %164 = vector.load %arg14[%c0_75, %c0_76, %c0_77] : memref<2x1x32xf32, #tpu.memory_space<vmem>>, vector<1x1x32xf32>
    %165 = vector.shape_cast %164 : vector<1x1x32xf32> to vector<1x32xf32>
    %cst_78 = arith.constant dense<0.000000e+00> : vector<8xf32>
    %166 = vector.multi_reduction <add>, %161, %cst_78 [1] : vector<8x32xf32> to vector<8xf32>
    %167 = vector.shape_cast %166 : vector<8xf32> to vector<8x1xf32>
    %cst_79 = arith.constant 3.200000e+01 : f32
    %168 = vector.broadcast %cst_79 : f32 to vector<8x1xf32>
    %169 = arith.divf %167, %168 : vector<8x1xf32>
    %170 = vector.broadcast %169 : vector<8x1xf32> to vector<8x32xf32>
    %171 = arith.subf %161, %170 : vector<8x32xf32>
    %172 = arith.mulf %171, %171 : vector<8x32xf32>
    %cst_80 = arith.constant dense<0.000000e+00> : vector<8xf32>
    %173 = vector.multi_reduction <add>, %172, %cst_80 [1] : vector<8x32xf32> to vector<8xf32>
    %174 = vector.shape_cast %173 : vector<8xf32> to vector<8x1xf32>
    %cst_81 = arith.constant 3.200000e+01 : f32
    %175 = vector.broadcast %cst_81 : f32 to vector<8x1xf32>
    %176 = arith.divf %174, %175 : vector<8x1xf32>
    %177 = vector.broadcast %169 : vector<8x1xf32> to vector<8x32xf32>
    %178 = arith.subf %161, %177 : vector<8x32xf32>
    %cst_82 = arith.constant 9.99999996E-13 : f32
    %179 = vector.broadcast %cst_82 : f32 to vector<8x1xf32>
    %180 = arith.addf %176, %179 : vector<8x1xf32>
    %181 = math.rsqrt %180 : vector<8x1xf32>
    %182 = vector.broadcast %181 : vector<8x1xf32> to vector<8x32xf32>
    %183 = arith.mulf %178, %182 : vector<8x32xf32>
    %184 = vector.broadcast %163 : vector<1x32xf32> to vector<8x32xf32>
    %185 = arith.mulf %183, %184 : vector<8x32xf32>
    %186 = vector.broadcast %165 : vector<1x32xf32> to vector<8x32xf32>
    %187 = arith.addf %185, %186 : vector<8x32xf32>
    %c1 = arith.constant 1 : index
    %c0_83 = arith.constant 0 : index
    %c0_84 = arith.constant 0 : index
    %188 = vector.load %arg3[%c1, %c0_83, %c0_84] : memref<2x32x96xf32, #tpu.memory_space<vmem>>, vector<1x32x96xf32>
    %189 = vector.shape_cast %188 : vector<1x32x96xf32> to vector<32x96xf32>
    %cst_85 = arith.constant dense<0.000000e+00> : vector<8x96xf32>
    %190 = tpu.matmul %187, %189, %cst_85 {dimension_numbers = #tpu.dot_dimension_numbers<[1], [0], [0], [1], [0, 0, 1, 1], [], []>} : vector<8x32xf32>, vector<32x96xf32>, vector<8x96xf32> -> vector<8x96xf32>
    %c1_86 = arith.constant 1 : index
    %c0_87 = arith.constant 0 : index
    %c0_88 = arith.constant 0 : index
    %191 = vector.load %arg4[%c1_86, %c0_87, %c0_88] : memref<2x1x96xf32, #tpu.memory_space<vmem>>, vector<1x1x96xf32>
    %192 = vector.shape_cast %191 : vector<1x1x96xf32> to vector<1x96xf32>
    %193 = vector.broadcast %192 : vector<1x96xf32> to vector<8x96xf32>
    %194 = arith.addf %190, %193 : vector<8x96xf32>
    %195 = vector.extract_strided_slice %194 {offsets = [0, 0], sizes = [8, 32], strides = [1, 1]} : vector<8x96xf32> to vector<8x32xf32>
    %196 = vector.extract_strided_slice %194 {offsets = [0, 32], sizes = [8, 32], strides = [1, 1]} : vector<8x96xf32> to vector<8x32xf32>
    %197 = vector.extract_strided_slice %194 {offsets = [0, 64], sizes = [8, 32], strides = [1, 1]} : vector<8x96xf32> to vector<8x32xf32>
    %198 = vector.extract_strided_slice %195 {offsets = [0, 0], sizes = [8, 8], strides = [1, 1]} : vector<8x32xf32> to vector<8x8xf32>
    %199 = vector.extract_strided_slice %196 {offsets = [0, 0], sizes = [8, 8], strides = [1, 1]} : vector<8x32xf32> to vector<8x8xf32>
    %200 = tpu.transpose %199, [1, 0] : vector<8x8xf32> -> vector<8x8xf32>
    %cst_89 = arith.constant dense<0.000000e+00> : vector<8x8xf32>
    %201 = tpu.matmul %198, %200, %cst_89 {dimension_numbers = #tpu.dot_dimension_numbers<[1], [0], [0], [1], [0, 0, 1, 1], [], []>} : vector<8x8xf32>, vector<8x8xf32>, vector<8x8xf32> -> vector<8x8xf32>
    %cst_90 = arith.constant 0.353553385 : f32
    %202 = vector.broadcast %cst_90 : f32 to vector<8x8xf32>
    %203 = arith.mulf %201, %202 : vector<8x8xf32>
    %cst_91 = arith.constant 0.000000e+00 : f32
    %204 = vector.broadcast %cst_91 : f32 to vector<1x8xf32>
    %205 = arith.cmpf oeq, %3, %204 : vector<1x8xf32>
    %cst_92 = arith.constant -1.000000e+04 : f32
    %206 = vector.shape_cast %205 : vector<1x8xi1> to vector<1x8xi1>
    %207 = vector.broadcast %206 : vector<1x8xi1> to vector<8x8xi1>
    %208 = vector.broadcast %cst_92 : f32 to vector<8x8xf32>
    %209 = arith.select %207, %208, %203 : vector<8x8xi1>, vector<8x8xf32>
    %cst_93 = arith.constant dense<0xFF800000> : vector<8xf32>
    %210 = vector.multi_reduction <maximumf>, %209, %cst_93 [1] : vector<8x8xf32> to vector<8xf32>
    %211 = vector.shape_cast %210 : vector<8xf32> to vector<8x1xf32>
    %212 = vector.broadcast %211 : vector<8x1xf32> to vector<8x8xf32>
    %213 = arith.subf %209, %212 : vector<8x8xf32>
    %214 = math.exp %213 : vector<8x8xf32>
    %cst_94 = arith.constant dense<0.000000e+00> : vector<8xf32>
    %215 = vector.multi_reduction <add>, %214, %cst_94 [1] : vector<8x8xf32> to vector<8xf32>
    %216 = vector.shape_cast %215 : vector<8xf32> to vector<8x1xf32>
    %217 = tpu.reciprocal %216 {approx = true} : vector<8x1xf32> -> vector<8x1xf32>
    %218 = vector.broadcast %217 : vector<8x1xf32> to vector<8x8xf32>
    %219 = arith.mulf %214, %218 : vector<8x8xf32>
    %220 = vector.extract_strided_slice %197 {offsets = [0, 0], sizes = [8, 8], strides = [1, 1]} : vector<8x32xf32> to vector<8x8xf32>
    %cst_95 = arith.constant dense<0.000000e+00> : vector<8x8xf32>
    %221 = tpu.matmul %219, %220, %cst_95 {dimension_numbers = #tpu.dot_dimension_numbers<[1], [0], [0], [1], [0, 0, 1, 1], [], []>} : vector<8x8xf32>, vector<8x8xf32>, vector<8x8xf32> -> vector<8x8xf32>
    %222 = vector.extract_strided_slice %195 {offsets = [0, 8], sizes = [8, 8], strides = [1, 1]} : vector<8x32xf32> to vector<8x8xf32>
    %223 = vector.extract_strided_slice %196 {offsets = [0, 8], sizes = [8, 8], strides = [1, 1]} : vector<8x32xf32> to vector<8x8xf32>
    %224 = tpu.transpose %223, [1, 0] : vector<8x8xf32> -> vector<8x8xf32>
    %cst_96 = arith.constant dense<0.000000e+00> : vector<8x8xf32>
    %225 = tpu.matmul %222, %224, %cst_96 {dimension_numbers = #tpu.dot_dimension_numbers<[1], [0], [0], [1], [0, 0, 1, 1], [], []>} : vector<8x8xf32>, vector<8x8xf32>, vector<8x8xf32> -> vector<8x8xf32>
    %cst_97 = arith.constant 0.353553385 : f32
    %226 = vector.broadcast %cst_97 : f32 to vector<8x8xf32>
    %227 = arith.mulf %225, %226 : vector<8x8xf32>
    %cst_98 = arith.constant 0.000000e+00 : f32
    %228 = vector.broadcast %cst_98 : f32 to vector<1x8xf32>
    %229 = arith.cmpf oeq, %3, %228 : vector<1x8xf32>
    %cst_99 = arith.constant -1.000000e+04 : f32
    %230 = vector.shape_cast %229 : vector<1x8xi1> to vector<1x8xi1>
    %231 = vector.broadcast %230 : vector<1x8xi1> to vector<8x8xi1>
    %232 = vector.broadcast %cst_99 : f32 to vector<8x8xf32>
    %233 = arith.select %231, %232, %227 : vector<8x8xi1>, vector<8x8xf32>
    %cst_100 = arith.constant dense<0xFF800000> : vector<8xf32>
    %234 = vector.multi_reduction <maximumf>, %233, %cst_100 [1] : vector<8x8xf32> to vector<8xf32>
    %235 = vector.shape_cast %234 : vector<8xf32> to vector<8x1xf32>
    %236 = vector.broadcast %235 : vector<8x1xf32> to vector<8x8xf32>
    %237 = arith.subf %233, %236 : vector<8x8xf32>
    %238 = math.exp %237 : vector<8x8xf32>
    %cst_101 = arith.constant dense<0.000000e+00> : vector<8xf32>
    %239 = vector.multi_reduction <add>, %238, %cst_101 [1] : vector<8x8xf32> to vector<8xf32>
    %240 = vector.shape_cast %239 : vector<8xf32> to vector<8x1xf32>
    %241 = tpu.reciprocal %240 {approx = true} : vector<8x1xf32> -> vector<8x1xf32>
    %242 = vector.broadcast %241 : vector<8x1xf32> to vector<8x8xf32>
    %243 = arith.mulf %238, %242 : vector<8x8xf32>
    %244 = vector.extract_strided_slice %197 {offsets = [0, 8], sizes = [8, 8], strides = [1, 1]} : vector<8x32xf32> to vector<8x8xf32>
    %cst_102 = arith.constant dense<0.000000e+00> : vector<8x8xf32>
    %245 = tpu.matmul %243, %244, %cst_102 {dimension_numbers = #tpu.dot_dimension_numbers<[1], [0], [0], [1], [0, 0, 1, 1], [], []>} : vector<8x8xf32>, vector<8x8xf32>, vector<8x8xf32> -> vector<8x8xf32>
    %246 = vector.extract_strided_slice %195 {offsets = [0, 16], sizes = [8, 8], strides = [1, 1]} : vector<8x32xf32> to vector<8x8xf32>
    %247 = vector.extract_strided_slice %196 {offsets = [0, 16], sizes = [8, 8], strides = [1, 1]} : vector<8x32xf32> to vector<8x8xf32>
    %248 = tpu.transpose %247, [1, 0] : vector<8x8xf32> -> vector<8x8xf32>
    %cst_103 = arith.constant dense<0.000000e+00> : vector<8x8xf32>
    %249 = tpu.matmul %246, %248, %cst_103 {dimension_numbers = #tpu.dot_dimension_numbers<[1], [0], [0], [1], [0, 0, 1, 1], [], []>} : vector<8x8xf32>, vector<8x8xf32>, vector<8x8xf32> -> vector<8x8xf32>
    %cst_104 = arith.constant 0.353553385 : f32
    %250 = vector.broadcast %cst_104 : f32 to vector<8x8xf32>
    %251 = arith.mulf %249, %250 : vector<8x8xf32>
    %cst_105 = arith.constant 0.000000e+00 : f32
    %252 = vector.broadcast %cst_105 : f32 to vector<1x8xf32>
    %253 = arith.cmpf oeq, %3, %252 : vector<1x8xf32>
    %cst_106 = arith.constant -1.000000e+04 : f32
    %254 = vector.shape_cast %253 : vector<1x8xi1> to vector<1x8xi1>
    %255 = vector.broadcast %254 : vector<1x8xi1> to vector<8x8xi1>
    %256 = vector.broadcast %cst_106 : f32 to vector<8x8xf32>
    %257 = arith.select %255, %256, %251 : vector<8x8xi1>, vector<8x8xf32>
    %cst_107 = arith.constant dense<0xFF800000> : vector<8xf32>
    %258 = vector.multi_reduction <maximumf>, %257, %cst_107 [1] : vector<8x8xf32> to vector<8xf32>
    %259 = vector.shape_cast %258 : vector<8xf32> to vector<8x1xf32>
    %260 = vector.broadcast %259 : vector<8x1xf32> to vector<8x8xf32>
    %261 = arith.subf %257, %260 : vector<8x8xf32>
    %262 = math.exp %261 : vector<8x8xf32>
    %cst_108 = arith.constant dense<0.000000e+00> : vector<8xf32>
    %263 = vector.multi_reduction <add>, %262, %cst_108 [1] : vector<8x8xf32> to vector<8xf32>
    %264 = vector.shape_cast %263 : vector<8xf32> to vector<8x1xf32>
    %265 = tpu.reciprocal %264 {approx = true} : vector<8x1xf32> -> vector<8x1xf32>
    %266 = vector.broadcast %265 : vector<8x1xf32> to vector<8x8xf32>
    %267 = arith.mulf %262, %266 : vector<8x8xf32>
    %268 = vector.extract_strided_slice %197 {offsets = [0, 16], sizes = [8, 8], strides = [1, 1]} : vector<8x32xf32> to vector<8x8xf32>
    %cst_109 = arith.constant dense<0.000000e+00> : vector<8x8xf32>
    %269 = tpu.matmul %267, %268, %cst_109 {dimension_numbers = #tpu.dot_dimension_numbers<[1], [0], [0], [1], [0, 0, 1, 1], [], []>} : vector<8x8xf32>, vector<8x8xf32>, vector<8x8xf32> -> vector<8x8xf32>
    %270 = vector.extract_strided_slice %195 {offsets = [0, 24], sizes = [8, 8], strides = [1, 1]} : vector<8x32xf32> to vector<8x8xf32>
    %271 = vector.extract_strided_slice %196 {offsets = [0, 24], sizes = [8, 8], strides = [1, 1]} : vector<8x32xf32> to vector<8x8xf32>
    %272 = tpu.transpose %271, [1, 0] : vector<8x8xf32> -> vector<8x8xf32>
    %cst_110 = arith.constant dense<0.000000e+00> : vector<8x8xf32>
    %273 = tpu.matmul %270, %272, %cst_110 {dimension_numbers = #tpu.dot_dimension_numbers<[1], [0], [0], [1], [0, 0, 1, 1], [], []>} : vector<8x8xf32>, vector<8x8xf32>, vector<8x8xf32> -> vector<8x8xf32>
    %cst_111 = arith.constant 0.353553385 : f32
    %274 = vector.broadcast %cst_111 : f32 to vector<8x8xf32>
    %275 = arith.mulf %273, %274 : vector<8x8xf32>
    %cst_112 = arith.constant 0.000000e+00 : f32
    %276 = vector.broadcast %cst_112 : f32 to vector<1x8xf32>
    %277 = arith.cmpf oeq, %3, %276 : vector<1x8xf32>
    %cst_113 = arith.constant -1.000000e+04 : f32
    %278 = vector.shape_cast %277 : vector<1x8xi1> to vector<1x8xi1>
    %279 = vector.broadcast %278 : vector<1x8xi1> to vector<8x8xi1>
    %280 = vector.broadcast %cst_113 : f32 to vector<8x8xf32>
    %281 = arith.select %279, %280, %275 : vector<8x8xi1>, vector<8x8xf32>
    %cst_114 = arith.constant dense<0xFF800000> : vector<8xf32>
    %282 = vector.multi_reduction <maximumf>, %281, %cst_114 [1] : vector<8x8xf32> to vector<8xf32>
    %283 = vector.shape_cast %282 : vector<8xf32> to vector<8x1xf32>
    %284 = vector.broadcast %283 : vector<8x1xf32> to vector<8x8xf32>
    %285 = arith.subf %281, %284 : vector<8x8xf32>
    %286 = math.exp %285 : vector<8x8xf32>
    %cst_115 = arith.constant dense<0.000000e+00> : vector<8xf32>
    %287 = vector.multi_reduction <add>, %286, %cst_115 [1] : vector<8x8xf32> to vector<8xf32>
    %288 = vector.shape_cast %287 : vector<8xf32> to vector<8x1xf32>
    %289 = tpu.reciprocal %288 {approx = true} : vector<8x1xf32> -> vector<8x1xf32>
    %290 = vector.broadcast %289 : vector<8x1xf32> to vector<8x8xf32>
    %291 = arith.mulf %286, %290 : vector<8x8xf32>
    %292 = vector.extract_strided_slice %197 {offsets = [0, 24], sizes = [8, 8], strides = [1, 1]} : vector<8x32xf32> to vector<8x8xf32>
    %cst_116 = arith.constant dense<0.000000e+00> : vector<8x8xf32>
    %293 = tpu.matmul %291, %292, %cst_116 {dimension_numbers = #tpu.dot_dimension_numbers<[1], [0], [0], [1], [0, 0, 1, 1], [], []>} : vector<8x8xf32>, vector<8x8xf32>, vector<8x8xf32> -> vector<8x8xf32>
    %294 = tpu.concatenate %221, %245, %269, %293 in 1 : vector<8x8xf32>, vector<8x8xf32>, vector<8x8xf32>, vector<8x8xf32> -> vector<8x32xf32>
    %c1_117 = arith.constant 1 : index
    %c0_118 = arith.constant 0 : index
    %c0_119 = arith.constant 0 : index
    %295 = vector.load %arg5[%c1_117, %c0_118, %c0_119] : memref<2x32x32xf32, #tpu.memory_space<vmem>>, vector<1x32x32xf32>
    %296 = vector.shape_cast %295 : vector<1x32x32xf32> to vector<32x32xf32>
    %cst_120 = arith.constant dense<0.000000e+00> : vector<8x32xf32>
    %297 = tpu.matmul %294, %296, %cst_120 {dimension_numbers = #tpu.dot_dimension_numbers<[1], [0], [0], [1], [0, 0, 1, 1], [], []>} : vector<8x32xf32>, vector<32x32xf32>, vector<8x32xf32> -> vector<8x32xf32>
    %c1_121 = arith.constant 1 : index
    %c0_122 = arith.constant 0 : index
    %c0_123 = arith.constant 0 : index
    %298 = vector.load %arg6[%c1_121, %c0_122, %c0_123] : memref<2x1x32xf32, #tpu.memory_space<vmem>>, vector<1x1x32xf32>
    %299 = vector.shape_cast %298 : vector<1x1x32xf32> to vector<1x32xf32>
    %300 = vector.broadcast %299 : vector<1x32xf32> to vector<8x32xf32>
    %301 = arith.addf %297, %300 : vector<8x32xf32>
    %302 = arith.addf %301, %187 : vector<8x32xf32>
    %c1_124 = arith.constant 1 : index
    %c0_125 = arith.constant 0 : index
    %c0_126 = arith.constant 0 : index
    %303 = vector.load %arg7[%c1_124, %c0_125, %c0_126] : memref<2x1x32xf32, #tpu.memory_space<vmem>>, vector<1x1x32xf32>
    %304 = vector.shape_cast %303 : vector<1x1x32xf32> to vector<1x32xf32>
    %c1_127 = arith.constant 1 : index
    %c0_128 = arith.constant 0 : index
    %c0_129 = arith.constant 0 : index
    %305 = vector.load %arg8[%c1_127, %c0_128, %c0_129] : memref<2x1x32xf32, #tpu.memory_space<vmem>>, vector<1x1x32xf32>
    %306 = vector.shape_cast %305 : vector<1x1x32xf32> to vector<1x32xf32>
    %cst_130 = arith.constant dense<0.000000e+00> : vector<8xf32>
    %307 = vector.multi_reduction <add>, %302, %cst_130 [1] : vector<8x32xf32> to vector<8xf32>
    %308 = vector.shape_cast %307 : vector<8xf32> to vector<8x1xf32>
    %cst_131 = arith.constant 3.200000e+01 : f32
    %309 = vector.broadcast %cst_131 : f32 to vector<8x1xf32>
    %310 = arith.divf %308, %309 : vector<8x1xf32>
    %311 = vector.broadcast %310 : vector<8x1xf32> to vector<8x32xf32>
    %312 = arith.subf %302, %311 : vector<8x32xf32>
    %313 = arith.mulf %312, %312 : vector<8x32xf32>
    %cst_132 = arith.constant dense<0.000000e+00> : vector<8xf32>
    %314 = vector.multi_reduction <add>, %313, %cst_132 [1] : vector<8x32xf32> to vector<8xf32>
    %315 = vector.shape_cast %314 : vector<8xf32> to vector<8x1xf32>
    %cst_133 = arith.constant 3.200000e+01 : f32
    %316 = vector.broadcast %cst_133 : f32 to vector<8x1xf32>
    %317 = arith.divf %315, %316 : vector<8x1xf32>
    %318 = vector.broadcast %310 : vector<8x1xf32> to vector<8x32xf32>
    %319 = arith.subf %302, %318 : vector<8x32xf32>
    %cst_134 = arith.constant 9.99999996E-13 : f32
    %320 = vector.broadcast %cst_134 : f32 to vector<8x1xf32>
    %321 = arith.addf %317, %320 : vector<8x1xf32>
    %322 = math.rsqrt %321 : vector<8x1xf32>
    %323 = vector.broadcast %322 : vector<8x1xf32> to vector<8x32xf32>
    %324 = arith.mulf %319, %323 : vector<8x32xf32>
    %325 = vector.broadcast %304 : vector<1x32xf32> to vector<8x32xf32>
    %326 = arith.mulf %324, %325 : vector<8x32xf32>
    %327 = vector.broadcast %306 : vector<1x32xf32> to vector<8x32xf32>
    %328 = arith.addf %326, %327 : vector<8x32xf32>
    %c1_135 = arith.constant 1 : index
    %c0_136 = arith.constant 0 : index
    %c0_137 = arith.constant 0 : index
    %329 = vector.load %arg9[%c1_135, %c0_136, %c0_137] : memref<2x32x64xf32, #tpu.memory_space<vmem>>, vector<1x32x64xf32>
    %330 = vector.shape_cast %329 : vector<1x32x64xf32> to vector<32x64xf32>
    %cst_138 = arith.constant dense<0.000000e+00> : vector<8x64xf32>
    %331 = tpu.matmul %328, %330, %cst_138 {dimension_numbers = #tpu.dot_dimension_numbers<[1], [0], [0], [1], [0, 0, 1, 1], [], []>} : vector<8x32xf32>, vector<32x64xf32>, vector<8x64xf32> -> vector<8x64xf32>
    %c1_139 = arith.constant 1 : index
    %c0_140 = arith.constant 0 : index
    %c0_141 = arith.constant 0 : index
    %332 = vector.load %arg10[%c1_139, %c0_140, %c0_141] : memref<2x1x64xf32, #tpu.memory_space<vmem>>, vector<1x1x64xf32>
    %333 = vector.shape_cast %332 : vector<1x1x64xf32> to vector<1x64xf32>
    %334 = vector.broadcast %333 : vector<1x64xf32> to vector<8x64xf32>
    %335 = arith.addf %331, %334 : vector<8x64xf32>
    %cst_142 = arith.constant 0.000000e+00 : f32
    %336 = vector.broadcast %cst_142 : f32 to vector<8x64xf32>
    %337 = arith.maximumf %335, %336 : vector<8x64xf32>
    %c1_143 = arith.constant 1 : index
    %c0_144 = arith.constant 0 : index
    %c0_145 = arith.constant 0 : index
    %338 = vector.load %arg11[%c1_143, %c0_144, %c0_145] : memref<2x64x32xf32, #tpu.memory_space<vmem>>, vector<1x64x32xf32>
    %339 = vector.shape_cast %338 : vector<1x64x32xf32> to vector<64x32xf32>
    %cst_146 = arith.constant dense<0.000000e+00> : vector<8x32xf32>
    %340 = tpu.matmul %337, %339, %cst_146 {dimension_numbers = #tpu.dot_dimension_numbers<[1], [0], [0], [1], [0, 0, 1, 1], [], []>} : vector<8x64xf32>, vector<64x32xf32>, vector<8x32xf32> -> vector<8x32xf32>
    %c1_147 = arith.constant 1 : index
    %c0_148 = arith.constant 0 : index
    %c0_149 = arith.constant 0 : index
    %341 = vector.load %arg12[%c1_147, %c0_148, %c0_149] : memref<2x1x32xf32, #tpu.memory_space<vmem>>, vector<1x1x32xf32>
    %342 = vector.shape_cast %341 : vector<1x1x32xf32> to vector<1x32xf32>
    %343 = vector.broadcast %342 : vector<1x32xf32> to vector<8x32xf32>
    %344 = arith.addf %340, %343 : vector<8x32xf32>
    %345 = arith.addf %344, %328 : vector<8x32xf32>
    %c1_150 = arith.constant 1 : index
    %c0_151 = arith.constant 0 : index
    %c0_152 = arith.constant 0 : index
    %346 = vector.load %arg13[%c1_150, %c0_151, %c0_152] : memref<2x1x32xf32, #tpu.memory_space<vmem>>, vector<1x1x32xf32>
    %347 = vector.shape_cast %346 : vector<1x1x32xf32> to vector<1x32xf32>
    %c1_153 = arith.constant 1 : index
    %c0_154 = arith.constant 0 : index
    %c0_155 = arith.constant 0 : index
    %348 = vector.load %arg14[%c1_153, %c0_154, %c0_155] : memref<2x1x32xf32, #tpu.memory_space<vmem>>, vector<1x1x32xf32>
    %349 = vector.shape_cast %348 : vector<1x1x32xf32> to vector<1x32xf32>
    %cst_156 = arith.constant dense<0.000000e+00> : vector<8xf32>
    %350 = vector.multi_reduction <add>, %345, %cst_156 [1] : vector<8x32xf32> to vector<8xf32>
    %351 = vector.shape_cast %350 : vector<8xf32> to vector<8x1xf32>
    %cst_157 = arith.constant 3.200000e+01 : f32
    %352 = vector.broadcast %cst_157 : f32 to vector<8x1xf32>
    %353 = arith.divf %351, %352 : vector<8x1xf32>
    %354 = vector.broadcast %353 : vector<8x1xf32> to vector<8x32xf32>
    %355 = arith.subf %345, %354 : vector<8x32xf32>
    %356 = arith.mulf %355, %355 : vector<8x32xf32>
    %cst_158 = arith.constant dense<0.000000e+00> : vector<8xf32>
    %357 = vector.multi_reduction <add>, %356, %cst_158 [1] : vector<8x32xf32> to vector<8xf32>
    %358 = vector.shape_cast %357 : vector<8xf32> to vector<8x1xf32>
    %cst_159 = arith.constant 3.200000e+01 : f32
    %359 = vector.broadcast %cst_159 : f32 to vector<8x1xf32>
    %360 = arith.divf %358, %359 : vector<8x1xf32>
    %361 = vector.broadcast %353 : vector<8x1xf32> to vector<8x32xf32>
    %362 = arith.subf %345, %361 : vector<8x32xf32>
    %cst_160 = arith.constant 9.99999996E-13 : f32
    %363 = vector.broadcast %cst_160 : f32 to vector<8x1xf32>
    %364 = arith.addf %360, %363 : vector<8x1xf32>
    %365 = math.rsqrt %364 : vector<8x1xf32>
    %366 = vector.broadcast %365 : vector<8x1xf32> to vector<8x32xf32>
    %367 = arith.mulf %362, %366 : vector<8x32xf32>
    %368 = vector.broadcast %347 : vector<1x32xf32> to vector<8x32xf32>
    %369 = arith.mulf %367, %368 : vector<8x32xf32>
    %370 = vector.broadcast %349 : vector<1x32xf32> to vector<8x32xf32>
    %371 = arith.addf %369, %370 : vector<8x32xf32>
    %c0_161 = arith.constant 0 : index
    %c0_162 = arith.constant 0 : index
    %c0_163 = arith.constant 0 : index
    %372 = vector.load %arg15[%c0_161, %c0_162, %c0_163] : memref<1x8x32xf32, #tpu.memory_space<vmem>>, vector<1x8x32xf32>
    %373 = vector.shape_cast %372 : vector<1x8x32xf32> to vector<8x32xf32>
    %374 = vector.shape_cast %371 : vector<8x32xf32> to vector<1x8x32xf32>
    tpu.vector_store %arg15[%c0_161, %c0_162, %c0_163], %374 {strides = array<i32>} : memref<1x8x32xf32, #tpu.memory_space<vmem>>, vector<1x8x32xf32>,
    return
  }
  func.func @transform_0(%arg0: i32) -> (i32, i32, i32) {
    %c0_i32 = arith.constant 0 : i32
    %c0_i32_0 = arith.constant 0 : i32
    %c0_i32_1 = arith.constant 0 : i32
    return %arg0, %c0_i32, %c0_i32_0 : i32, i32, i32
  }
  func.func @transform_1(%arg0: i32) -> (i32, i32, i32) {
    %c0_i32 = arith.constant 0 : i32
    %c0_i32_0 = arith.constant 0 : i32
    %c0_i32_1 = arith.constant 0 : i32
    return %arg0, %c0_i32, %c0_i32_0 : i32, i32, i32
  }
  func.func @transform_2(%arg0: i32) -> (i32, i32, i32) {
    %c0_i32 = arith.constant 0 : i32
    %c0_i32_0 = arith.constant 0 : i32
    %c0_i32_1 = arith.constant 0 : i32
    %c0_i32_2 = arith.constant 0 : i32
    return %c0_i32, %c0_i32_0, %c0_i32_1 : i32, i32, i32
  }
  func.func @transform_3(%arg0: i32) -> (i32, i32, i32) {
    %c0_i32 = arith.constant 0 : i32
    %c0_i32_0 = arith.constant 0 : i32
    %c0_i32_1 = arith.constant 0 : i32
    %c0_i32_2 = arith.constant 0 : i32
    return %c0_i32, %c0_i32_0, %c0_i32_1 : i32, i32, i32
  }
  func.func @transform_4(%arg0: i32) -> (i32, i32, i32) {
    %c0_i32 = arith.constant 0 : i32
    %c0_i32_0 = arith.constant 0 : i32
    %c0_i32_1 = arith.constant 0 : i32
    %c0_i32_2 = arith.constant 0 : i32
    return %c0_i32, %c0_i32_0, %c0_i32_1 : i32, i32, i32
  }
  func.func @transform_5(%arg0: i32) -> (i32, i32, i32) {
    %c0_i32 = arith.constant 0 : i32
    %c0_i32_0 = arith.constant 0 : i32
    %c0_i32_1 = arith.constant 0 : i32
    %c0_i32_2 = arith.constant 0 : i32
    return %c0_i32, %c0_i32_0, %c0_i32_1 : i32, i32, i32
  }
  func.func @transform_6(%arg0: i32) -> (i32, i32, i32) {
    %c0_i32 = arith.constant 0 : i32
    %c0_i32_0 = arith.constant 0 : i32
    %c0_i32_1 = arith.constant 0 : i32
    %c0_i32_2 = arith.constant 0 : i32
    return %c0_i32, %c0_i32_0, %c0_i32_1 : i32, i32, i32
  }
  func.func @transform_7(%arg0: i32) -> (i32, i32, i32) {
    %c0_i32 = arith.constant 0 : i32
    %c0_i32_0 = arith.constant 0 : i32
    %c0_i32_1 = arith.constant 0 : i32
    %c0_i32_2 = arith.constant 0 : i32
    return %c0_i32, %c0_i32_0, %c0_i32_1 : i32, i32, i32
  }
  func.func @transform_8(%arg0: i32) -> (i32, i32, i32) {
    %c0_i32 = arith.constant 0 : i32
    %c0_i32_0 = arith.constant 0 : i32
    %c0_i32_1 = arith.constant 0 : i32
    %c0_i32_2 = arith.constant 0 : i32
    return %c0_i32, %c0_i32_0, %c0_i32_1 : i32, i32, i32
  }
  func.func @transform_9(%arg0: i32) -> (i32, i32, i32) {
    %c0_i32 = arith.constant 0 : i32
    %c0_i32_0 = arith.constant 0 : i32
    %c0_i32_1 = arith.constant 0 : i32
    %c0_i32_2 = arith.constant 0 : i32
    return %c0_i32, %c0_i32_0, %c0_i32_1 : i32, i32, i32
  }
  func.func @transform_10(%arg0: i32) -> (i32, i32, i32) {
    %c0_i32 = arith.constant 0 : i32
    %c0_i32_0 = arith.constant 0 : i32
    %c0_i32_1 = arith.constant 0 : i32
    %c0_i32_2 = arith.constant 0 : i32
    return %c0_i32, %c0_i32_0, %c0_i32_1 : i32, i32, i32
  }
  func.func @transform_11(%arg0: i32) -> (i32, i32, i32) {
    %c0_i32 = arith.constant 0 : i32
    %c0_i32_0 = arith.constant 0 : i32
    %c0_i32_1 = arith.constant 0 : i32
    %c0_i32_2 = arith.constant 0 : i32
    return %c0_i32, %c0_i32_0, %c0_i32_1 : i32, i32, i32
  }
  func.func @transform_12(%arg0: i32) -> (i32, i32, i32) {
    %c0_i32 = arith.constant 0 : i32
    %c0_i32_0 = arith.constant 0 : i32
    %c0_i32_1 = arith.constant 0 : i32
    %c0_i32_2 = arith.constant 0 : i32
    return %c0_i32, %c0_i32_0, %c0_i32_1 : i32, i32, i32
  }
  func.func @transform_13(%arg0: i32) -> (i32, i32, i32) {
    %c0_i32 = arith.constant 0 : i32
    %c0_i32_0 = arith.constant 0 : i32
    %c0_i32_1 = arith.constant 0 : i32
    %c0_i32_2 = arith.constant 0 : i32
    return %c0_i32, %c0_i32_0, %c0_i32_1 : i32, i32, i32
  }
  func.func @transform_14(%arg0: i32) -> (i32, i32, i32) {
    %c0_i32 = arith.constant 0 : i32
    %c0_i32_0 = arith.constant 0 : i32
    %c0_i32_1 = arith.constant 0 : i32
    return %arg0, %c0_i32, %c0_i32_0 : i32, i32, i32
  }
}

module attributes {stable_mosaic.version = 11 : i64} {
  func.func @_decoder_stack_kernel(%arg0: i32, %arg1: memref<1x8x32xf32, #tpu.memory_space<vmem>>, %arg2: memref<1x8x32xf32, #tpu.memory_space<vmem>>, %arg3: memref<1x8x8xf32, #tpu.memory_space<vmem>>, %arg4: memref<1x1x8xf32, #tpu.memory_space<vmem>>, %arg5: memref<2x32x96xf32, #tpu.memory_space<vmem>>, %arg6: memref<2x1x96xf32, #tpu.memory_space<vmem>>, %arg7: memref<2x32x32xf32, #tpu.memory_space<vmem>>, %arg8: memref<2x1x32xf32, #tpu.memory_space<vmem>>, %arg9: memref<2x1x32xf32, #tpu.memory_space<vmem>>, %arg10: memref<2x1x32xf32, #tpu.memory_space<vmem>>, %arg11: memref<2x32x32xf32, #tpu.memory_space<vmem>>, %arg12: memref<2x1x32xf32, #tpu.memory_space<vmem>>, %arg13: memref<2x32x64xf32, #tpu.memory_space<vmem>>, %arg14: memref<2x1x64xf32, #tpu.memory_space<vmem>>, %arg15: memref<2x32x32xf32, #tpu.memory_space<vmem>>, %arg16: memref<2x1x32xf32, #tpu.memory_space<vmem>>, %arg17: memref<2x1x32xf32, #tpu.memory_space<vmem>>, %arg18: memref<2x1x32xf32, #tpu.memory_space<vmem>>, %arg19: memref<2x32x64xf32, #tpu.memory_space<vmem>>, %arg20: memref<2x1x64xf32, #tpu.memory_space<vmem>>, %arg21: memref<2x64x32xf32, #tpu.memory_space<vmem>>, %arg22: memref<2x1x32xf32, #tpu.memory_space<vmem>>, %arg23: memref<2x1x32xf32, #tpu.memory_space<vmem>>, %arg24: memref<2x1x32xf32, #tpu.memory_space<vmem>>, %arg25: memref<1x8x32xf32, #tpu.memory_space<vmem>>) attributes {dimension_semantics = [#tpu.dimension_semantics<parallel>], iteration_bounds = array<i64: 2>, scalar_prefetch = 0 : i64, scratch_operands = 0 : i64, tpu.core_type = #tpu.core_type<tc>, window_params = [{transform_indices = @transform_0, window_bounds = array<i64: 1, 8, 32>}, {transform_indices = @transform_1, window_bounds = array<i64: 1, 8, 32>}, {transform_indices = @transform_2, window_bounds = array<i64: 1, 8, 8>}, {transform_indices = @transform_3, window_bounds = array<i64: 1, 1, 8>}, {pipeline_mode = #tpu.pipeline_mode<synchronous>, transform_indices = @transform_4, window_bounds = array<i64: 2, 32, 96>}, {pipeline_mode = #tpu.pipeline_mode<synchronous>, transform_indices = @transform_5, window_bounds = array<i64: 2, 1, 96>}, {pipeline_mode = #tpu.pipeline_mode<synchronous>, transform_indices = @transform_6, window_bounds = array<i64: 2, 32, 32>}, {pipeline_mode = #tpu.pipeline_mode<synchronous>, transform_indices = @transform_7, window_bounds = array<i64: 2, 1, 32>}, {pipeline_mode = #tpu.pipeline_mode<synchronous>, transform_indices = @transform_8, window_bounds = array<i64: 2, 1, 32>}, {pipeline_mode = #tpu.pipeline_mode<synchronous>, transform_indices = @transform_9, window_bounds = array<i64: 2, 1, 32>}, {pipeline_mode = #tpu.pipeline_mode<synchronous>, transform_indices = @transform_10, window_bounds = array<i64: 2, 32, 32>}, {pipeline_mode = #tpu.pipeline_mode<synchronous>, transform_indices = @transform_11, window_bounds = array<i64: 2, 1, 32>}, {pipeline_mode = #tpu.pipeline_mode<synchronous>, transform_indices = @transform_12, window_bounds = array<i64: 2, 32, 64>}, {pipeline_mode = #tpu.pipeline_mode<synchronous>, transform_indices = @transform_13, window_bounds = array<i64: 2, 1, 64>}, {pipeline_mode = #tpu.pipeline_mode<synchronous>, transform_indices = @transform_14, window_bounds = array<i64: 2, 32, 32>}, {pipeline_mode = #tpu.pipeline_mode<synchronous>, transform_indices = @transform_15, window_bounds = array<i64: 2, 1, 32>}, {pipeline_mode = #tpu.pipeline_mode<synchronous>, transform_indices = @transform_16, window_bounds = array<i64: 2, 1, 32>}, {pipeline_mode = #tpu.pipeline_mode<synchronous>, transform_indices = @transform_17, window_bounds = array<i64: 2, 1, 32>}, {pipeline_mode = #tpu.pipeline_mode<synchronous>, transform_indices = @transform_18, window_bounds = array<i64: 2, 32, 64>}, {pipeline_mode = #tpu.pipeline_mode<synchronous>, transform_indices = @transform_19, window_bounds = array<i64: 2, 1, 64>}, {pipeline_mode = #tpu.pipeline_mode<synchronous>, transform_indices = @transform_20, window_bounds = array<i64: 2, 64, 32>}, {pipeline_mode = #tpu.pipeline_mode<synchronous>, transform_indices = @transform_21, window_bounds = array<i64: 2, 1, 32>}, {pipeline_mode = #tpu.pipeline_mode<synchronous>, transform_indices = @transform_22, window_bounds = array<i64: 2, 1, 32>}, {pipeline_mode = #tpu.pipeline_mode<synchronous>, transform_indices = @transform_23, window_bounds = array<i64: 2, 1, 32>}, {transform_indices = @transform_24, window_bounds = array<i64: 1, 8, 32>}]} {
    %c0 = arith.constant 0 : index
    %c0_0 = arith.constant 0 : index
    %c0_1 = arith.constant 0 : index
    %0 = vector.load %arg1[%c0, %c0_0, %c0_1] : memref<1x8x32xf32, #tpu.memory_space<vmem>>, vector<1x8x32xf32>
    %1 = vector.shape_cast %0 : vector<1x8x32xf32> to vector<8x32xf32>
    %c0_2 = arith.constant 0 : index
    %c0_3 = arith.constant 0 : index
    %c0_4 = arith.constant 0 : index
    %2 = vector.load %arg2[%c0_2, %c0_3, %c0_4] : memref<1x8x32xf32, #tpu.memory_space<vmem>>, vector<1x8x32xf32>
    %3 = vector.shape_cast %2 : vector<1x8x32xf32> to vector<8x32xf32>
    %c0_5 = arith.constant 0 : index
    %c0_6 = arith.constant 0 : index
    %c0_7 = arith.constant 0 : index
    %4 = vector.load %arg3[%c0_5, %c0_6, %c0_7] : memref<1x8x8xf32, #tpu.memory_space<vmem>>, vector<1x8x8xf32>
    %5 = vector.shape_cast %4 : vector<1x8x8xf32> to vector<8x8xf32>
    %c0_8 = arith.constant 0 : index
    %c0_9 = arith.constant 0 : index
    %c0_10 = arith.constant 0 : index
    %6 = vector.load %arg4[%c0_8, %c0_9, %c0_10] : memref<1x1x8xf32, #tpu.memory_space<vmem>>, vector<1x1x8xf32>
    %7 = vector.shape_cast %6 : vector<1x1x8xf32> to vector<1x8xf32>
    %c0_11 = arith.constant 0 : index
    %c0_12 = arith.constant 0 : index
    %c0_13 = arith.constant 0 : index
    %8 = vector.load %arg5[%c0_11, %c0_12, %c0_13] : memref<2x32x96xf32, #tpu.memory_space<vmem>>, vector<1x32x96xf32>
    %9 = vector.shape_cast %8 : vector<1x32x96xf32> to vector<32x96xf32>
    %cst = arith.constant dense<0.000000e+00> : vector<8x96xf32>
    %10 = tpu.matmul %1, %9, %cst {dimension_numbers = #tpu.dot_dimension_numbers<[1], [0], [0], [1], [0, 0, 1, 1], [], []>} : vector<8x32xf32>, vector<32x96xf32>, vector<8x96xf32> -> vector<8x96xf32>
    %c0_14 = arith.constant 0 : index
    %c0_15 = arith.constant 0 : index
    %c0_16 = arith.constant 0 : index
    %11 = vector.load %arg6[%c0_14, %c0_15, %c0_16] : memref<2x1x96xf32, #tpu.memory_space<vmem>>, vector<1x1x96xf32>
    %12 = vector.shape_cast %11 : vector<1x1x96xf32> to vector<1x96xf32>
    %13 = vector.broadcast %12 : vector<1x96xf32> to vector<8x96xf32>
    %14 = arith.addf %10, %13 : vector<8x96xf32>
    %15 = vector.extract_strided_slice %14 {offsets = [0, 0], sizes = [8, 32], strides = [1, 1]} : vector<8x96xf32> to vector<8x32xf32>
    %16 = vector.extract_strided_slice %14 {offsets = [0, 32], sizes = [8, 32], strides = [1, 1]} : vector<8x96xf32> to vector<8x32xf32>
    %17 = vector.extract_strided_slice %14 {offsets = [0, 64], sizes = [8, 32], strides = [1, 1]} : vector<8x96xf32> to vector<8x32xf32>
    %18 = vector.extract_strided_slice %15 {offsets = [0, 0], sizes = [8, 8], strides = [1, 1]} : vector<8x32xf32> to vector<8x8xf32>
    %19 = vector.extract_strided_slice %16 {offsets = [0, 0], sizes = [8, 8], strides = [1, 1]} : vector<8x32xf32> to vector<8x8xf32>
    %20 = tpu.transpose %19, [1, 0] : vector<8x8xf32> -> vector<8x8xf32>
    %cst_17 = arith.constant dense<0.000000e+00> : vector<8x8xf32>
    %21 = tpu.matmul %18, %20, %cst_17 {dimension_numbers = #tpu.dot_dimension_numbers<[1], [0], [0], [1], [0, 0, 1, 1], [], []>} : vector<8x8xf32>, vector<8x8xf32>, vector<8x8xf32> -> vector<8x8xf32>
    %cst_18 = arith.constant 0.353553385 : f32
    %22 = vector.broadcast %cst_18 : f32 to vector<8x8xf32>
    %23 = arith.mulf %21, %22 : vector<8x8xf32>
    %cst_19 = arith.constant 0.000000e+00 : f32
    %24 = vector.broadcast %cst_19 : f32 to vector<8x8xf32>
    %25 = arith.cmpf oeq, %5, %24 : vector<8x8xf32>
    %cst_20 = arith.constant -1.000000e+04 : f32
    %26 = vector.broadcast %cst_20 : f32 to vector<8x8xf32>
    %27 = arith.select %25, %26, %23 : vector<8x8xi1>, vector<8x8xf32>
    %cst_21 = arith.constant dense<0xFF800000> : vector<8xf32>
    %28 = vector.multi_reduction <maximumf>, %27, %cst_21 [1] : vector<8x8xf32> to vector<8xf32>
    %29 = vector.shape_cast %28 : vector<8xf32> to vector<8x1xf32>
    %30 = vector.broadcast %29 : vector<8x1xf32> to vector<8x8xf32>
    %31 = arith.subf %27, %30 : vector<8x8xf32>
    %32 = math.exp %31 : vector<8x8xf32>
    %cst_22 = arith.constant dense<0.000000e+00> : vector<8xf32>
    %33 = vector.multi_reduction <add>, %32, %cst_22 [1] : vector<8x8xf32> to vector<8xf32>
    %34 = vector.shape_cast %33 : vector<8xf32> to vector<8x1xf32>
    %35 = tpu.reciprocal %34 {approx = true} : vector<8x1xf32> -> vector<8x1xf32>
    %36 = vector.broadcast %35 : vector<8x1xf32> to vector<8x8xf32>
    %37 = arith.mulf %32, %36 : vector<8x8xf32>
    %38 = vector.extract_strided_slice %17 {offsets = [0, 0], sizes = [8, 8], strides = [1, 1]} : vector<8x32xf32> to vector<8x8xf32>
    %cst_23 = arith.constant dense<0.000000e+00> : vector<8x8xf32>
    %39 = tpu.matmul %37, %38, %cst_23 {dimension_numbers = #tpu.dot_dimension_numbers<[1], [0], [0], [1], [0, 0, 1, 1], [], []>} : vector<8x8xf32>, vector<8x8xf32>, vector<8x8xf32> -> vector<8x8xf32>
    %40 = vector.extract_strided_slice %15 {offsets = [0, 8], sizes = [8, 8], strides = [1, 1]} : vector<8x32xf32> to vector<8x8xf32>
    %41 = vector.extract_strided_slice %16 {offsets = [0, 8], sizes = [8, 8], strides = [1, 1]} : vector<8x32xf32> to vector<8x8xf32>
    %42 = tpu.transpose %41, [1, 0] : vector<8x8xf32> -> vector<8x8xf32>
    %cst_24 = arith.constant dense<0.000000e+00> : vector<8x8xf32>
    %43 = tpu.matmul %40, %42, %cst_24 {dimension_numbers = #tpu.dot_dimension_numbers<[1], [0], [0], [1], [0, 0, 1, 1], [], []>} : vector<8x8xf32>, vector<8x8xf32>, vector<8x8xf32> -> vector<8x8xf32>
    %cst_25 = arith.constant 0.353553385 : f32
    %44 = vector.broadcast %cst_25 : f32 to vector<8x8xf32>
    %45 = arith.mulf %43, %44 : vector<8x8xf32>
    %cst_26 = arith.constant 0.000000e+00 : f32
    %46 = vector.broadcast %cst_26 : f32 to vector<8x8xf32>
    %47 = arith.cmpf oeq, %5, %46 : vector<8x8xf32>
    %cst_27 = arith.constant -1.000000e+04 : f32
    %48 = vector.broadcast %cst_27 : f32 to vector<8x8xf32>
    %49 = arith.select %47, %48, %45 : vector<8x8xi1>, vector<8x8xf32>
    %cst_28 = arith.constant dense<0xFF800000> : vector<8xf32>
    %50 = vector.multi_reduction <maximumf>, %49, %cst_28 [1] : vector<8x8xf32> to vector<8xf32>
    %51 = vector.shape_cast %50 : vector<8xf32> to vector<8x1xf32>
    %52 = vector.broadcast %51 : vector<8x1xf32> to vector<8x8xf32>
    %53 = arith.subf %49, %52 : vector<8x8xf32>
    %54 = math.exp %53 : vector<8x8xf32>
    %cst_29 = arith.constant dense<0.000000e+00> : vector<8xf32>
    %55 = vector.multi_reduction <add>, %54, %cst_29 [1] : vector<8x8xf32> to vector<8xf32>
    %56 = vector.shape_cast %55 : vector<8xf32> to vector<8x1xf32>
    %57 = tpu.reciprocal %56 {approx = true} : vector<8x1xf32> -> vector<8x1xf32>
    %58 = vector.broadcast %57 : vector<8x1xf32> to vector<8x8xf32>
    %59 = arith.mulf %54, %58 : vector<8x8xf32>
    %60 = vector.extract_strided_slice %17 {offsets = [0, 8], sizes = [8, 8], strides = [1, 1]} : vector<8x32xf32> to vector<8x8xf32>
    %cst_30 = arith.constant dense<0.000000e+00> : vector<8x8xf32>
    %61 = tpu.matmul %59, %60, %cst_30 {dimension_numbers = #tpu.dot_dimension_numbers<[1], [0], [0], [1], [0, 0, 1, 1], [], []>} : vector<8x8xf32>, vector<8x8xf32>, vector<8x8xf32> -> vector<8x8xf32>
    %62 = vector.extract_strided_slice %15 {offsets = [0, 16], sizes = [8, 8], strides = [1, 1]} : vector<8x32xf32> to vector<8x8xf32>
    %63 = vector.extract_strided_slice %16 {offsets = [0, 16], sizes = [8, 8], strides = [1, 1]} : vector<8x32xf32> to vector<8x8xf32>
    %64 = tpu.transpose %63, [1, 0] : vector<8x8xf32> -> vector<8x8xf32>
    %cst_31 = arith.constant dense<0.000000e+00> : vector<8x8xf32>
    %65 = tpu.matmul %62, %64, %cst_31 {dimension_numbers = #tpu.dot_dimension_numbers<[1], [0], [0], [1], [0, 0, 1, 1], [], []>} : vector<8x8xf32>, vector<8x8xf32>, vector<8x8xf32> -> vector<8x8xf32>
    %cst_32 = arith.constant 0.353553385 : f32
    %66 = vector.broadcast %cst_32 : f32 to vector<8x8xf32>
    %67 = arith.mulf %65, %66 : vector<8x8xf32>
    %cst_33 = arith.constant 0.000000e+00 : f32
    %68 = vector.broadcast %cst_33 : f32 to vector<8x8xf32>
    %69 = arith.cmpf oeq, %5, %68 : vector<8x8xf32>
    %cst_34 = arith.constant -1.000000e+04 : f32
    %70 = vector.broadcast %cst_34 : f32 to vector<8x8xf32>
    %71 = arith.select %69, %70, %67 : vector<8x8xi1>, vector<8x8xf32>
    %cst_35 = arith.constant dense<0xFF800000> : vector<8xf32>
    %72 = vector.multi_reduction <maximumf>, %71, %cst_35 [1] : vector<8x8xf32> to vector<8xf32>
    %73 = vector.shape_cast %72 : vector<8xf32> to vector<8x1xf32>
    %74 = vector.broadcast %73 : vector<8x1xf32> to vector<8x8xf32>
    %75 = arith.subf %71, %74 : vector<8x8xf32>
    %76 = math.exp %75 : vector<8x8xf32>
    %cst_36 = arith.constant dense<0.000000e+00> : vector<8xf32>
    %77 = vector.multi_reduction <add>, %76, %cst_36 [1] : vector<8x8xf32> to vector<8xf32>
    %78 = vector.shape_cast %77 : vector<8xf32> to vector<8x1xf32>
    %79 = tpu.reciprocal %78 {approx = true} : vector<8x1xf32> -> vector<8x1xf32>
    %80 = vector.broadcast %79 : vector<8x1xf32> to vector<8x8xf32>
    %81 = arith.mulf %76, %80 : vector<8x8xf32>
    %82 = vector.extract_strided_slice %17 {offsets = [0, 16], sizes = [8, 8], strides = [1, 1]} : vector<8x32xf32> to vector<8x8xf32>
    %cst_37 = arith.constant dense<0.000000e+00> : vector<8x8xf32>
    %83 = tpu.matmul %81, %82, %cst_37 {dimension_numbers = #tpu.dot_dimension_numbers<[1], [0], [0], [1], [0, 0, 1, 1], [], []>} : vector<8x8xf32>, vector<8x8xf32>, vector<8x8xf32> -> vector<8x8xf32>
    %84 = vector.extract_strided_slice %15 {offsets = [0, 24], sizes = [8, 8], strides = [1, 1]} : vector<8x32xf32> to vector<8x8xf32>
    %85 = vector.extract_strided_slice %16 {offsets = [0, 24], sizes = [8, 8], strides = [1, 1]} : vector<8x32xf32> to vector<8x8xf32>
    %86 = tpu.transpose %85, [1, 0] : vector<8x8xf32> -> vector<8x8xf32>
    %cst_38 = arith.constant dense<0.000000e+00> : vector<8x8xf32>
    %87 = tpu.matmul %84, %86, %cst_38 {dimension_numbers = #tpu.dot_dimension_numbers<[1], [0], [0], [1], [0, 0, 1, 1], [], []>} : vector<8x8xf32>, vector<8x8xf32>, vector<8x8xf32> -> vector<8x8xf32>
    %cst_39 = arith.constant 0.353553385 : f32
    %88 = vector.broadcast %cst_39 : f32 to vector<8x8xf32>
    %89 = arith.mulf %87, %88 : vector<8x8xf32>
    %cst_40 = arith.constant 0.000000e+00 : f32
    %90 = vector.broadcast %cst_40 : f32 to vector<8x8xf32>
    %91 = arith.cmpf oeq, %5, %90 : vector<8x8xf32>
    %cst_41 = arith.constant -1.000000e+04 : f32
    %92 = vector.broadcast %cst_41 : f32 to vector<8x8xf32>
    %93 = arith.select %91, %92, %89 : vector<8x8xi1>, vector<8x8xf32>
    %cst_42 = arith.constant dense<0xFF800000> : vector<8xf32>
    %94 = vector.multi_reduction <maximumf>, %93, %cst_42 [1] : vector<8x8xf32> to vector<8xf32>
    %95 = vector.shape_cast %94 : vector<8xf32> to vector<8x1xf32>
    %96 = vector.broadcast %95 : vector<8x1xf32> to vector<8x8xf32>
    %97 = arith.subf %93, %96 : vector<8x8xf32>
    %98 = math.exp %97 : vector<8x8xf32>
    %cst_43 = arith.constant dense<0.000000e+00> : vector<8xf32>
    %99 = vector.multi_reduction <add>, %98, %cst_43 [1] : vector<8x8xf32> to vector<8xf32>
    %100 = vector.shape_cast %99 : vector<8xf32> to vector<8x1xf32>
    %101 = tpu.reciprocal %100 {approx = true} : vector<8x1xf32> -> vector<8x1xf32>
    %102 = vector.broadcast %101 : vector<8x1xf32> to vector<8x8xf32>
    %103 = arith.mulf %98, %102 : vector<8x8xf32>
    %104 = vector.extract_strided_slice %17 {offsets = [0, 24], sizes = [8, 8], strides = [1, 1]} : vector<8x32xf32> to vector<8x8xf32>
    %cst_44 = arith.constant dense<0.000000e+00> : vector<8x8xf32>
    %105 = tpu.matmul %103, %104, %cst_44 {dimension_numbers = #tpu.dot_dimension_numbers<[1], [0], [0], [1], [0, 0, 1, 1], [], []>} : vector<8x8xf32>, vector<8x8xf32>, vector<8x8xf32> -> vector<8x8xf32>
    %106 = tpu.concatenate %39, %61, %83, %105 in 1 : vector<8x8xf32>, vector<8x8xf32>, vector<8x8xf32>, vector<8x8xf32> -> vector<8x32xf32>
    %c0_45 = arith.constant 0 : index
    %c0_46 = arith.constant 0 : index
    %c0_47 = arith.constant 0 : index
    %107 = vector.load %arg7[%c0_45, %c0_46, %c0_47] : memref<2x32x32xf32, #tpu.memory_space<vmem>>, vector<1x32x32xf32>
    %108 = vector.shape_cast %107 : vector<1x32x32xf32> to vector<32x32xf32>
    %cst_48 = arith.constant dense<0.000000e+00> : vector<8x32xf32>
    %109 = tpu.matmul %106, %108, %cst_48 {dimension_numbers = #tpu.dot_dimension_numbers<[1], [0], [0], [1], [0, 0, 1, 1], [], []>} : vector<8x32xf32>, vector<32x32xf32>, vector<8x32xf32> -> vector<8x32xf32>
    %c0_49 = arith.constant 0 : index
    %c0_50 = arith.constant 0 : index
    %c0_51 = arith.constant 0 : index
    %110 = vector.load %arg8[%c0_49, %c0_50, %c0_51] : memref<2x1x32xf32, #tpu.memory_space<vmem>>, vector<1x1x32xf32>
    %111 = vector.shape_cast %110 : vector<1x1x32xf32> to vector<1x32xf32>
    %112 = vector.broadcast %111 : vector<1x32xf32> to vector<8x32xf32>
    %113 = arith.addf %109, %112 : vector<8x32xf32>
    %114 = arith.addf %113, %1 : vector<8x32xf32>
    %c0_52 = arith.constant 0 : index
    %c0_53 = arith.constant 0 : index
    %c0_54 = arith.constant 0 : index
    %115 = vector.load %arg9[%c0_52, %c0_53, %c0_54] : memref<2x1x32xf32, #tpu.memory_space<vmem>>, vector<1x1x32xf32>
    %116 = vector.shape_cast %115 : vector<1x1x32xf32> to vector<1x32xf32>
    %c0_55 = arith.constant 0 : index
    %c0_56 = arith.constant 0 : index
    %c0_57 = arith.constant 0 : index
    %117 = vector.load %arg10[%c0_55, %c0_56, %c0_57] : memref<2x1x32xf32, #tpu.memory_space<vmem>>, vector<1x1x32xf32>
    %118 = vector.shape_cast %117 : vector<1x1x32xf32> to vector<1x32xf32>
    %cst_58 = arith.constant dense<0.000000e+00> : vector<8xf32>
    %119 = vector.multi_reduction <add>, %114, %cst_58 [1] : vector<8x32xf32> to vector<8xf32>
    %120 = vector.shape_cast %119 : vector<8xf32> to vector<8x1xf32>
    %cst_59 = arith.constant 3.200000e+01 : f32
    %121 = vector.broadcast %cst_59 : f32 to vector<8x1xf32>
    %122 = arith.divf %120, %121 : vector<8x1xf32>
    %123 = vector.broadcast %122 : vector<8x1xf32> to vector<8x32xf32>
    %124 = arith.subf %114, %123 : vector<8x32xf32>
    %125 = arith.mulf %124, %124 : vector<8x32xf32>
    %cst_60 = arith.constant dense<0.000000e+00> : vector<8xf32>
    %126 = vector.multi_reduction <add>, %125, %cst_60 [1] : vector<8x32xf32> to vector<8xf32>
    %127 = vector.shape_cast %126 : vector<8xf32> to vector<8x1xf32>
    %cst_61 = arith.constant 3.200000e+01 : f32
    %128 = vector.broadcast %cst_61 : f32 to vector<8x1xf32>
    %129 = arith.divf %127, %128 : vector<8x1xf32>
    %130 = vector.broadcast %122 : vector<8x1xf32> to vector<8x32xf32>
    %131 = arith.subf %114, %130 : vector<8x32xf32>
    %cst_62 = arith.constant 9.99999996E-13 : f32
    %132 = vector.broadcast %cst_62 : f32 to vector<8x1xf32>
    %133 = arith.addf %129, %132 : vector<8x1xf32>
    %134 = math.rsqrt %133 : vector<8x1xf32>
    %135 = vector.broadcast %134 : vector<8x1xf32> to vector<8x32xf32>
    %136 = arith.mulf %131, %135 : vector<8x32xf32>
    %137 = vector.broadcast %116 : vector<1x32xf32> to vector<8x32xf32>
    %138 = arith.mulf %136, %137 : vector<8x32xf32>
    %139 = vector.broadcast %118 : vector<1x32xf32> to vector<8x32xf32>
    %140 = arith.addf %138, %139 : vector<8x32xf32>
    %c0_63 = arith.constant 0 : index
    %c0_64 = arith.constant 0 : index
    %c0_65 = arith.constant 0 : index
    %141 = vector.load %arg11[%c0_63, %c0_64, %c0_65] : memref<2x32x32xf32, #tpu.memory_space<vmem>>, vector<1x32x32xf32>
    %142 = vector.shape_cast %141 : vector<1x32x32xf32> to vector<32x32xf32>
    %cst_66 = arith.constant dense<0.000000e+00> : vector<8x32xf32>
    %143 = tpu.matmul %140, %142, %cst_66 {dimension_numbers = #tpu.dot_dimension_numbers<[1], [0], [0], [1], [0, 0, 1, 1], [], []>} : vector<8x32xf32>, vector<32x32xf32>, vector<8x32xf32> -> vector<8x32xf32>
    %c0_67 = arith.constant 0 : index
    %c0_68 = arith.constant 0 : index
    %c0_69 = arith.constant 0 : index
    %144 = vector.load %arg12[%c0_67, %c0_68, %c0_69] : memref<2x1x32xf32, #tpu.memory_space<vmem>>, vector<1x1x32xf32>
    %145 = vector.shape_cast %144 : vector<1x1x32xf32> to vector<1x32xf32>
    %146 = vector.broadcast %145 : vector<1x32xf32> to vector<8x32xf32>
    %147 = arith.addf %143, %146 : vector<8x32xf32>
    %c0_70 = arith.constant 0 : index
    %c0_71 = arith.constant 0 : index
    %c0_72 = arith.constant 0 : index
    %148 = vector.load %arg13[%c0_70, %c0_71, %c0_72] : memref<2x32x64xf32, #tpu.memory_space<vmem>>, vector<1x32x64xf32>
    %149 = vector.shape_cast %148 : vector<1x32x64xf32> to vector<32x64xf32>
    %cst_73 = arith.constant dense<0.000000e+00> : vector<8x64xf32>
    %150 = tpu.matmul %3, %149, %cst_73 {dimension_numbers = #tpu.dot_dimension_numbers<[1], [0], [0], [1], [0, 0, 1, 1], [], []>} : vector<8x32xf32>, vector<32x64xf32>, vector<8x64xf32> -> vector<8x64xf32>
    %c0_74 = arith.constant 0 : index
    %c0_75 = arith.constant 0 : index
    %c0_76 = arith.constant 0 : index
    %151 = vector.load %arg14[%c0_74, %c0_75, %c0_76] : memref<2x1x64xf32, #tpu.memory_space<vmem>>, vector<1x1x64xf32>
    %152 = vector.shape_cast %151 : vector<1x1x64xf32> to vector<1x64xf32>
    %153 = vector.broadcast %152 : vector<1x64xf32> to vector<8x64xf32>
    %154 = arith.addf %150, %153 : vector<8x64xf32>
    %155 = vector.extract_strided_slice %154 {offsets = [0, 0], sizes = [8, 32], strides = [1, 1]} : vector<8x64xf32> to vector<8x32xf32>
    %156 = vector.extract_strided_slice %154 {offsets = [0, 32], sizes = [8, 32], strides = [1, 1]} : vector<8x64xf32> to vector<8x32xf32>
    %157 = vector.extract_strided_slice %147 {offsets = [0, 0], sizes = [8, 8], strides = [1, 1]} : vector<8x32xf32> to vector<8x8xf32>
    %158 = vector.extract_strided_slice %155 {offsets = [0, 0], sizes = [8, 8], strides = [1, 1]} : vector<8x32xf32> to vector<8x8xf32>
    %159 = tpu.transpose %158, [1, 0] : vector<8x8xf32> -> vector<8x8xf32>
    %cst_77 = arith.constant dense<0.000000e+00> : vector<8x8xf32>
    %160 = tpu.matmul %157, %159, %cst_77 {dimension_numbers = #tpu.dot_dimension_numbers<[1], [0], [0], [1], [0, 0, 1, 1], [], []>} : vector<8x8xf32>, vector<8x8xf32>, vector<8x8xf32> -> vector<8x8xf32>
    %cst_78 = arith.constant 0.353553385 : f32
    %161 = vector.broadcast %cst_78 : f32 to vector<8x8xf32>
    %162 = arith.mulf %160, %161 : vector<8x8xf32>
    %cst_79 = arith.constant 0.000000e+00 : f32
    %163 = vector.broadcast %cst_79 : f32 to vector<1x8xf32>
    %164 = arith.cmpf oeq, %7, %163 : vector<1x8xf32>
    %cst_80 = arith.constant -1.000000e+04 : f32
    %165 = vector.shape_cast %164 : vector<1x8xi1> to vector<1x8xi1>
    %166 = vector.broadcast %165 : vector<1x8xi1> to vector<8x8xi1>
    %167 = vector.broadcast %cst_80 : f32 to vector<8x8xf32>
    %168 = arith.select %166, %167, %162 : vector<8x8xi1>, vector<8x8xf32>
    %cst_81 = arith.constant dense<0xFF800000> : vector<8xf32>
    %169 = vector.multi_reduction <maximumf>, %168, %cst_81 [1] : vector<8x8xf32> to vector<8xf32>
    %170 = vector.shape_cast %169 : vector<8xf32> to vector<8x1xf32>
    %171 = vector.broadcast %170 : vector<8x1xf32> to vector<8x8xf32>
    %172 = arith.subf %168, %171 : vector<8x8xf32>
    %173 = math.exp %172 : vector<8x8xf32>
    %cst_82 = arith.constant dense<0.000000e+00> : vector<8xf32>
    %174 = vector.multi_reduction <add>, %173, %cst_82 [1] : vector<8x8xf32> to vector<8xf32>
    %175 = vector.shape_cast %174 : vector<8xf32> to vector<8x1xf32>
    %176 = tpu.reciprocal %175 {approx = true} : vector<8x1xf32> -> vector<8x1xf32>
    %177 = vector.broadcast %176 : vector<8x1xf32> to vector<8x8xf32>
    %178 = arith.mulf %173, %177 : vector<8x8xf32>
    %179 = vector.extract_strided_slice %156 {offsets = [0, 0], sizes = [8, 8], strides = [1, 1]} : vector<8x32xf32> to vector<8x8xf32>
    %cst_83 = arith.constant dense<0.000000e+00> : vector<8x8xf32>
    %180 = tpu.matmul %178, %179, %cst_83 {dimension_numbers = #tpu.dot_dimension_numbers<[1], [0], [0], [1], [0, 0, 1, 1], [], []>} : vector<8x8xf32>, vector<8x8xf32>, vector<8x8xf32> -> vector<8x8xf32>
    %181 = vector.extract_strided_slice %147 {offsets = [0, 8], sizes = [8, 8], strides = [1, 1]} : vector<8x32xf32> to vector<8x8xf32>
    %182 = vector.extract_strided_slice %155 {offsets = [0, 8], sizes = [8, 8], strides = [1, 1]} : vector<8x32xf32> to vector<8x8xf32>
    %183 = tpu.transpose %182, [1, 0] : vector<8x8xf32> -> vector<8x8xf32>
    %cst_84 = arith.constant dense<0.000000e+00> : vector<8x8xf32>
    %184 = tpu.matmul %181, %183, %cst_84 {dimension_numbers = #tpu.dot_dimension_numbers<[1], [0], [0], [1], [0, 0, 1, 1], [], []>} : vector<8x8xf32>, vector<8x8xf32>, vector<8x8xf32> -> vector<8x8xf32>
    %cst_85 = arith.constant 0.353553385 : f32
    %185 = vector.broadcast %cst_85 : f32 to vector<8x8xf32>
    %186 = arith.mulf %184, %185 : vector<8x8xf32>
    %cst_86 = arith.constant 0.000000e+00 : f32
    %187 = vector.broadcast %cst_86 : f32 to vector<1x8xf32>
    %188 = arith.cmpf oeq, %7, %187 : vector<1x8xf32>
    %cst_87 = arith.constant -1.000000e+04 : f32
    %189 = vector.shape_cast %188 : vector<1x8xi1> to vector<1x8xi1>
    %190 = vector.broadcast %189 : vector<1x8xi1> to vector<8x8xi1>
    %191 = vector.broadcast %cst_87 : f32 to vector<8x8xf32>
    %192 = arith.select %190, %191, %186 : vector<8x8xi1>, vector<8x8xf32>
    %cst_88 = arith.constant dense<0xFF800000> : vector<8xf32>
    %193 = vector.multi_reduction <maximumf>, %192, %cst_88 [1] : vector<8x8xf32> to vector<8xf32>
    %194 = vector.shape_cast %193 : vector<8xf32> to vector<8x1xf32>
    %195 = vector.broadcast %194 : vector<8x1xf32> to vector<8x8xf32>
    %196 = arith.subf %192, %195 : vector<8x8xf32>
    %197 = math.exp %196 : vector<8x8xf32>
    %cst_89 = arith.constant dense<0.000000e+00> : vector<8xf32>
    %198 = vector.multi_reduction <add>, %197, %cst_89 [1] : vector<8x8xf32> to vector<8xf32>
    %199 = vector.shape_cast %198 : vector<8xf32> to vector<8x1xf32>
    %200 = tpu.reciprocal %199 {approx = true} : vector<8x1xf32> -> vector<8x1xf32>
    %201 = vector.broadcast %200 : vector<8x1xf32> to vector<8x8xf32>
    %202 = arith.mulf %197, %201 : vector<8x8xf32>
    %203 = vector.extract_strided_slice %156 {offsets = [0, 8], sizes = [8, 8], strides = [1, 1]} : vector<8x32xf32> to vector<8x8xf32>
    %cst_90 = arith.constant dense<0.000000e+00> : vector<8x8xf32>
    %204 = tpu.matmul %202, %203, %cst_90 {dimension_numbers = #tpu.dot_dimension_numbers<[1], [0], [0], [1], [0, 0, 1, 1], [], []>} : vector<8x8xf32>, vector<8x8xf32>, vector<8x8xf32> -> vector<8x8xf32>
    %205 = vector.extract_strided_slice %147 {offsets = [0, 16], sizes = [8, 8], strides = [1, 1]} : vector<8x32xf32> to vector<8x8xf32>
    %206 = vector.extract_strided_slice %155 {offsets = [0, 16], sizes = [8, 8], strides = [1, 1]} : vector<8x32xf32> to vector<8x8xf32>
    %207 = tpu.transpose %206, [1, 0] : vector<8x8xf32> -> vector<8x8xf32>
    %cst_91 = arith.constant dense<0.000000e+00> : vector<8x8xf32>
    %208 = tpu.matmul %205, %207, %cst_91 {dimension_numbers = #tpu.dot_dimension_numbers<[1], [0], [0], [1], [0, 0, 1, 1], [], []>} : vector<8x8xf32>, vector<8x8xf32>, vector<8x8xf32> -> vector<8x8xf32>
    %cst_92 = arith.constant 0.353553385 : f32
    %209 = vector.broadcast %cst_92 : f32 to vector<8x8xf32>
    %210 = arith.mulf %208, %209 : vector<8x8xf32>
    %cst_93 = arith.constant 0.000000e+00 : f32
    %211 = vector.broadcast %cst_93 : f32 to vector<1x8xf32>
    %212 = arith.cmpf oeq, %7, %211 : vector<1x8xf32>
    %cst_94 = arith.constant -1.000000e+04 : f32
    %213 = vector.shape_cast %212 : vector<1x8xi1> to vector<1x8xi1>
    %214 = vector.broadcast %213 : vector<1x8xi1> to vector<8x8xi1>
    %215 = vector.broadcast %cst_94 : f32 to vector<8x8xf32>
    %216 = arith.select %214, %215, %210 : vector<8x8xi1>, vector<8x8xf32>
    %cst_95 = arith.constant dense<0xFF800000> : vector<8xf32>
    %217 = vector.multi_reduction <maximumf>, %216, %cst_95 [1] : vector<8x8xf32> to vector<8xf32>
    %218 = vector.shape_cast %217 : vector<8xf32> to vector<8x1xf32>
    %219 = vector.broadcast %218 : vector<8x1xf32> to vector<8x8xf32>
    %220 = arith.subf %216, %219 : vector<8x8xf32>
    %221 = math.exp %220 : vector<8x8xf32>
    %cst_96 = arith.constant dense<0.000000e+00> : vector<8xf32>
    %222 = vector.multi_reduction <add>, %221, %cst_96 [1] : vector<8x8xf32> to vector<8xf32>
    %223 = vector.shape_cast %222 : vector<8xf32> to vector<8x1xf32>
    %224 = tpu.reciprocal %223 {approx = true} : vector<8x1xf32> -> vector<8x1xf32>
    %225 = vector.broadcast %224 : vector<8x1xf32> to vector<8x8xf32>
    %226 = arith.mulf %221, %225 : vector<8x8xf32>
    %227 = vector.extract_strided_slice %156 {offsets = [0, 16], sizes = [8, 8], strides = [1, 1]} : vector<8x32xf32> to vector<8x8xf32>
    %cst_97 = arith.constant dense<0.000000e+00> : vector<8x8xf32>
    %228 = tpu.matmul %226, %227, %cst_97 {dimension_numbers = #tpu.dot_dimension_numbers<[1], [0], [0], [1], [0, 0, 1, 1], [], []>} : vector<8x8xf32>, vector<8x8xf32>, vector<8x8xf32> -> vector<8x8xf32>
    %229 = vector.extract_strided_slice %147 {offsets = [0, 24], sizes = [8, 8], strides = [1, 1]} : vector<8x32xf32> to vector<8x8xf32>
    %230 = vector.extract_strided_slice %155 {offsets = [0, 24], sizes = [8, 8], strides = [1, 1]} : vector<8x32xf32> to vector<8x8xf32>
    %231 = tpu.transpose %230, [1, 0] : vector<8x8xf32> -> vector<8x8xf32>
    %cst_98 = arith.constant dense<0.000000e+00> : vector<8x8xf32>
    %232 = tpu.matmul %229, %231, %cst_98 {dimension_numbers = #tpu.dot_dimension_numbers<[1], [0], [0], [1], [0, 0, 1, 1], [], []>} : vector<8x8xf32>, vector<8x8xf32>, vector<8x8xf32> -> vector<8x8xf32>
    %cst_99 = arith.constant 0.353553385 : f32
    %233 = vector.broadcast %cst_99 : f32 to vector<8x8xf32>
    %234 = arith.mulf %232, %233 : vector<8x8xf32>
    %cst_100 = arith.constant 0.000000e+00 : f32
    %235 = vector.broadcast %cst_100 : f32 to vector<1x8xf32>
    %236 = arith.cmpf oeq, %7, %235 : vector<1x8xf32>
    %cst_101 = arith.constant -1.000000e+04 : f32
    %237 = vector.shape_cast %236 : vector<1x8xi1> to vector<1x8xi1>
    %238 = vector.broadcast %237 : vector<1x8xi1> to vector<8x8xi1>
    %239 = vector.broadcast %cst_101 : f32 to vector<8x8xf32>
    %240 = arith.select %238, %239, %234 : vector<8x8xi1>, vector<8x8xf32>
    %cst_102 = arith.constant dense<0xFF800000> : vector<8xf32>
    %241 = vector.multi_reduction <maximumf>, %240, %cst_102 [1] : vector<8x8xf32> to vector<8xf32>
    %242 = vector.shape_cast %241 : vector<8xf32> to vector<8x1xf32>
    %243 = vector.broadcast %242 : vector<8x1xf32> to vector<8x8xf32>
    %244 = arith.subf %240, %243 : vector<8x8xf32>
    %245 = math.exp %244 : vector<8x8xf32>
    %cst_103 = arith.constant dense<0.000000e+00> : vector<8xf32>
    %246 = vector.multi_reduction <add>, %245, %cst_103 [1] : vector<8x8xf32> to vector<8xf32>
    %247 = vector.shape_cast %246 : vector<8xf32> to vector<8x1xf32>
    %248 = tpu.reciprocal %247 {approx = true} : vector<8x1xf32> -> vector<8x1xf32>
    %249 = vector.broadcast %248 : vector<8x1xf32> to vector<8x8xf32>
    %250 = arith.mulf %245, %249 : vector<8x8xf32>
    %251 = vector.extract_strided_slice %156 {offsets = [0, 24], sizes = [8, 8], strides = [1, 1]} : vector<8x32xf32> to vector<8x8xf32>
    %cst_104 = arith.constant dense<0.000000e+00> : vector<8x8xf32>
    %252 = tpu.matmul %250, %251, %cst_104 {dimension_numbers = #tpu.dot_dimension_numbers<[1], [0], [0], [1], [0, 0, 1, 1], [], []>} : vector<8x8xf32>, vector<8x8xf32>, vector<8x8xf32> -> vector<8x8xf32>
    %253 = tpu.concatenate %180, %204, %228, %252 in 1 : vector<8x8xf32>, vector<8x8xf32>, vector<8x8xf32>, vector<8x8xf32> -> vector<8x32xf32>
    %c0_105 = arith.constant 0 : index
    %c0_106 = arith.constant 0 : index
    %c0_107 = arith.constant 0 : index
    %254 = vector.load %arg15[%c0_105, %c0_106, %c0_107] : memref<2x32x32xf32, #tpu.memory_space<vmem>>, vector<1x32x32xf32>
    %255 = vector.shape_cast %254 : vector<1x32x32xf32> to vector<32x32xf32>
    %cst_108 = arith.constant dense<0.000000e+00> : vector<8x32xf32>
    %256 = tpu.matmul %253, %255, %cst_108 {dimension_numbers = #tpu.dot_dimension_numbers<[1], [0], [0], [1], [0, 0, 1, 1], [], []>} : vector<8x32xf32>, vector<32x32xf32>, vector<8x32xf32> -> vector<8x32xf32>
    %c0_109 = arith.constant 0 : index
    %c0_110 = arith.constant 0 : index
    %c0_111 = arith.constant 0 : index
    %257 = vector.load %arg16[%c0_109, %c0_110, %c0_111] : memref<2x1x32xf32, #tpu.memory_space<vmem>>, vector<1x1x32xf32>
    %258 = vector.shape_cast %257 : vector<1x1x32xf32> to vector<1x32xf32>
    %259 = vector.broadcast %258 : vector<1x32xf32> to vector<8x32xf32>
    %260 = arith.addf %256, %259 : vector<8x32xf32>
    %261 = arith.addf %260, %140 : vector<8x32xf32>
    %c0_112 = arith.constant 0 : index
    %c0_113 = arith.constant 0 : index
    %c0_114 = arith.constant 0 : index
    %262 = vector.load %arg17[%c0_112, %c0_113, %c0_114] : memref<2x1x32xf32, #tpu.memory_space<vmem>>, vector<1x1x32xf32>
    %263 = vector.shape_cast %262 : vector<1x1x32xf32> to vector<1x32xf32>
    %c0_115 = arith.constant 0 : index
    %c0_116 = arith.constant 0 : index
    %c0_117 = arith.constant 0 : index
    %264 = vector.load %arg18[%c0_115, %c0_116, %c0_117] : memref<2x1x32xf32, #tpu.memory_space<vmem>>, vector<1x1x32xf32>
    %265 = vector.shape_cast %264 : vector<1x1x32xf32> to vector<1x32xf32>
    %cst_118 = arith.constant dense<0.000000e+00> : vector<8xf32>
    %266 = vector.multi_reduction <add>, %261, %cst_118 [1] : vector<8x32xf32> to vector<8xf32>
    %267 = vector.shape_cast %266 : vector<8xf32> to vector<8x1xf32>
    %cst_119 = arith.constant 3.200000e+01 : f32
    %268 = vector.broadcast %cst_119 : f32 to vector<8x1xf32>
    %269 = arith.divf %267, %268 : vector<8x1xf32>
    %270 = vector.broadcast %269 : vector<8x1xf32> to vector<8x32xf32>
    %271 = arith.subf %261, %270 : vector<8x32xf32>
    %272 = arith.mulf %271, %271 : vector<8x32xf32>
    %cst_120 = arith.constant dense<0.000000e+00> : vector<8xf32>
    %273 = vector.multi_reduction <add>, %272, %cst_120 [1] : vector<8x32xf32> to vector<8xf32>
    %274 = vector.shape_cast %273 : vector<8xf32> to vector<8x1xf32>
    %cst_121 = arith.constant 3.200000e+01 : f32
    %275 = vector.broadcast %cst_121 : f32 to vector<8x1xf32>
    %276 = arith.divf %274, %275 : vector<8x1xf32>
    %277 = vector.broadcast %269 : vector<8x1xf32> to vector<8x32xf32>
    %278 = arith.subf %261, %277 : vector<8x32xf32>
    %cst_122 = arith.constant 9.99999996E-13 : f32
    %279 = vector.broadcast %cst_122 : f32 to vector<8x1xf32>
    %280 = arith.addf %276, %279 : vector<8x1xf32>
    %281 = math.rsqrt %280 : vector<8x1xf32>
    %282 = vector.broadcast %281 : vector<8x1xf32> to vector<8x32xf32>
    %283 = arith.mulf %278, %282 : vector<8x32xf32>
    %284 = vector.broadcast %263 : vector<1x32xf32> to vector<8x32xf32>
    %285 = arith.mulf %283, %284 : vector<8x32xf32>
    %286 = vector.broadcast %265 : vector<1x32xf32> to vector<8x32xf32>
    %287 = arith.addf %285, %286 : vector<8x32xf32>
    %c0_123 = arith.constant 0 : index
    %c0_124 = arith.constant 0 : index
    %c0_125 = arith.constant 0 : index
    %288 = vector.load %arg19[%c0_123, %c0_124, %c0_125] : memref<2x32x64xf32, #tpu.memory_space<vmem>>, vector<1x32x64xf32>
    %289 = vector.shape_cast %288 : vector<1x32x64xf32> to vector<32x64xf32>
    %cst_126 = arith.constant dense<0.000000e+00> : vector<8x64xf32>
    %290 = tpu.matmul %287, %289, %cst_126 {dimension_numbers = #tpu.dot_dimension_numbers<[1], [0], [0], [1], [0, 0, 1, 1], [], []>} : vector<8x32xf32>, vector<32x64xf32>, vector<8x64xf32> -> vector<8x64xf32>
    %c0_127 = arith.constant 0 : index
    %c0_128 = arith.constant 0 : index
    %c0_129 = arith.constant 0 : index
    %291 = vector.load %arg20[%c0_127, %c0_128, %c0_129] : memref<2x1x64xf32, #tpu.memory_space<vmem>>, vector<1x1x64xf32>
    %292 = vector.shape_cast %291 : vector<1x1x64xf32> to vector<1x64xf32>
    %293 = vector.broadcast %292 : vector<1x64xf32> to vector<8x64xf32>
    %294 = arith.addf %290, %293 : vector<8x64xf32>
    %cst_130 = arith.constant 0.000000e+00 : f32
    %295 = vector.broadcast %cst_130 : f32 to vector<8x64xf32>
    %296 = arith.maximumf %294, %295 : vector<8x64xf32>
    %c0_131 = arith.constant 0 : index
    %c0_132 = arith.constant 0 : index
    %c0_133 = arith.constant 0 : index
    %297 = vector.load %arg21[%c0_131, %c0_132, %c0_133] : memref<2x64x32xf32, #tpu.memory_space<vmem>>, vector<1x64x32xf32>
    %298 = vector.shape_cast %297 : vector<1x64x32xf32> to vector<64x32xf32>
    %cst_134 = arith.constant dense<0.000000e+00> : vector<8x32xf32>
    %299 = tpu.matmul %296, %298, %cst_134 {dimension_numbers = #tpu.dot_dimension_numbers<[1], [0], [0], [1], [0, 0, 1, 1], [], []>} : vector<8x64xf32>, vector<64x32xf32>, vector<8x32xf32> -> vector<8x32xf32>
    %c0_135 = arith.constant 0 : index
    %c0_136 = arith.constant 0 : index
    %c0_137 = arith.constant 0 : index
    %300 = vector.load %arg22[%c0_135, %c0_136, %c0_137] : memref<2x1x32xf32, #tpu.memory_space<vmem>>, vector<1x1x32xf32>
    %301 = vector.shape_cast %300 : vector<1x1x32xf32> to vector<1x32xf32>
    %302 = vector.broadcast %301 : vector<1x32xf32> to vector<8x32xf32>
    %303 = arith.addf %299, %302 : vector<8x32xf32>
    %304 = arith.addf %303, %287 : vector<8x32xf32>
    %c0_138 = arith.constant 0 : index
    %c0_139 = arith.constant 0 : index
    %c0_140 = arith.constant 0 : index
    %305 = vector.load %arg23[%c0_138, %c0_139, %c0_140] : memref<2x1x32xf32, #tpu.memory_space<vmem>>, vector<1x1x32xf32>
    %306 = vector.shape_cast %305 : vector<1x1x32xf32> to vector<1x32xf32>
    %c0_141 = arith.constant 0 : index
    %c0_142 = arith.constant 0 : index
    %c0_143 = arith.constant 0 : index
    %307 = vector.load %arg24[%c0_141, %c0_142, %c0_143] : memref<2x1x32xf32, #tpu.memory_space<vmem>>, vector<1x1x32xf32>
    %308 = vector.shape_cast %307 : vector<1x1x32xf32> to vector<1x32xf32>
    %cst_144 = arith.constant dense<0.000000e+00> : vector<8xf32>
    %309 = vector.multi_reduction <add>, %304, %cst_144 [1] : vector<8x32xf32> to vector<8xf32>
    %310 = vector.shape_cast %309 : vector<8xf32> to vector<8x1xf32>
    %cst_145 = arith.constant 3.200000e+01 : f32
    %311 = vector.broadcast %cst_145 : f32 to vector<8x1xf32>
    %312 = arith.divf %310, %311 : vector<8x1xf32>
    %313 = vector.broadcast %312 : vector<8x1xf32> to vector<8x32xf32>
    %314 = arith.subf %304, %313 : vector<8x32xf32>
    %315 = arith.mulf %314, %314 : vector<8x32xf32>
    %cst_146 = arith.constant dense<0.000000e+00> : vector<8xf32>
    %316 = vector.multi_reduction <add>, %315, %cst_146 [1] : vector<8x32xf32> to vector<8xf32>
    %317 = vector.shape_cast %316 : vector<8xf32> to vector<8x1xf32>
    %cst_147 = arith.constant 3.200000e+01 : f32
    %318 = vector.broadcast %cst_147 : f32 to vector<8x1xf32>
    %319 = arith.divf %317, %318 : vector<8x1xf32>
    %320 = vector.broadcast %312 : vector<8x1xf32> to vector<8x32xf32>
    %321 = arith.subf %304, %320 : vector<8x32xf32>
    %cst_148 = arith.constant 9.99999996E-13 : f32
    %322 = vector.broadcast %cst_148 : f32 to vector<8x1xf32>
    %323 = arith.addf %319, %322 : vector<8x1xf32>
    %324 = math.rsqrt %323 : vector<8x1xf32>
    %325 = vector.broadcast %324 : vector<8x1xf32> to vector<8x32xf32>
    %326 = arith.mulf %321, %325 : vector<8x32xf32>
    %327 = vector.broadcast %306 : vector<1x32xf32> to vector<8x32xf32>
    %328 = arith.mulf %326, %327 : vector<8x32xf32>
    %329 = vector.broadcast %308 : vector<1x32xf32> to vector<8x32xf32>
    %330 = arith.addf %328, %329 : vector<8x32xf32>
    %c1 = arith.constant 1 : index
    %c0_149 = arith.constant 0 : index
    %c0_150 = arith.constant 0 : index
    %331 = vector.load %arg5[%c1, %c0_149, %c0_150] : memref<2x32x96xf32, #tpu.memory_space<vmem>>, vector<1x32x96xf32>
    %332 = vector.shape_cast %331 : vector<1x32x96xf32> to vector<32x96xf32>
    %cst_151 = arith.constant dense<0.000000e+00> : vector<8x96xf32>
    %333 = tpu.matmul %330, %332, %cst_151 {dimension_numbers = #tpu.dot_dimension_numbers<[1], [0], [0], [1], [0, 0, 1, 1], [], []>} : vector<8x32xf32>, vector<32x96xf32>, vector<8x96xf32> -> vector<8x96xf32>
    %c1_152 = arith.constant 1 : index
    %c0_153 = arith.constant 0 : index
    %c0_154 = arith.constant 0 : index
    %334 = vector.load %arg6[%c1_152, %c0_153, %c0_154] : memref<2x1x96xf32, #tpu.memory_space<vmem>>, vector<1x1x96xf32>
    %335 = vector.shape_cast %334 : vector<1x1x96xf32> to vector<1x96xf32>
    %336 = vector.broadcast %335 : vector<1x96xf32> to vector<8x96xf32>
    %337 = arith.addf %333, %336 : vector<8x96xf32>
    %338 = vector.extract_strided_slice %337 {offsets = [0, 0], sizes = [8, 32], strides = [1, 1]} : vector<8x96xf32> to vector<8x32xf32>
    %339 = vector.extract_strided_slice %337 {offsets = [0, 32], sizes = [8, 32], strides = [1, 1]} : vector<8x96xf32> to vector<8x32xf32>
    %340 = vector.extract_strided_slice %337 {offsets = [0, 64], sizes = [8, 32], strides = [1, 1]} : vector<8x96xf32> to vector<8x32xf32>
    %341 = vector.extract_strided_slice %338 {offsets = [0, 0], sizes = [8, 8], strides = [1, 1]} : vector<8x32xf32> to vector<8x8xf32>
    %342 = vector.extract_strided_slice %339 {offsets = [0, 0], sizes = [8, 8], strides = [1, 1]} : vector<8x32xf32> to vector<8x8xf32>
    %343 = tpu.transpose %342, [1, 0] : vector<8x8xf32> -> vector<8x8xf32>
    %cst_155 = arith.constant dense<0.000000e+00> : vector<8x8xf32>
    %344 = tpu.matmul %341, %343, %cst_155 {dimension_numbers = #tpu.dot_dimension_numbers<[1], [0], [0], [1], [0, 0, 1, 1], [], []>} : vector<8x8xf32>, vector<8x8xf32>, vector<8x8xf32> -> vector<8x8xf32>
    %cst_156 = arith.constant 0.353553385 : f32
    %345 = vector.broadcast %cst_156 : f32 to vector<8x8xf32>
    %346 = arith.mulf %344, %345 : vector<8x8xf32>
    %cst_157 = arith.constant 0.000000e+00 : f32
    %347 = vector.broadcast %cst_157 : f32 to vector<8x8xf32>
    %348 = arith.cmpf oeq, %5, %347 : vector<8x8xf32>
    %cst_158 = arith.constant -1.000000e+04 : f32
    %349 = vector.broadcast %cst_158 : f32 to vector<8x8xf32>
    %350 = arith.select %348, %349, %346 : vector<8x8xi1>, vector<8x8xf32>
    %cst_159 = arith.constant dense<0xFF800000> : vector<8xf32>
    %351 = vector.multi_reduction <maximumf>, %350, %cst_159 [1] : vector<8x8xf32> to vector<8xf32>
    %352 = vector.shape_cast %351 : vector<8xf32> to vector<8x1xf32>
    %353 = vector.broadcast %352 : vector<8x1xf32> to vector<8x8xf32>
    %354 = arith.subf %350, %353 : vector<8x8xf32>
    %355 = math.exp %354 : vector<8x8xf32>
    %cst_160 = arith.constant dense<0.000000e+00> : vector<8xf32>
    %356 = vector.multi_reduction <add>, %355, %cst_160 [1] : vector<8x8xf32> to vector<8xf32>
    %357 = vector.shape_cast %356 : vector<8xf32> to vector<8x1xf32>
    %358 = tpu.reciprocal %357 {approx = true} : vector<8x1xf32> -> vector<8x1xf32>
    %359 = vector.broadcast %358 : vector<8x1xf32> to vector<8x8xf32>
    %360 = arith.mulf %355, %359 : vector<8x8xf32>
    %361 = vector.extract_strided_slice %340 {offsets = [0, 0], sizes = [8, 8], strides = [1, 1]} : vector<8x32xf32> to vector<8x8xf32>
    %cst_161 = arith.constant dense<0.000000e+00> : vector<8x8xf32>
    %362 = tpu.matmul %360, %361, %cst_161 {dimension_numbers = #tpu.dot_dimension_numbers<[1], [0], [0], [1], [0, 0, 1, 1], [], []>} : vector<8x8xf32>, vector<8x8xf32>, vector<8x8xf32> -> vector<8x8xf32>
    %363 = vector.extract_strided_slice %338 {offsets = [0, 8], sizes = [8, 8], strides = [1, 1]} : vector<8x32xf32> to vector<8x8xf32>
    %364 = vector.extract_strided_slice %339 {offsets = [0, 8], sizes = [8, 8], strides = [1, 1]} : vector<8x32xf32> to vector<8x8xf32>
    %365 = tpu.transpose %364, [1, 0] : vector<8x8xf32> -> vector<8x8xf32>
    %cst_162 = arith.constant dense<0.000000e+00> : vector<8x8xf32>
    %366 = tpu.matmul %363, %365, %cst_162 {dimension_numbers = #tpu.dot_dimension_numbers<[1], [0], [0], [1], [0, 0, 1, 1], [], []>} : vector<8x8xf32>, vector<8x8xf32>, vector<8x8xf32> -> vector<8x8xf32>
    %cst_163 = arith.constant 0.353553385 : f32
    %367 = vector.broadcast %cst_163 : f32 to vector<8x8xf32>
    %368 = arith.mulf %366, %367 : vector<8x8xf32>
    %cst_164 = arith.constant 0.000000e+00 : f32
    %369 = vector.broadcast %cst_164 : f32 to vector<8x8xf32>
    %370 = arith.cmpf oeq, %5, %369 : vector<8x8xf32>
    %cst_165 = arith.constant -1.000000e+04 : f32
    %371 = vector.broadcast %cst_165 : f32 to vector<8x8xf32>
    %372 = arith.select %370, %371, %368 : vector<8x8xi1>, vector<8x8xf32>
    %cst_166 = arith.constant dense<0xFF800000> : vector<8xf32>
    %373 = vector.multi_reduction <maximumf>, %372, %cst_166 [1] : vector<8x8xf32> to vector<8xf32>
    %374 = vector.shape_cast %373 : vector<8xf32> to vector<8x1xf32>
    %375 = vector.broadcast %374 : vector<8x1xf32> to vector<8x8xf32>
    %376 = arith.subf %372, %375 : vector<8x8xf32>
    %377 = math.exp %376 : vector<8x8xf32>
    %cst_167 = arith.constant dense<0.000000e+00> : vector<8xf32>
    %378 = vector.multi_reduction <add>, %377, %cst_167 [1] : vector<8x8xf32> to vector<8xf32>
    %379 = vector.shape_cast %378 : vector<8xf32> to vector<8x1xf32>
    %380 = tpu.reciprocal %379 {approx = true} : vector<8x1xf32> -> vector<8x1xf32>
    %381 = vector.broadcast %380 : vector<8x1xf32> to vector<8x8xf32>
    %382 = arith.mulf %377, %381 : vector<8x8xf32>
    %383 = vector.extract_strided_slice %340 {offsets = [0, 8], sizes = [8, 8], strides = [1, 1]} : vector<8x32xf32> to vector<8x8xf32>
    %cst_168 = arith.constant dense<0.000000e+00> : vector<8x8xf32>
    %384 = tpu.matmul %382, %383, %cst_168 {dimension_numbers = #tpu.dot_dimension_numbers<[1], [0], [0], [1], [0, 0, 1, 1], [], []>} : vector<8x8xf32>, vector<8x8xf32>, vector<8x8xf32> -> vector<8x8xf32>
    %385 = vector.extract_strided_slice %338 {offsets = [0, 16], sizes = [8, 8], strides = [1, 1]} : vector<8x32xf32> to vector<8x8xf32>
    %386 = vector.extract_strided_slice %339 {offsets = [0, 16], sizes = [8, 8], strides = [1, 1]} : vector<8x32xf32> to vector<8x8xf32>
    %387 = tpu.transpose %386, [1, 0] : vector<8x8xf32> -> vector<8x8xf32>
    %cst_169 = arith.constant dense<0.000000e+00> : vector<8x8xf32>
    %388 = tpu.matmul %385, %387, %cst_169 {dimension_numbers = #tpu.dot_dimension_numbers<[1], [0], [0], [1], [0, 0, 1, 1], [], []>} : vector<8x8xf32>, vector<8x8xf32>, vector<8x8xf32> -> vector<8x8xf32>
    %cst_170 = arith.constant 0.353553385 : f32
    %389 = vector.broadcast %cst_170 : f32 to vector<8x8xf32>
    %390 = arith.mulf %388, %389 : vector<8x8xf32>
    %cst_171 = arith.constant 0.000000e+00 : f32
    %391 = vector.broadcast %cst_171 : f32 to vector<8x8xf32>
    %392 = arith.cmpf oeq, %5, %391 : vector<8x8xf32>
    %cst_172 = arith.constant -1.000000e+04 : f32
    %393 = vector.broadcast %cst_172 : f32 to vector<8x8xf32>
    %394 = arith.select %392, %393, %390 : vector<8x8xi1>, vector<8x8xf32>
    %cst_173 = arith.constant dense<0xFF800000> : vector<8xf32>
    %395 = vector.multi_reduction <maximumf>, %394, %cst_173 [1] : vector<8x8xf32> to vector<8xf32>
    %396 = vector.shape_cast %395 : vector<8xf32> to vector<8x1xf32>
    %397 = vector.broadcast %396 : vector<8x1xf32> to vector<8x8xf32>
    %398 = arith.subf %394, %397 : vector<8x8xf32>
    %399 = math.exp %398 : vector<8x8xf32>
    %cst_174 = arith.constant dense<0.000000e+00> : vector<8xf32>
    %400 = vector.multi_reduction <add>, %399, %cst_174 [1] : vector<8x8xf32> to vector<8xf32>
    %401 = vector.shape_cast %400 : vector<8xf32> to vector<8x1xf32>
    %402 = tpu.reciprocal %401 {approx = true} : vector<8x1xf32> -> vector<8x1xf32>
    %403 = vector.broadcast %402 : vector<8x1xf32> to vector<8x8xf32>
    %404 = arith.mulf %399, %403 : vector<8x8xf32>
    %405 = vector.extract_strided_slice %340 {offsets = [0, 16], sizes = [8, 8], strides = [1, 1]} : vector<8x32xf32> to vector<8x8xf32>
    %cst_175 = arith.constant dense<0.000000e+00> : vector<8x8xf32>
    %406 = tpu.matmul %404, %405, %cst_175 {dimension_numbers = #tpu.dot_dimension_numbers<[1], [0], [0], [1], [0, 0, 1, 1], [], []>} : vector<8x8xf32>, vector<8x8xf32>, vector<8x8xf32> -> vector<8x8xf32>
    %407 = vector.extract_strided_slice %338 {offsets = [0, 24], sizes = [8, 8], strides = [1, 1]} : vector<8x32xf32> to vector<8x8xf32>
    %408 = vector.extract_strided_slice %339 {offsets = [0, 24], sizes = [8, 8], strides = [1, 1]} : vector<8x32xf32> to vector<8x8xf32>
    %409 = tpu.transpose %408, [1, 0] : vector<8x8xf32> -> vector<8x8xf32>
    %cst_176 = arith.constant dense<0.000000e+00> : vector<8x8xf32>
    %410 = tpu.matmul %407, %409, %cst_176 {dimension_numbers = #tpu.dot_dimension_numbers<[1], [0], [0], [1], [0, 0, 1, 1], [], []>} : vector<8x8xf32>, vector<8x8xf32>, vector<8x8xf32> -> vector<8x8xf32>
    %cst_177 = arith.constant 0.353553385 : f32
    %411 = vector.broadcast %cst_177 : f32 to vector<8x8xf32>
    %412 = arith.mulf %410, %411 : vector<8x8xf32>
    %cst_178 = arith.constant 0.000000e+00 : f32
    %413 = vector.broadcast %cst_178 : f32 to vector<8x8xf32>
    %414 = arith.cmpf oeq, %5, %413 : vector<8x8xf32>
    %cst_179 = arith.constant -1.000000e+04 : f32
    %415 = vector.broadcast %cst_179 : f32 to vector<8x8xf32>
    %416 = arith.select %414, %415, %412 : vector<8x8xi1>, vector<8x8xf32>
    %cst_180 = arith.constant dense<0xFF800000> : vector<8xf32>
    %417 = vector.multi_reduction <maximumf>, %416, %cst_180 [1] : vector<8x8xf32> to vector<8xf32>
    %418 = vector.shape_cast %417 : vector<8xf32> to vector<8x1xf32>
    %419 = vector.broadcast %418 : vector<8x1xf32> to vector<8x8xf32>
    %420 = arith.subf %416, %419 : vector<8x8xf32>
    %421 = math.exp %420 : vector<8x8xf32>
    %cst_181 = arith.constant dense<0.000000e+00> : vector<8xf32>
    %422 = vector.multi_reduction <add>, %421, %cst_181 [1] : vector<8x8xf32> to vector<8xf32>
    %423 = vector.shape_cast %422 : vector<8xf32> to vector<8x1xf32>
    %424 = tpu.reciprocal %423 {approx = true} : vector<8x1xf32> -> vector<8x1xf32>
    %425 = vector.broadcast %424 : vector<8x1xf32> to vector<8x8xf32>
    %426 = arith.mulf %421, %425 : vector<8x8xf32>
    %427 = vector.extract_strided_slice %340 {offsets = [0, 24], sizes = [8, 8], strides = [1, 1]} : vector<8x32xf32> to vector<8x8xf32>
    %cst_182 = arith.constant dense<0.000000e+00> : vector<8x8xf32>
    %428 = tpu.matmul %426, %427, %cst_182 {dimension_numbers = #tpu.dot_dimension_numbers<[1], [0], [0], [1], [0, 0, 1, 1], [], []>} : vector<8x8xf32>, vector<8x8xf32>, vector<8x8xf32> -> vector<8x8xf32>
    %429 = tpu.concatenate %362, %384, %406, %428 in 1 : vector<8x8xf32>, vector<8x8xf32>, vector<8x8xf32>, vector<8x8xf32> -> vector<8x32xf32>
    %c1_183 = arith.constant 1 : index
    %c0_184 = arith.constant 0 : index
    %c0_185 = arith.constant 0 : index
    %430 = vector.load %arg7[%c1_183, %c0_184, %c0_185] : memref<2x32x32xf32, #tpu.memory_space<vmem>>, vector<1x32x32xf32>
    %431 = vector.shape_cast %430 : vector<1x32x32xf32> to vector<32x32xf32>
    %cst_186 = arith.constant dense<0.000000e+00> : vector<8x32xf32>
    %432 = tpu.matmul %429, %431, %cst_186 {dimension_numbers = #tpu.dot_dimension_numbers<[1], [0], [0], [1], [0, 0, 1, 1], [], []>} : vector<8x32xf32>, vector<32x32xf32>, vector<8x32xf32> -> vector<8x32xf32>
    %c1_187 = arith.constant 1 : index
    %c0_188 = arith.constant 0 : index
    %c0_189 = arith.constant 0 : index
    %433 = vector.load %arg8[%c1_187, %c0_188, %c0_189] : memref<2x1x32xf32, #tpu.memory_space<vmem>>, vector<1x1x32xf32>
    %434 = vector.shape_cast %433 : vector<1x1x32xf32> to vector<1x32xf32>
    %435 = vector.broadcast %434 : vector<1x32xf32> to vector<8x32xf32>
    %436 = arith.addf %432, %435 : vector<8x32xf32>
    %437 = arith.addf %436, %330 : vector<8x32xf32>
    %c1_190 = arith.constant 1 : index
    %c0_191 = arith.constant 0 : index
    %c0_192 = arith.constant 0 : index
    %438 = vector.load %arg9[%c1_190, %c0_191, %c0_192] : memref<2x1x32xf32, #tpu.memory_space<vmem>>, vector<1x1x32xf32>
    %439 = vector.shape_cast %438 : vector<1x1x32xf32> to vector<1x32xf32>
    %c1_193 = arith.constant 1 : index
    %c0_194 = arith.constant 0 : index
    %c0_195 = arith.constant 0 : index
    %440 = vector.load %arg10[%c1_193, %c0_194, %c0_195] : memref<2x1x32xf32, #tpu.memory_space<vmem>>, vector<1x1x32xf32>
    %441 = vector.shape_cast %440 : vector<1x1x32xf32> to vector<1x32xf32>
    %cst_196 = arith.constant dense<0.000000e+00> : vector<8xf32>
    %442 = vector.multi_reduction <add>, %437, %cst_196 [1] : vector<8x32xf32> to vector<8xf32>
    %443 = vector.shape_cast %442 : vector<8xf32> to vector<8x1xf32>
    %cst_197 = arith.constant 3.200000e+01 : f32
    %444 = vector.broadcast %cst_197 : f32 to vector<8x1xf32>
    %445 = arith.divf %443, %444 : vector<8x1xf32>
    %446 = vector.broadcast %445 : vector<8x1xf32> to vector<8x32xf32>
    %447 = arith.subf %437, %446 : vector<8x32xf32>
    %448 = arith.mulf %447, %447 : vector<8x32xf32>
    %cst_198 = arith.constant dense<0.000000e+00> : vector<8xf32>
    %449 = vector.multi_reduction <add>, %448, %cst_198 [1] : vector<8x32xf32> to vector<8xf32>
    %450 = vector.shape_cast %449 : vector<8xf32> to vector<8x1xf32>
    %cst_199 = arith.constant 3.200000e+01 : f32
    %451 = vector.broadcast %cst_199 : f32 to vector<8x1xf32>
    %452 = arith.divf %450, %451 : vector<8x1xf32>
    %453 = vector.broadcast %445 : vector<8x1xf32> to vector<8x32xf32>
    %454 = arith.subf %437, %453 : vector<8x32xf32>
    %cst_200 = arith.constant 9.99999996E-13 : f32
    %455 = vector.broadcast %cst_200 : f32 to vector<8x1xf32>
    %456 = arith.addf %452, %455 : vector<8x1xf32>
    %457 = math.rsqrt %456 : vector<8x1xf32>
    %458 = vector.broadcast %457 : vector<8x1xf32> to vector<8x32xf32>
    %459 = arith.mulf %454, %458 : vector<8x32xf32>
    %460 = vector.broadcast %439 : vector<1x32xf32> to vector<8x32xf32>
    %461 = arith.mulf %459, %460 : vector<8x32xf32>
    %462 = vector.broadcast %441 : vector<1x32xf32> to vector<8x32xf32>
    %463 = arith.addf %461, %462 : vector<8x32xf32>
    %c1_201 = arith.constant 1 : index
    %c0_202 = arith.constant 0 : index
    %c0_203 = arith.constant 0 : index
    %464 = vector.load %arg11[%c1_201, %c0_202, %c0_203] : memref<2x32x32xf32, #tpu.memory_space<vmem>>, vector<1x32x32xf32>
    %465 = vector.shape_cast %464 : vector<1x32x32xf32> to vector<32x32xf32>
    %cst_204 = arith.constant dense<0.000000e+00> : vector<8x32xf32>
    %466 = tpu.matmul %463, %465, %cst_204 {dimension_numbers = #tpu.dot_dimension_numbers<[1], [0], [0], [1], [0, 0, 1, 1], [], []>} : vector<8x32xf32>, vector<32x32xf32>, vector<8x32xf32> -> vector<8x32xf32>
    %c1_205 = arith.constant 1 : index
    %c0_206 = arith.constant 0 : index
    %c0_207 = arith.constant 0 : index
    %467 = vector.load %arg12[%c1_205, %c0_206, %c0_207] : memref<2x1x32xf32, #tpu.memory_space<vmem>>, vector<1x1x32xf32>
    %468 = vector.shape_cast %467 : vector<1x1x32xf32> to vector<1x32xf32>
    %469 = vector.broadcast %468 : vector<1x32xf32> to vector<8x32xf32>
    %470 = arith.addf %466, %469 : vector<8x32xf32>
    %c1_208 = arith.constant 1 : index
    %c0_209 = arith.constant 0 : index
    %c0_210 = arith.constant 0 : index
    %471 = vector.load %arg13[%c1_208, %c0_209, %c0_210] : memref<2x32x64xf32, #tpu.memory_space<vmem>>, vector<1x32x64xf32>
    %472 = vector.shape_cast %471 : vector<1x32x64xf32> to vector<32x64xf32>
    %cst_211 = arith.constant dense<0.000000e+00> : vector<8x64xf32>
    %473 = tpu.matmul %3, %472, %cst_211 {dimension_numbers = #tpu.dot_dimension_numbers<[1], [0], [0], [1], [0, 0, 1, 1], [], []>} : vector<8x32xf32>, vector<32x64xf32>, vector<8x64xf32> -> vector<8x64xf32>
    %c1_212 = arith.constant 1 : index
    %c0_213 = arith.constant 0 : index
    %c0_214 = arith.constant 0 : index
    %474 = vector.load %arg14[%c1_212, %c0_213, %c0_214] : memref<2x1x64xf32, #tpu.memory_space<vmem>>, vector<1x1x64xf32>
    %475 = vector.shape_cast %474 : vector<1x1x64xf32> to vector<1x64xf32>
    %476 = vector.broadcast %475 : vector<1x64xf32> to vector<8x64xf32>
    %477 = arith.addf %473, %476 : vector<8x64xf32>
    %478 = vector.extract_strided_slice %477 {offsets = [0, 0], sizes = [8, 32], strides = [1, 1]} : vector<8x64xf32> to vector<8x32xf32>
    %479 = vector.extract_strided_slice %477 {offsets = [0, 32], sizes = [8, 32], strides = [1, 1]} : vector<8x64xf32> to vector<8x32xf32>
    %480 = vector.extract_strided_slice %470 {offsets = [0, 0], sizes = [8, 8], strides = [1, 1]} : vector<8x32xf32> to vector<8x8xf32>
    %481 = vector.extract_strided_slice %478 {offsets = [0, 0], sizes = [8, 8], strides = [1, 1]} : vector<8x32xf32> to vector<8x8xf32>
    %482 = tpu.transpose %481, [1, 0] : vector<8x8xf32> -> vector<8x8xf32>
    %cst_215 = arith.constant dense<0.000000e+00> : vector<8x8xf32>
    %483 = tpu.matmul %480, %482, %cst_215 {dimension_numbers = #tpu.dot_dimension_numbers<[1], [0], [0], [1], [0, 0, 1, 1], [], []>} : vector<8x8xf32>, vector<8x8xf32>, vector<8x8xf32> -> vector<8x8xf32>
    %cst_216 = arith.constant 0.353553385 : f32
    %484 = vector.broadcast %cst_216 : f32 to vector<8x8xf32>
    %485 = arith.mulf %483, %484 : vector<8x8xf32>
    %cst_217 = arith.constant 0.000000e+00 : f32
    %486 = vector.broadcast %cst_217 : f32 to vector<1x8xf32>
    %487 = arith.cmpf oeq, %7, %486 : vector<1x8xf32>
    %cst_218 = arith.constant -1.000000e+04 : f32
    %488 = vector.shape_cast %487 : vector<1x8xi1> to vector<1x8xi1>
    %489 = vector.broadcast %488 : vector<1x8xi1> to vector<8x8xi1>
    %490 = vector.broadcast %cst_218 : f32 to vector<8x8xf32>
    %491 = arith.select %489, %490, %485 : vector<8x8xi1>, vector<8x8xf32>
    %cst_219 = arith.constant dense<0xFF800000> : vector<8xf32>
    %492 = vector.multi_reduction <maximumf>, %491, %cst_219 [1] : vector<8x8xf32> to vector<8xf32>
    %493 = vector.shape_cast %492 : vector<8xf32> to vector<8x1xf32>
    %494 = vector.broadcast %493 : vector<8x1xf32> to vector<8x8xf32>
    %495 = arith.subf %491, %494 : vector<8x8xf32>
    %496 = math.exp %495 : vector<8x8xf32>
    %cst_220 = arith.constant dense<0.000000e+00> : vector<8xf32>
    %497 = vector.multi_reduction <add>, %496, %cst_220 [1] : vector<8x8xf32> to vector<8xf32>
    %498 = vector.shape_cast %497 : vector<8xf32> to vector<8x1xf32>
    %499 = tpu.reciprocal %498 {approx = true} : vector<8x1xf32> -> vector<8x1xf32>
    %500 = vector.broadcast %499 : vector<8x1xf32> to vector<8x8xf32>
    %501 = arith.mulf %496, %500 : vector<8x8xf32>
    %502 = vector.extract_strided_slice %479 {offsets = [0, 0], sizes = [8, 8], strides = [1, 1]} : vector<8x32xf32> to vector<8x8xf32>
    %cst_221 = arith.constant dense<0.000000e+00> : vector<8x8xf32>
    %503 = tpu.matmul %501, %502, %cst_221 {dimension_numbers = #tpu.dot_dimension_numbers<[1], [0], [0], [1], [0, 0, 1, 1], [], []>} : vector<8x8xf32>, vector<8x8xf32>, vector<8x8xf32> -> vector<8x8xf32>
    %504 = vector.extract_strided_slice %470 {offsets = [0, 8], sizes = [8, 8], strides = [1, 1]} : vector<8x32xf32> to vector<8x8xf32>
    %505 = vector.extract_strided_slice %478 {offsets = [0, 8], sizes = [8, 8], strides = [1, 1]} : vector<8x32xf32> to vector<8x8xf32>
    %506 = tpu.transpose %505, [1, 0] : vector<8x8xf32> -> vector<8x8xf32>
    %cst_222 = arith.constant dense<0.000000e+00> : vector<8x8xf32>
    %507 = tpu.matmul %504, %506, %cst_222 {dimension_numbers = #tpu.dot_dimension_numbers<[1], [0], [0], [1], [0, 0, 1, 1], [], []>} : vector<8x8xf32>, vector<8x8xf32>, vector<8x8xf32> -> vector<8x8xf32>
    %cst_223 = arith.constant 0.353553385 : f32
    %508 = vector.broadcast %cst_223 : f32 to vector<8x8xf32>
    %509 = arith.mulf %507, %508 : vector<8x8xf32>
    %cst_224 = arith.constant 0.000000e+00 : f32
    %510 = vector.broadcast %cst_224 : f32 to vector<1x8xf32>
    %511 = arith.cmpf oeq, %7, %510 : vector<1x8xf32>
    %cst_225 = arith.constant -1.000000e+04 : f32
    %512 = vector.shape_cast %511 : vector<1x8xi1> to vector<1x8xi1>
    %513 = vector.broadcast %512 : vector<1x8xi1> to vector<8x8xi1>
    %514 = vector.broadcast %cst_225 : f32 to vector<8x8xf32>
    %515 = arith.select %513, %514, %509 : vector<8x8xi1>, vector<8x8xf32>
    %cst_226 = arith.constant dense<0xFF800000> : vector<8xf32>
    %516 = vector.multi_reduction <maximumf>, %515, %cst_226 [1] : vector<8x8xf32> to vector<8xf32>
    %517 = vector.shape_cast %516 : vector<8xf32> to vector<8x1xf32>
    %518 = vector.broadcast %517 : vector<8x1xf32> to vector<8x8xf32>
    %519 = arith.subf %515, %518 : vector<8x8xf32>
    %520 = math.exp %519 : vector<8x8xf32>
    %cst_227 = arith.constant dense<0.000000e+00> : vector<8xf32>
    %521 = vector.multi_reduction <add>, %520, %cst_227 [1] : vector<8x8xf32> to vector<8xf32>
    %522 = vector.shape_cast %521 : vector<8xf32> to vector<8x1xf32>
    %523 = tpu.reciprocal %522 {approx = true} : vector<8x1xf32> -> vector<8x1xf32>
    %524 = vector.broadcast %523 : vector<8x1xf32> to vector<8x8xf32>
    %525 = arith.mulf %520, %524 : vector<8x8xf32>
    %526 = vector.extract_strided_slice %479 {offsets = [0, 8], sizes = [8, 8], strides = [1, 1]} : vector<8x32xf32> to vector<8x8xf32>
    %cst_228 = arith.constant dense<0.000000e+00> : vector<8x8xf32>
    %527 = tpu.matmul %525, %526, %cst_228 {dimension_numbers = #tpu.dot_dimension_numbers<[1], [0], [0], [1], [0, 0, 1, 1], [], []>} : vector<8x8xf32>, vector<8x8xf32>, vector<8x8xf32> -> vector<8x8xf32>
    %528 = vector.extract_strided_slice %470 {offsets = [0, 16], sizes = [8, 8], strides = [1, 1]} : vector<8x32xf32> to vector<8x8xf32>
    %529 = vector.extract_strided_slice %478 {offsets = [0, 16], sizes = [8, 8], strides = [1, 1]} : vector<8x32xf32> to vector<8x8xf32>
    %530 = tpu.transpose %529, [1, 0] : vector<8x8xf32> -> vector<8x8xf32>
    %cst_229 = arith.constant dense<0.000000e+00> : vector<8x8xf32>
    %531 = tpu.matmul %528, %530, %cst_229 {dimension_numbers = #tpu.dot_dimension_numbers<[1], [0], [0], [1], [0, 0, 1, 1], [], []>} : vector<8x8xf32>, vector<8x8xf32>, vector<8x8xf32> -> vector<8x8xf32>
    %cst_230 = arith.constant 0.353553385 : f32
    %532 = vector.broadcast %cst_230 : f32 to vector<8x8xf32>
    %533 = arith.mulf %531, %532 : vector<8x8xf32>
    %cst_231 = arith.constant 0.000000e+00 : f32
    %534 = vector.broadcast %cst_231 : f32 to vector<1x8xf32>
    %535 = arith.cmpf oeq, %7, %534 : vector<1x8xf32>
    %cst_232 = arith.constant -1.000000e+04 : f32
    %536 = vector.shape_cast %535 : vector<1x8xi1> to vector<1x8xi1>
    %537 = vector.broadcast %536 : vector<1x8xi1> to vector<8x8xi1>
    %538 = vector.broadcast %cst_232 : f32 to vector<8x8xf32>
    %539 = arith.select %537, %538, %533 : vector<8x8xi1>, vector<8x8xf32>
    %cst_233 = arith.constant dense<0xFF800000> : vector<8xf32>
    %540 = vector.multi_reduction <maximumf>, %539, %cst_233 [1] : vector<8x8xf32> to vector<8xf32>
    %541 = vector.shape_cast %540 : vector<8xf32> to vector<8x1xf32>
    %542 = vector.broadcast %541 : vector<8x1xf32> to vector<8x8xf32>
    %543 = arith.subf %539, %542 : vector<8x8xf32>
    %544 = math.exp %543 : vector<8x8xf32>
    %cst_234 = arith.constant dense<0.000000e+00> : vector<8xf32>
    %545 = vector.multi_reduction <add>, %544, %cst_234 [1] : vector<8x8xf32> to vector<8xf32>
    %546 = vector.shape_cast %545 : vector<8xf32> to vector<8x1xf32>
    %547 = tpu.reciprocal %546 {approx = true} : vector<8x1xf32> -> vector<8x1xf32>
    %548 = vector.broadcast %547 : vector<8x1xf32> to vector<8x8xf32>
    %549 = arith.mulf %544, %548 : vector<8x8xf32>
    %550 = vector.extract_strided_slice %479 {offsets = [0, 16], sizes = [8, 8], strides = [1, 1]} : vector<8x32xf32> to vector<8x8xf32>
    %cst_235 = arith.constant dense<0.000000e+00> : vector<8x8xf32>
    %551 = tpu.matmul %549, %550, %cst_235 {dimension_numbers = #tpu.dot_dimension_numbers<[1], [0], [0], [1], [0, 0, 1, 1], [], []>} : vector<8x8xf32>, vector<8x8xf32>, vector<8x8xf32> -> vector<8x8xf32>
    %552 = vector.extract_strided_slice %470 {offsets = [0, 24], sizes = [8, 8], strides = [1, 1]} : vector<8x32xf32> to vector<8x8xf32>
    %553 = vector.extract_strided_slice %478 {offsets = [0, 24], sizes = [8, 8], strides = [1, 1]} : vector<8x32xf32> to vector<8x8xf32>
    %554 = tpu.transpose %553, [1, 0] : vector<8x8xf32> -> vector<8x8xf32>
    %cst_236 = arith.constant dense<0.000000e+00> : vector<8x8xf32>
    %555 = tpu.matmul %552, %554, %cst_236 {dimension_numbers = #tpu.dot_dimension_numbers<[1], [0], [0], [1], [0, 0, 1, 1], [], []>} : vector<8x8xf32>, vector<8x8xf32>, vector<8x8xf32> -> vector<8x8xf32>
    %cst_237 = arith.constant 0.353553385 : f32
    %556 = vector.broadcast %cst_237 : f32 to vector<8x8xf32>
    %557 = arith.mulf %555, %556 : vector<8x8xf32>
    %cst_238 = arith.constant 0.000000e+00 : f32
    %558 = vector.broadcast %cst_238 : f32 to vector<1x8xf32>
    %559 = arith.cmpf oeq, %7, %558 : vector<1x8xf32>
    %cst_239 = arith.constant -1.000000e+04 : f32
    %560 = vector.shape_cast %559 : vector<1x8xi1> to vector<1x8xi1>
    %561 = vector.broadcast %560 : vector<1x8xi1> to vector<8x8xi1>
    %562 = vector.broadcast %cst_239 : f32 to vector<8x8xf32>
    %563 = arith.select %561, %562, %557 : vector<8x8xi1>, vector<8x8xf32>
    %cst_240 = arith.constant dense<0xFF800000> : vector<8xf32>
    %564 = vector.multi_reduction <maximumf>, %563, %cst_240 [1] : vector<8x8xf32> to vector<8xf32>
    %565 = vector.shape_cast %564 : vector<8xf32> to vector<8x1xf32>
    %566 = vector.broadcast %565 : vector<8x1xf32> to vector<8x8xf32>
    %567 = arith.subf %563, %566 : vector<8x8xf32>
    %568 = math.exp %567 : vector<8x8xf32>
    %cst_241 = arith.constant dense<0.000000e+00> : vector<8xf32>
    %569 = vector.multi_reduction <add>, %568, %cst_241 [1] : vector<8x8xf32> to vector<8xf32>
    %570 = vector.shape_cast %569 : vector<8xf32> to vector<8x1xf32>
    %571 = tpu.reciprocal %570 {approx = true} : vector<8x1xf32> -> vector<8x1xf32>
    %572 = vector.broadcast %571 : vector<8x1xf32> to vector<8x8xf32>
    %573 = arith.mulf %568, %572 : vector<8x8xf32>
    %574 = vector.extract_strided_slice %479 {offsets = [0, 24], sizes = [8, 8], strides = [1, 1]} : vector<8x32xf32> to vector<8x8xf32>
    %cst_242 = arith.constant dense<0.000000e+00> : vector<8x8xf32>
    %575 = tpu.matmul %573, %574, %cst_242 {dimension_numbers = #tpu.dot_dimension_numbers<[1], [0], [0], [1], [0, 0, 1, 1], [], []>} : vector<8x8xf32>, vector<8x8xf32>, vector<8x8xf32> -> vector<8x8xf32>
    %576 = tpu.concatenate %503, %527, %551, %575 in 1 : vector<8x8xf32>, vector<8x8xf32>, vector<8x8xf32>, vector<8x8xf32> -> vector<8x32xf32>
    %c1_243 = arith.constant 1 : index
    %c0_244 = arith.constant 0 : index
    %c0_245 = arith.constant 0 : index
    %577 = vector.load %arg15[%c1_243, %c0_244, %c0_245] : memref<2x32x32xf32, #tpu.memory_space<vmem>>, vector<1x32x32xf32>
    %578 = vector.shape_cast %577 : vector<1x32x32xf32> to vector<32x32xf32>
    %cst_246 = arith.constant dense<0.000000e+00> : vector<8x32xf32>
    %579 = tpu.matmul %576, %578, %cst_246 {dimension_numbers = #tpu.dot_dimension_numbers<[1], [0], [0], [1], [0, 0, 1, 1], [], []>} : vector<8x32xf32>, vector<32x32xf32>, vector<8x32xf32> -> vector<8x32xf32>
    %c1_247 = arith.constant 1 : index
    %c0_248 = arith.constant 0 : index
    %c0_249 = arith.constant 0 : index
    %580 = vector.load %arg16[%c1_247, %c0_248, %c0_249] : memref<2x1x32xf32, #tpu.memory_space<vmem>>, vector<1x1x32xf32>
    %581 = vector.shape_cast %580 : vector<1x1x32xf32> to vector<1x32xf32>
    %582 = vector.broadcast %581 : vector<1x32xf32> to vector<8x32xf32>
    %583 = arith.addf %579, %582 : vector<8x32xf32>
    %584 = arith.addf %583, %463 : vector<8x32xf32>
    %c1_250 = arith.constant 1 : index
    %c0_251 = arith.constant 0 : index
    %c0_252 = arith.constant 0 : index
    %585 = vector.load %arg17[%c1_250, %c0_251, %c0_252] : memref<2x1x32xf32, #tpu.memory_space<vmem>>, vector<1x1x32xf32>
    %586 = vector.shape_cast %585 : vector<1x1x32xf32> to vector<1x32xf32>
    %c1_253 = arith.constant 1 : index
    %c0_254 = arith.constant 0 : index
    %c0_255 = arith.constant 0 : index
    %587 = vector.load %arg18[%c1_253, %c0_254, %c0_255] : memref<2x1x32xf32, #tpu.memory_space<vmem>>, vector<1x1x32xf32>
    %588 = vector.shape_cast %587 : vector<1x1x32xf32> to vector<1x32xf32>
    %cst_256 = arith.constant dense<0.000000e+00> : vector<8xf32>
    %589 = vector.multi_reduction <add>, %584, %cst_256 [1] : vector<8x32xf32> to vector<8xf32>
    %590 = vector.shape_cast %589 : vector<8xf32> to vector<8x1xf32>
    %cst_257 = arith.constant 3.200000e+01 : f32
    %591 = vector.broadcast %cst_257 : f32 to vector<8x1xf32>
    %592 = arith.divf %590, %591 : vector<8x1xf32>
    %593 = vector.broadcast %592 : vector<8x1xf32> to vector<8x32xf32>
    %594 = arith.subf %584, %593 : vector<8x32xf32>
    %595 = arith.mulf %594, %594 : vector<8x32xf32>
    %cst_258 = arith.constant dense<0.000000e+00> : vector<8xf32>
    %596 = vector.multi_reduction <add>, %595, %cst_258 [1] : vector<8x32xf32> to vector<8xf32>
    %597 = vector.shape_cast %596 : vector<8xf32> to vector<8x1xf32>
    %cst_259 = arith.constant 3.200000e+01 : f32
    %598 = vector.broadcast %cst_259 : f32 to vector<8x1xf32>
    %599 = arith.divf %597, %598 : vector<8x1xf32>
    %600 = vector.broadcast %592 : vector<8x1xf32> to vector<8x32xf32>
    %601 = arith.subf %584, %600 : vector<8x32xf32>
    %cst_260 = arith.constant 9.99999996E-13 : f32
    %602 = vector.broadcast %cst_260 : f32 to vector<8x1xf32>
    %603 = arith.addf %599, %602 : vector<8x1xf32>
    %604 = math.rsqrt %603 : vector<8x1xf32>
    %605 = vector.broadcast %604 : vector<8x1xf32> to vector<8x32xf32>
    %606 = arith.mulf %601, %605 : vector<8x32xf32>
    %607 = vector.broadcast %586 : vector<1x32xf32> to vector<8x32xf32>
    %608 = arith.mulf %606, %607 : vector<8x32xf32>
    %609 = vector.broadcast %588 : vector<1x32xf32> to vector<8x32xf32>
    %610 = arith.addf %608, %609 : vector<8x32xf32>
    %c1_261 = arith.constant 1 : index
    %c0_262 = arith.constant 0 : index
    %c0_263 = arith.constant 0 : index
    %611 = vector.load %arg19[%c1_261, %c0_262, %c0_263] : memref<2x32x64xf32, #tpu.memory_space<vmem>>, vector<1x32x64xf32>
    %612 = vector.shape_cast %611 : vector<1x32x64xf32> to vector<32x64xf32>
    %cst_264 = arith.constant dense<0.000000e+00> : vector<8x64xf32>
    %613 = tpu.matmul %610, %612, %cst_264 {dimension_numbers = #tpu.dot_dimension_numbers<[1], [0], [0], [1], [0, 0, 1, 1], [], []>} : vector<8x32xf32>, vector<32x64xf32>, vector<8x64xf32> -> vector<8x64xf32>
    %c1_265 = arith.constant 1 : index
    %c0_266 = arith.constant 0 : index
    %c0_267 = arith.constant 0 : index
    %614 = vector.load %arg20[%c1_265, %c0_266, %c0_267] : memref<2x1x64xf32, #tpu.memory_space<vmem>>, vector<1x1x64xf32>
    %615 = vector.shape_cast %614 : vector<1x1x64xf32> to vector<1x64xf32>
    %616 = vector.broadcast %615 : vector<1x64xf32> to vector<8x64xf32>
    %617 = arith.addf %613, %616 : vector<8x64xf32>
    %cst_268 = arith.constant 0.000000e+00 : f32
    %618 = vector.broadcast %cst_268 : f32 to vector<8x64xf32>
    %619 = arith.maximumf %617, %618 : vector<8x64xf32>
    %c1_269 = arith.constant 1 : index
    %c0_270 = arith.constant 0 : index
    %c0_271 = arith.constant 0 : index
    %620 = vector.load %arg21[%c1_269, %c0_270, %c0_271] : memref<2x64x32xf32, #tpu.memory_space<vmem>>, vector<1x64x32xf32>
    %621 = vector.shape_cast %620 : vector<1x64x32xf32> to vector<64x32xf32>
    %cst_272 = arith.constant dense<0.000000e+00> : vector<8x32xf32>
    %622 = tpu.matmul %619, %621, %cst_272 {dimension_numbers = #tpu.dot_dimension_numbers<[1], [0], [0], [1], [0, 0, 1, 1], [], []>} : vector<8x64xf32>, vector<64x32xf32>, vector<8x32xf32> -> vector<8x32xf32>
    %c1_273 = arith.constant 1 : index
    %c0_274 = arith.constant 0 : index
    %c0_275 = arith.constant 0 : index
    %623 = vector.load %arg22[%c1_273, %c0_274, %c0_275] : memref<2x1x32xf32, #tpu.memory_space<vmem>>, vector<1x1x32xf32>
    %624 = vector.shape_cast %623 : vector<1x1x32xf32> to vector<1x32xf32>
    %625 = vector.broadcast %624 : vector<1x32xf32> to vector<8x32xf32>
    %626 = arith.addf %622, %625 : vector<8x32xf32>
    %627 = arith.addf %626, %610 : vector<8x32xf32>
    %c1_276 = arith.constant 1 : index
    %c0_277 = arith.constant 0 : index
    %c0_278 = arith.constant 0 : index
    %628 = vector.load %arg23[%c1_276, %c0_277, %c0_278] : memref<2x1x32xf32, #tpu.memory_space<vmem>>, vector<1x1x32xf32>
    %629 = vector.shape_cast %628 : vector<1x1x32xf32> to vector<1x32xf32>
    %c1_279 = arith.constant 1 : index
    %c0_280 = arith.constant 0 : index
    %c0_281 = arith.constant 0 : index
    %630 = vector.load %arg24[%c1_279, %c0_280, %c0_281] : memref<2x1x32xf32, #tpu.memory_space<vmem>>, vector<1x1x32xf32>
    %631 = vector.shape_cast %630 : vector<1x1x32xf32> to vector<1x32xf32>
    %cst_282 = arith.constant dense<0.000000e+00> : vector<8xf32>
    %632 = vector.multi_reduction <add>, %627, %cst_282 [1] : vector<8x32xf32> to vector<8xf32>
    %633 = vector.shape_cast %632 : vector<8xf32> to vector<8x1xf32>
    %cst_283 = arith.constant 3.200000e+01 : f32
    %634 = vector.broadcast %cst_283 : f32 to vector<8x1xf32>
    %635 = arith.divf %633, %634 : vector<8x1xf32>
    %636 = vector.broadcast %635 : vector<8x1xf32> to vector<8x32xf32>
    %637 = arith.subf %627, %636 : vector<8x32xf32>
    %638 = arith.mulf %637, %637 : vector<8x32xf32>
    %cst_284 = arith.constant dense<0.000000e+00> : vector<8xf32>
    %639 = vector.multi_reduction <add>, %638, %cst_284 [1] : vector<8x32xf32> to vector<8xf32>
    %640 = vector.shape_cast %639 : vector<8xf32> to vector<8x1xf32>
    %cst_285 = arith.constant 3.200000e+01 : f32
    %641 = vector.broadcast %cst_285 : f32 to vector<8x1xf32>
    %642 = arith.divf %640, %641 : vector<8x1xf32>
    %643 = vector.broadcast %635 : vector<8x1xf32> to vector<8x32xf32>
    %644 = arith.subf %627, %643 : vector<8x32xf32>
    %cst_286 = arith.constant 9.99999996E-13 : f32
    %645 = vector.broadcast %cst_286 : f32 to vector<8x1xf32>
    %646 = arith.addf %642, %645 : vector<8x1xf32>
    %647 = math.rsqrt %646 : vector<8x1xf32>
    %648 = vector.broadcast %647 : vector<8x1xf32> to vector<8x32xf32>
    %649 = arith.mulf %644, %648 : vector<8x32xf32>
    %650 = vector.broadcast %629 : vector<1x32xf32> to vector<8x32xf32>
    %651 = arith.mulf %649, %650 : vector<8x32xf32>
    %652 = vector.broadcast %631 : vector<1x32xf32> to vector<8x32xf32>
    %653 = arith.addf %651, %652 : vector<8x32xf32>
    %c0_287 = arith.constant 0 : index
    %c0_288 = arith.constant 0 : index
    %c0_289 = arith.constant 0 : index
    %654 = vector.load %arg25[%c0_287, %c0_288, %c0_289] : memref<1x8x32xf32, #tpu.memory_space<vmem>>, vector<1x8x32xf32>
    %655 = vector.shape_cast %654 : vector<1x8x32xf32> to vector<8x32xf32>
    %656 = vector.shape_cast %653 : vector<8x32xf32> to vector<1x8x32xf32>
    tpu.vector_store %arg25[%c0_287, %c0_288, %c0_289], %656 {strides = array<i32>} : memref<1x8x32xf32, #tpu.memory_space<vmem>>, vector<1x8x32xf32>,
    return
  }
  func.func @transform_0(%arg0: i32) -> (i32, i32, i32) {
    %c0_i32 = arith.constant 0 : i32
    %c0_i32_0 = arith.constant 0 : i32
    %c0_i32_1 = arith.constant 0 : i32
    return %arg0, %c0_i32, %c0_i32_0 : i32, i32, i32
  }
  func.func @transform_1(%arg0: i32) -> (i32, i32, i32) {
    %c0_i32 = arith.constant 0 : i32
    %c0_i32_0 = arith.constant 0 : i32
    %c0_i32_1 = arith.constant 0 : i32
    return %arg0, %c0_i32, %c0_i32_0 : i32, i32, i32
  }
  func.func @transform_2(%arg0: i32) -> (i32, i32, i32) {
    %c0_i32 = arith.constant 0 : i32
    %c0_i32_0 = arith.constant 0 : i32
    %c0_i32_1 = arith.constant 0 : i32
    return %arg0, %c0_i32, %c0_i32_0 : i32, i32, i32
  }
  func.func @transform_3(%arg0: i32) -> (i32, i32, i32) {
    %c0_i32 = arith.constant 0 : i32
    %c0_i32_0 = arith.constant 0 : i32
    %c0_i32_1 = arith.constant 0 : i32
    return %arg0, %c0_i32, %c0_i32_0 : i32, i32, i32
  }
  func.func @transform_4(%arg0: i32) -> (i32, i32, i32) {
    %c0_i32 = arith.constant 0 : i32
    %c0_i32_0 = arith.constant 0 : i32
    %c0_i32_1 = arith.constant 0 : i32
    %c0_i32_2 = arith.constant 0 : i32
    return %c0_i32, %c0_i32_0, %c0_i32_1 : i32, i32, i32
  }
  func.func @transform_5(%arg0: i32) -> (i32, i32, i32) {
    %c0_i32 = arith.constant 0 : i32
    %c0_i32_0 = arith.constant 0 : i32
    %c0_i32_1 = arith.constant 0 : i32
    %c0_i32_2 = arith.constant 0 : i32
    return %c0_i32, %c0_i32_0, %c0_i32_1 : i32, i32, i32
  }
  func.func @transform_6(%arg0: i32) -> (i32, i32, i32) {
    %c0_i32 = arith.constant 0 : i32
    %c0_i32_0 = arith.constant 0 : i32
    %c0_i32_1 = arith.constant 0 : i32
    %c0_i32_2 = arith.constant 0 : i32
    return %c0_i32, %c0_i32_0, %c0_i32_1 : i32, i32, i32
  }
  func.func @transform_7(%arg0: i32) -> (i32, i32, i32) {
    %c0_i32 = arith.constant 0 : i32
    %c0_i32_0 = arith.constant 0 : i32
    %c0_i32_1 = arith.constant 0 : i32
    %c0_i32_2 = arith.constant 0 : i32
    return %c0_i32, %c0_i32_0, %c0_i32_1 : i32, i32, i32
  }
  func.func @transform_8(%arg0: i32) -> (i32, i32, i32) {
    %c0_i32 = arith.constant 0 : i32
    %c0_i32_0 = arith.constant 0 : i32
    %c0_i32_1 = arith.constant 0 : i32
    %c0_i32_2 = arith.constant 0 : i32
    return %c0_i32, %c0_i32_0, %c0_i32_1 : i32, i32, i32
  }
  func.func @transform_9(%arg0: i32) -> (i32, i32, i32) {
    %c0_i32 = arith.constant 0 : i32
    %c0_i32_0 = arith.constant 0 : i32
    %c0_i32_1 = arith.constant 0 : i32
    %c0_i32_2 = arith.constant 0 : i32
    return %c0_i32, %c0_i32_0, %c0_i32_1 : i32, i32, i32
  }
  func.func @transform_10(%arg0: i32) -> (i32, i32, i32) {
    %c0_i32 = arith.constant 0 : i32
    %c0_i32_0 = arith.constant 0 : i32
    %c0_i32_1 = arith.constant 0 : i32
    %c0_i32_2 = arith.constant 0 : i32
    return %c0_i32, %c0_i32_0, %c0_i32_1 : i32, i32, i32
  }
  func.func @transform_11(%arg0: i32) -> (i32, i32, i32) {
    %c0_i32 = arith.constant 0 : i32
    %c0_i32_0 = arith.constant 0 : i32
    %c0_i32_1 = arith.constant 0 : i32
    %c0_i32_2 = arith.constant 0 : i32
    return %c0_i32, %c0_i32_0, %c0_i32_1 : i32, i32, i32
  }
  func.func @transform_12(%arg0: i32) -> (i32, i32, i32) {
    %c0_i32 = arith.constant 0 : i32
    %c0_i32_0 = arith.constant 0 : i32
    %c0_i32_1 = arith.constant 0 : i32
    %c0_i32_2 = arith.constant 0 : i32
    return %c0_i32, %c0_i32_0, %c0_i32_1 : i32, i32, i32
  }
  func.func @transform_13(%arg0: i32) -> (i32, i32, i32) {
    %c0_i32 = arith.constant 0 : i32
    %c0_i32_0 = arith.constant 0 : i32
    %c0_i32_1 = arith.constant 0 : i32
    %c0_i32_2 = arith.constant 0 : i32
    return %c0_i32, %c0_i32_0, %c0_i32_1 : i32, i32, i32
  }
  func.func @transform_14(%arg0: i32) -> (i32, i32, i32) {
    %c0_i32 = arith.constant 0 : i32
    %c0_i32_0 = arith.constant 0 : i32
    %c0_i32_1 = arith.constant 0 : i32
    %c0_i32_2 = arith.constant 0 : i32
    return %c0_i32, %c0_i32_0, %c0_i32_1 : i32, i32, i32
  }
  func.func @transform_15(%arg0: i32) -> (i32, i32, i32) {
    %c0_i32 = arith.constant 0 : i32
    %c0_i32_0 = arith.constant 0 : i32
    %c0_i32_1 = arith.constant 0 : i32
    %c0_i32_2 = arith.constant 0 : i32
    return %c0_i32, %c0_i32_0, %c0_i32_1 : i32, i32, i32
  }
  func.func @transform_16(%arg0: i32) -> (i32, i32, i32) {
    %c0_i32 = arith.constant 0 : i32
    %c0_i32_0 = arith.constant 0 : i32
    %c0_i32_1 = arith.constant 0 : i32
    %c0_i32_2 = arith.constant 0 : i32
    return %c0_i32, %c0_i32_0, %c0_i32_1 : i32, i32, i32
  }
  func.func @transform_17(%arg0: i32) -> (i32, i32, i32) {
    %c0_i32 = arith.constant 0 : i32
    %c0_i32_0 = arith.constant 0 : i32
    %c0_i32_1 = arith.constant 0 : i32
    %c0_i32_2 = arith.constant 0 : i32
    return %c0_i32, %c0_i32_0, %c0_i32_1 : i32, i32, i32
  }
  func.func @transform_18(%arg0: i32) -> (i32, i32, i32) {
    %c0_i32 = arith.constant 0 : i32
    %c0_i32_0 = arith.constant 0 : i32
    %c0_i32_1 = arith.constant 0 : i32
    %c0_i32_2 = arith.constant 0 : i32
    return %c0_i32, %c0_i32_0, %c0_i32_1 : i32, i32, i32
  }
  func.func @transform_19(%arg0: i32) -> (i32, i32, i32) {
    %c0_i32 = arith.constant 0 : i32
    %c0_i32_0 = arith.constant 0 : i32
    %c0_i32_1 = arith.constant 0 : i32
    %c0_i32_2 = arith.constant 0 : i32
    return %c0_i32, %c0_i32_0, %c0_i32_1 : i32, i32, i32
  }
  func.func @transform_20(%arg0: i32) -> (i32, i32, i32) {
    %c0_i32 = arith.constant 0 : i32
    %c0_i32_0 = arith.constant 0 : i32
    %c0_i32_1 = arith.constant 0 : i32
    %c0_i32_2 = arith.constant 0 : i32
    return %c0_i32, %c0_i32_0, %c0_i32_1 : i32, i32, i32
  }
  func.func @transform_21(%arg0: i32) -> (i32, i32, i32) {
    %c0_i32 = arith.constant 0 : i32
    %c0_i32_0 = arith.constant 0 : i32
    %c0_i32_1 = arith.constant 0 : i32
    %c0_i32_2 = arith.constant 0 : i32
    return %c0_i32, %c0_i32_0, %c0_i32_1 : i32, i32, i32
  }
  func.func @transform_22(%arg0: i32) -> (i32, i32, i32) {
    %c0_i32 = arith.constant 0 : i32
    %c0_i32_0 = arith.constant 0 : i32
    %c0_i32_1 = arith.constant 0 : i32
    %c0_i32_2 = arith.constant 0 : i32
    return %c0_i32, %c0_i32_0, %c0_i32_1 : i32, i32, i32
  }
  func.func @transform_23(%arg0: i32) -> (i32, i32, i32) {
    %c0_i32 = arith.constant 0 : i32
    %c0_i32_0 = arith.constant 0 : i32
    %c0_i32_1 = arith.constant 0 : i32
    %c0_i32_2 = arith.constant 0 : i32
    return %c0_i32, %c0_i32_0, %c0_i32_1 : i32, i32, i32
  }
  func.func @transform_24(%arg0: i32) -> (i32, i32, i32) {
    %c0_i32 = arith.constant 0 : i32
    %c0_i32_0 = arith.constant 0 : i32
    %c0_i32_1 = arith.constant 0 : i32
    return %arg0, %c0_i32, %c0_i32_0 : i32, i32, i32
  }
}

</mosaic_0001>

<bundles_post_ra>
// kernel: transformer_forward.5
= control target key start
LH: loop header
LB: loop body
LE: loop exit
PB: predicated region body
PF: predicated region fallthrough
CT: control target
= control target key end

     0   :  { %vm24_vm0 = vcmask 261120   ;;  %s114_s1 = inlined_call_operand.vmem [shape: f32[32,128], index: 1, kind: input, shape index: {}]   ;;  %s115_s2 = inlined_call_operand.vmem [shape: f32[1,128], index: 2, kind: input, shape index: {}]   ;;  %s116_s0 = inlined_call_operand.vmem [shape: f32[16,32], index: 0, kind: input, shape index: {}]   ;;  %s117_s3 = inlined_call_operand.vmem [shape: f32[16,128], index: 3, kind: output, shape index: {}]  }
   0x1   :  { %v19_v0 = vld [vmem:[%s114_s1 + $0x18] sm:$0xff]  ;;  %v18_v1 = vld [vmem:[%s114_s1 + $0x10] sm:$0xff]  ;;  %v17_v2 = vld [vmem:[%s114_s1 + $0x8] sm:$0xff] }
   0x2   :  { %43 = vmatpush.msra.mxu0 %v19_v0  ;;  %62 = vmatpush.msra.mxu1 %v19_v0  ;;  %v16_v3 = vld [vmem:[%s114_s1] sm:$0xff]  ;;  %v15_v5 = vld [vmem:[%s116_s0 + $0x8] sm:$0xff] }
   0x3   :  { %v14_v4 = vld [vmem:[%s116_s0] sm:$0xff] }
   0x4   :  { %44 = vmatpush.msra.mxu0 %v18_v1  ;;  %63 = vmatpush.msra.mxu1 %v18_v1  ;;  %v66_v6 = vld [vmem:[%s115_s2] ss:$0 sm:$0xff] }
   0x6   :  { %45 = vmatpush.msra.mxu0 %v17_v2  ;;  %64 = vmatpush.msra.mxu1 %v17_v2 }
   0x8   :  { %46 = vmatpush.msra.mxu0 %v16_v3  ;;  %65 = vmatpush.msra.mxu1 %v16_v3 }
   0x9   :  { %60 = vmatmul.msk.f32.vlgmr.msra.gmra.mxu0 %vm24_vm0, %v14_v4  ;;  %61 = vmatmul.msk.f32.vlgmr.msra.gmra.mxu1 %vm24_vm0, %v15_v5 }
  0x86   :  { %v48_v7 = vpop.f32.mrf.mxu0  ;;  %v51_v8 = vpop.f32.mrf.mxu1 }
  0x87   :  { %v49_v9 = vadd.f32 %v66_v6, %v48_v7  ;;  %v52_v10 = vadd.f32 %v66_v6, %v51_v8 }
  0x89   :  { %54 = vst [vmem:[%s117_s3] sm:$0xff] %v49_v9 }
  0x8a   :  { %55 = vst [vmem:[%s117_s3 + $0x8] sm:$0xff] %v52_v10 }

// kernel: transformer_forward.3
= control target key start
LH: loop header
LB: loop body
LE: loop exit
PB: predicated region body
PF: predicated region fallthrough
CT: control target
= control target key end

     0   :  { %s1774_s29 = smov 0   ;;  %s2133_s0 = inlined_call_operand.vmem [shape: f32[2,8,32], index: 0, kind: input, shape index: {}]   ;;  %s2134_s1 = inlined_call_operand.vmem [shape: f32[2,1,8], index: 1, kind: input, shape index: {}]   ;;  %s2135_s2 = inlined_call_operand.vmem [shape: f32[2,32,96], index: 2, kind: input, shape index: {}]   ;;  %s2136_s3 = inlined_call_operand.vmem [shape: f32[2,1,96], index: 3, kind: input, shape index: {}]   ;;  %s2137_s4 = inlined_call_operand.vmem [shape: f32[2,32,32], index: 4, kind: input, shape index: {}]   ;;  %s2138_s5 = inlined_call_operand.vmem [shape: f32[2,1,32], index: 5, kind: input, shape index: {}]   ;;  %s2139_s6 = inlined_call_operand.vmem [shape: f32[2,1,32], index: 6, kind: input, shape index: {}]   ;;  %s2140_s7 = inlined_call_operand.vmem [shape: f32[2,1,32], index: 7, kind: input, shape index: {}]   ;;  %s2141_s8 = inlined_call_operand.vmem [shape: f32[2,32,64], index: 8, kind: input, shape index: {}]   ;;  %s2142_s9 = inlined_call_operand.vmem [shape: f32[2,1,64], index: 9, kind: input, shape index: {}]   ;;  %s2143_s10 = inlined_call_operand.vmem [shape: f32[2,64,32], index: 10, kind: input, shape index: {}]   ;;  %s2144_s11 = inlined_call_operand.vmem [shape: f32[2,1,32], index: 11, kind: input, shape index: {}]   ;;  %s2145_s12 = inlined_call_operand.vmem [shape: f32[2,1,32], index: 12, kind: input, shape index: {}]   ;;  %s2146_s13 = inlined_call_operand.vmem [shape: f32[2,1,32], index: 13, kind: input, shape index: {}]   ;;  %s2147_s14 = inlined_call_operand.vmem [shape: f32[2,8,32], index: 14, kind: output, shape index: {}]  }
   0x1 LB: > { %s1524_s30 = sadd.s32 4294967295, %s1681_s29   ;;  %p1528_p0 = scmp.ge.s32.totalorder %s1681_s29, 1  ;;  %s1681_s29 = sphi %s1774_s29, %s24_s29  }
   0x2   : > { %p419_p1 = scmp.lt.s32.totalorder %s1681_s29, 3 }
   0x4   : > { %p420_p2 = pnand %p1528_p0, %p419_p1 }
   0x5   : > { %p466_p3 = scmp.lt.s32.totalorder (!%p420_p2), %s1524_s30, 1  ;;  %s2154_s15 = smov (!%p420_p2), 88  }
   0x6   : > { %423 = sbr.rel (%p420_p2) target bundleno = 4449 (0x1161), region = 76  ;;  %s1684_s16 = smov (!%p420_p2), 64  }
   0x7   : > { %s1685_s17 = smov (!%p420_p2), 96   ;;  %s1686_s18 = smov (!%p420_p2), 120  }
   0x8   : > { %s1687_s19 = smov (!%p420_p2), 80   ;;  %s2152_s20 = smov (!%p420_p2), 72  }
   0x9   : > { %s2153_s21 = smov (!%p420_p2), 112   ;;  %s2149_s27 = smov (!%p420_p2), 40  }
   0xa   : > { %s2151_s28 = smov (!%p420_p2), 56   ;;  %s2150_s22 = smov (!%p420_p2), 48  }
   0xb   : > { %v482_v0 = vld [vmem:[%s2135_s2 + $0x18] sm:$0xff]  ;;  %v481_v1 = vld [vmem:[%s2135_s2 + $0x10] sm:$0xff]  ;;  %v480_v2 = vld [vmem:[%s2135_s2 + $0x8] sm:$0xff]  ;;  %s2173_s30 = smov (!%p466_p3, %s1524_s30), 1  ;;  %vm487_vm0 = vcmask 261120   ;;  %vm514_vm1 = vcmask 64512  }
   0xc   : > { %503 = vmatpush.msra.mxu0 %v482_v0  ;;  %v479_v3 = vld [vmem:[%s2135_s2] sm:$0xff]  ;;  %s2148_s23 = sshll.u32 %s2173_s30, 3  ;;  %s472_s25 = scalar_lea.vmem %s2134_s1, %s2173_s30  ;;  %v1690_v16 = vmov 0   ;;  %vm796_vm4 = vcmask 130048   ;;  %vm798_vm5 = vcmask 195584   ;;  %vm915_vm10 = vcmask 523264  }
   0xd   : > { %s469_s26 = scalar_lea.vmem %s2133_s0, %s2148_s23  ;;  %v1617_v5 = vld [vmem:[%s2136_s3] ss:$0 sm:$0xff]  ;;  %s2156_s24 = smov 8  }
   0xe   : > { %504 = vmatpush.msra.mxu0 %v481_v1  ;;  %v1802_v4 = vld [vmem:[%s469_s26] sm:$0xff]  ;;  %s2158_s26 = smov 104   ;;  %s2157_s23 = smov 16  }
   0xf   : > { %v478_v15 = vld [vmem:[%s472_s25] sm:$0x1]  ;;  %s2155_s25 = smov 24  }
  0x10   : > { %505 = vmatpush.msra.mxu0 %v480_v2  ;;  %vm540_vm2 = vcmp.eq.f32.partialorder %v478_v15, 0.0  ;;  %v801_v15 = vld [vmem:[%s2137_s4 + $0x8] sm:$0xff] }
  0x11   : > { %v541_v17 = vsel %vm540_vm2, 1, %v1690_v16  ;;  %v800_v16 = vld [vmem:[%s2137_s4] sm:$0xff] }
  0x12   : > { %506 = vmatpush.msra.mxu0 %v479_v3  ;;  %v542_v18 = vperm.slane %v541_v17, 0 }
  0x13   : > { %1531 = vmatmul.msk.f32.vlgmr.msra.gmra.mxu0 %vm487_vm0, %v1802_v4 }
  0x14   : > { %vm1836_vm3 = vcmp.eq.s32.totalorder %v542_v18, 1 }
  0x90   : > { %v508_v6 = vpop.f32.mrf.mxu0 }
  0x91   : > { %v1809_v7 = vadd.f32 %v1617_v5, %v508_v6 }
  0x93   : > { %584 = vrot.lane.b32.xlu2 %v1809_v7, %s2154_s15  ;;  %556 = vrot.lane.b32.xlu1 %v1809_v7, %s1684_s16  ;;  %s2167_s15 = smov 40  }
  0x94   : > { %512 = vrot.lane.b32.xlu0 %v1809_v7, %s1685_s17 }
  0x9b   : > { %582 = vrot.lane.b32.xlu2 %v1809_v7, %s1686_s18 }
  0xa3   : > { %651 = vrot.lane.b32.xlu2 %v1809_v7, %s1687_s19 }
  0xab   : > { %718 = vrot.lane.b32.xlu2 %v1809_v7, %s2152_s20  ;;  %s2168_s20 = smov 8  }
  0xb3   : > { %649 = vrot.lane.b32.xlu2 %v1809_v7, %s2153_s21  ;;  %s2169_s21 = smov 24  }
  0xed   : > { %v585_v8 = vpop.permute.xlu2 %584 }
  0xf5   : > { %v583_v9 = vpop.permute.xlu2 %582 }
  0xfd   : > { %v652_v10 = vpop.permute.xlu2 %651 }
 0x105   : > { %v719_v11 = vpop.permute.xlu2 %718  ;;  %v557_v12 = vpop.permute.xlu1 %556 }
 0x106   : > { %v513_v13 = vpop.permute.xlu0 %512  ;;  %577 = vmatpush.msra.mxu3 %v557_v12  ;;  %1541 = vmatpush.xpose.msk.msrb.mxu0 %vm514_vm1, %v719_v11 }
 0x107   : > { %1532 = vmatpush.xpose.msk.msra.mxu1 %vm514_vm1, %v513_v13  ;;  %v803_v13 = vld [vmem:[%s2137_s4 + $0x18] sm:$0xff] }
 0x108   : > { %1535 = vmatpush.xpose.msk.msrb.mxu3 %vm514_vm1, %v585_v8 }
 0x10a   : > { %1533 = vmatmul.msk.f32.vlgmr.msra.gmra.mxu1 %vm514_vm1, %v1809_v7 }
 0x10b   : > { %1538 = vmatpush.xpose.msk.msrb.mxu1 %vm514_vm1, %v652_v10 }
 0x10d   : > { %v650_v14 = vpop.permute.xlu2 %649 }
 0x10f   : > { %823 = vmatpush.msra.mxu1 %v803_v13 }
 0x112   : > { %1539 = vmatmul.msk.f32.vlgmr.msrb.gmra.mxu1 %vm514_vm1, %v650_v14  ;;  %v802_v14 = vld [vmem:[%s2137_s4 + $0x10] sm:$0xff] }
 0x113   : > { %824 = vmatpush.msra.mxu1 %v802_v14 }
 0x115   : > { %825 = vmatpush.msra.mxu1 %v801_v15 }
 0x117   : > { %826 = vmatpush.msra.mxu1 %v800_v16 }
 0x187   : > { %v536_v20 = vpop.f32.mrf.mxu1 }
 0x188   : > { %v539_v21 = vmul.f32 0.35355338, %v536_v20 }
 0x18a   : > { %v544_v22 = vsel %vm1836_vm3, -10000.0, %v539_v21 }
 0x18b   : > { %v545_v23 = vsel %vm514_vm1, %v544_v22, -inf }
 0x18c   : > { %546 = vmax.xlane.f32.xlu0 %v545_v23 }
 0x18f   : > { %v674_v29 = vpop.f32.mrf.mxu1 }
 0x190   : > { %v677_v30 = vmul.f32 0.35355338, %v674_v29  ;;  %v1698_v29 = vmov 32.0  }
 0x192   : > { %v678_v31 = vsel %vm1836_vm3, -10000.0, %v677_v30 }
 0x193   : > { %v679_v32 = vsel %vm514_vm1, %v678_v31, -inf }
 0x1ff   : > { %v547_v24 = vpop.xlane.xlu0 %546 }
 0x200   : > { %v548_v25 = vsub.f32 %v544_v22, %v547_v24  ;;  %v1618_v24 = vld [vmem:[%s2138_s5] ss:$0 sm:$0xff] }
 0x202   : > { %v549_v26 = vmul.f32 1.442695, %v548_v25 }
 0x204   : > { %1633 = vpow2.f32 %v549_v26 }
 0x20a   : > { %v1634_v27 = vpop.eup %1633 }
 0x20b   : > { %v551_v28 = vsel %vm514_vm1, %v1634_v27, 0.0 }
 0x20c   : > { %552 = vadd.xlane.f32.xlu1 %v551_v28 }
 0x225   : > { %716 = vrot.lane.b32.xlu1 %v1809_v7, %s2158_s26  ;;  %s2166_s26 = smov 48  }
 0x24f   : > { %680 = vmax.xlane.f32.xlu1 %v679_v32 }
 0x268   : > { %757 = vrot.lane.b32.xlu1 %v1809_v7, %s2149_s27  ;;  %s2170_s27 = smov 16  }
 0x27f   : > { %v553_v33 = vpop.xlane.xlu1 %552 }
 0x280   : > { %1635 = vrcp.f32 %v553_v33 }
 0x286   : > { %v1636_v34 = vpop.eup %1635 }
 0x287   : > { %v555_v35 = vmul.f32 %v1636_v34, %v1634_v27 }
 0x289   : > { %1534 = vmatmul.msk.f32.vlgmr.msra.gmra.mxu3 %vm514_vm1, %v555_v35 }
 0x291   : > { %1536 = vmatmul.msk.f32.vlgmr.msrb.gmra.mxu3 %vm514_vm1, %v583_v9 }
 0x297   : > { %v717_v36 = vpop.permute.xlu1 %716 }
 0x298   : > { %1542 = vmatmul.msk.f32.vlgmr.msrb.gmra.mxu0 %vm514_vm1, %v717_v36 }
 0x2c2   : > { %v681_v38 = vpop.xlane.xlu1 %680 }
 0x2c3   : > { %v682_v39 = vsub.f32 %v678_v31, %v681_v38 }
 0x2c5   : > { %v683_v40 = vmul.f32 1.442695, %v682_v39 }
 0x2c7   : > { %1637 = vpow2.f32 %v683_v40  ;;  %v874_v40 = vld [vmem:[%s2141_s8 + $0x18] sm:$0xff] }
 0x2cd   : > { %v1638_v49 = vpop.eup %1637 }
 0x2ce   : > { %v685_v50 = vsel %vm514_vm1, %v1638_v49, 0.0 }
 0x2da   : > { %v758_v58 = vpop.permute.xlu1 %757 }
 0x30c   : > { %v1854_v37 = vpop.f32.mrf.mxu3 }
 0x314   : > { %v607_v41 = vpop.f32.mrf.mxu3 }
 0x315   : > { %v610_v42 = vmul.f32 0.35355338, %v607_v41  ;;  %v741_v43 = vpop.f32.mrf.mxu0  ;;  %v873_v41 = vld [vmem:[%s2141_s8 + $0x10] sm:$0xff] }
 0x316   : > { %v744_v44 = vmul.f32 0.35355338, %v741_v43  ;;  %v871_v43 = vld [vmem:[%s2141_s8] sm:$0xff] }
 0x317   : > { %v611_v45 = vsel %vm1836_vm3, -10000.0, %v610_v42  ;;  %v872_v42 = vld [vmem:[%s2141_s8 + $0x8] sm:$0xff] }
 0x318   : > { %v612_v46 = vsel %vm514_vm1, %v611_v45, -inf  ;;  %v745_v47 = vsel %vm1836_vm3, -10000.0, %v744_v44  ;;  %v910_v44 = vld [vmem:[%s2143_s10 + $0x38] sm:$0xff] }
 0x319   : > { %613 = vmax.xlane.f32.xlu2 %v612_v46  ;;  %v746_v48 = vsel %vm514_vm1, %v745_v47, -inf  ;;  %927 = vmatpush.msra.mxu0 %v910_v44  ;;  %v908_v46 = vld [vmem:[%s2143_s10 + $0x28] sm:$0xff] }
 0x31a   : > { %747 = vmax.xlane.f32.xlu0 %v746_v48 }
 0x322   : > { %686 = vadd.xlane.f32.xlu0 %v685_v50 }
 0x331   : > { %623 = vrot.lane.b32.xlu2 %v1809_v7, %s2151_s28 }
 0x38c   : > { %v614_v51 = vpop.xlane.xlu2 %613 }
 0x38d   : > { %v748_v52 = vpop.xlane.xlu0 %747  ;;  %v615_v54 = vsub.f32 %v611_v45, %v614_v51  ;;  %v909_v45 = vld [vmem:[%s2143_s10 + $0x30] sm:$0xff]  ;;  %v906_v51 = vld [vmem:[%s2143_s10 + $0x18] sm:$0xff] }
 0x38e   : > { %v749_v53 = vsub.f32 %v745_v47, %v748_v52  ;;  %928 = vmatpush.msra.mxu0 %v909_v45 }
 0x38f   : > { %v616_v56 = vmul.f32 1.442695, %v615_v54 }
 0x390   : > { %v750_v55 = vmul.f32 1.442695, %v749_v53  ;;  %929 = vmatpush.msra.mxu0 %v908_v46 }
 0x392   : > { %1639 = vpow2.f32 %v750_v55 }
 0x393   : > { %1641 = vpow2.f32 %v616_v56 }
 0x394   : > { %v624_v57 = vpop.permute.xlu2 %623 }
 0x395   : > { %644 = vmatpush.msra.mxu2 %v624_v57  ;;  %v687_v63 = vpop.xlane.xlu0 %686 }
 0x397   : > { %778 = vmatpush.msrb.mxu2 %v758_v58  ;;  %v1619_v58 = vld [vmem:[%s2139_s6] ss:$0 sm:$0xff] }
 0x398   : > { %v1640_v59 = vpop.eup %1639 }
 0x399   : > { %v752_v60 = vsel %vm514_vm1, %v1640_v59, 0.0  ;;  %v1642_v61 = vpop.eup %1641 }
 0x39a   : > { %753 = vadd.xlane.f32.xlu0 %v752_v60  ;;  %v618_v62 = vsel %vm514_vm1, %v1642_v61, 0.0 }
 0x3a2   : > { %619 = vadd.xlane.f32.xlu0 %v618_v62 }
 0x3b6   : > { %690 = vrot.lane.b32.xlu0 %v1809_v7, %s2150_s22 }
 0x40d   : > { %v754_v0 = vpop.xlane.xlu0 %753 }
 0x415   : > { %v620_v1 = vpop.xlane.xlu0 %619 }
 0x416   : > { %1643 = vrcp.f32 %v620_v1  ;;  %v904_v1 = vld [vmem:[%s2143_s10 + $0x8] sm:$0xff] }
 0x417   : > { %1645 = vrcp.f32 %v754_v0  ;;  %v905_v0 = vld [vmem:[%s2143_s10 + $0x10] sm:$0xff] }
 0x418   : > { %1647 = vrcp.f32 %v687_v63 }
 0x419   : > { %1649 = vrcp.f32 %v1698_v29 }
 0x41c   : > { %v1644_v2 = vpop.eup %1643 }
 0x41d   : > { %v622_v3 = vmul.f32 %v1644_v2, %v1642_v61  ;;  %v1646_v5 = vpop.eup %1645  ;;  %v1620_v61 = vld [vmem:[%s2140_s7] ss:$0 sm:$0xff] }
 0x41e   : > { %v1648_v6 = vpop.eup %1647  ;;  %v756_v8 = vmul.f32 %v1646_v5, %v1640_v59  ;;  %v903_v2 = vld [vmem:[%s2143_s10] sm:$0xff] }
 0x41f   : > { %1537 = vmatmul.msk.f32.vlgmr.msra.gmra.mxu2 %vm514_vm1, %v622_v3  ;;  %v689_v9 = vmul.f32 %v1648_v6, %v1638_v49  ;;  %v1650_v30 = vpop.eup %1649  ;;  %v907_v49 = vld [vmem:[%s2143_s10 + $0x20] sm:$0xff] }
 0x420   : > { %v838_v31 = vmul.f32 32.0, %v1650_v30  ;;  %vm842_vm6 = vweird.f32 %v1650_v30  ;;  %930 = vmatpush.msra.mxu0 %v907_v49  ;;  %v1621_v3 = vld [vmem:[%s2142_s9] ss:$0 sm:$0xff] }
 0x422   : > { %v839_v32 = vsub.f32 1.0, %v838_v31  ;;  %931 = vmatpush.msra.mxu0 %v906_v51 }
 0x424   : > { %v840_v33 = vmul.f32 %v1650_v30, %v839_v32  ;;  %932 = vmatpush.msra.mxu0 %v905_v0  ;;  %v1623_v32 = vld [vmem:[%s2145_s12] ss:$0 sm:$0xff] }
 0x426   : > { %v841_v34 = vadd.f32 %v1650_v30, %v840_v33  ;;  %933 = vmatpush.msra.mxu0 %v904_v1 }
 0x427   : > { %1543 = vmatmul.msk.f32.vlgmr.msrb.gmra.mxu2 %vm514_vm1, %v756_v8 }
 0x428   : > { %v691_v10 = vpop.permute.xlu0 %690  ;;  %v1897_v35 = vsel %vm842_vm6, %v1650_v30, %v841_v34  ;;  %934 = vmatpush.msra.mxu0 %v903_v2 }
 0x429   : > { %711 = vmatpush.msra.mxu3 %v691_v10 }
 0x42a   : > { %1540 = vmatmul.msk.f32.vlgmr.msra.gmra.mxu3 %vm514_vm1, %v689_v9  ;;  %v1622_v9 = vld [vmem:[%s2144_s11] ss:$0 sm:$0xff] }
 0x42b   : > { %894 = vmatpush.msrb.mxu3 %v874_v40 }
 0x42d   : > { %895 = vmatpush.msrb.mxu3 %v873_v41 }
 0x42f   : > { %896 = vmatpush.msrb.mxu3 %v872_v42 }
 0x431   : > { %897 = vmatpush.msrb.mxu3 %v871_v43 }
 0x4a2   : > { %v646_v7 = vpop.f32.mrf.mxu2 }
 0x4a3   : > { %784 = vrot.lane.b32.xlu0 %v646_v7, %s2156_s24 }
 0x4aa   : > { %v780_v11 = vpop.f32.mrf.mxu2 }
 0x4ab   : > { %792 = vrot.lane.b32.xlu1 %v780_v11, %s2155_s25 }
 0x4ad   : > { %v713_v12 = vpop.f32.mrf.mxu3 }
 0x4ae   : > { %788 = vrot.lane.b32.xlu2 %v713_v12, %s2157_s23  ;;  %s2161_s23 = smov 104  }
 0x508   : > { %v789_v20 = vpop.permute.xlu2 %788 }
 0x515   : > { %v785_v17 = vpop.permute.xlu0 %784 }
 0x516   : > { %v795_v18 = vsel %vm514_vm1, %v1854_v37, %v785_v17 }
 0x517   : > { %v797_v21 = vsel %vm796_vm4, %v795_v18, %v789_v20  ;;  %v1550_v18 = vld [vmem:[%s2135_s2 + $0x38] sm:$0xff]  ;;  %v1549_v20 = vld [vmem:[%s2135_s2 + $0x30] sm:$0xff] }
 0x518   : > { %997 = vmatpush.msra.mxu2 %v1550_v18 }
 0x51a   : > { %998 = vmatpush.msra.mxu2 %v1549_v20 }
 0x51d   : > { %v793_v22 = vpop.permute.xlu1 %792 }
 0x51e   : > { %v799_v23 = vsel %vm798_vm5, %v797_v21, %v793_v22  ;;  %v1548_v21 = vld [vmem:[%s2135_s2 + $0x28] sm:$0xff]  ;;  %v1547_v22 = vld [vmem:[%s2135_s2 + $0x20] sm:$0xff] }
 0x51f   : > { %1544 = vmatmul.msk.f32.vlgmr.msra.gmra.mxu1 %vm487_vm0, %v799_v23  ;;  %999 = vmatpush.msra.mxu2 %v1548_v21 }
 0x521   : > { %1000 = vmatpush.msra.mxu2 %v1547_v22 }
 0x59c   : > { %v828_v25 = vpop.f32.mrf.mxu1 }
 0x59d   : > { %v829_v26 = vadd.f32 %v1618_v24, %v828_v25 }
 0x59f   : > { %v831_v27 = vadd.f32 %v829_v26, %v1802_v4 }
 0x5a1   : > { %v834_v28 = vsel %vm487_vm0, %v831_v27, 0.0 }
 0x5a2   : > { %835 = vadd.xlane.f32.xlu0 %v834_v28 }
 0x615   : > { %v836_v36 = vpop.xlane.xlu0 %835 }
 0x616   : > { %v844_v37 = vmul.f32 %v1897_v35, %v836_v36  ;;  %v1624_v36 = vld [vmem:[%s2146_s13] ss:$0 sm:$0xff] }
 0x618   : > { %v845_v38 = vsub.f32 %v831_v27, %v844_v37 }
 0x61a   : > { %v846_v39 = vmul.f32 %v845_v38, %v845_v38 }
 0x61c   : > { %v847_v4 = vsel %vm487_vm0, %v846_v39, 0.0  ;;  %v1625_v39 = vld [vmem:[%s2136_s3 + $0x1] ss:$0 sm:$0xff] }
 0x61d   : > { %848 = vadd.xlane.f32.xlu2 %v847_v4 }
 0x690   : > { %v849_v47 = vpop.xlane.xlu2 %848 }
 0x691   : > { %v850_v48 = vmul.f32 %v849_v47, %v1897_v35 }
 0x693   : > { %v851_v50 = vadd.f32 1e-12, %v850_v48 }
 0x695   : > { %1651 = vrsqrt.f32 %v851_v50  ;;  %vm858_vm8 = vweird.f32 %v851_v50 }
 0x69b   : > { %v1652_v52 = vpop.eup %1651 }
 0x69c   : > { %v853_v53 = vmul.f32 %v1652_v52, %v851_v50  ;;  %vm859_vm7 = vweird.f32 %v1652_v52 }
 0x69d   : > { %vm860_vm9 = vmor %vm858_vm8, %vm859_vm7 }
 0x69e   : > { %v854_v54 = vmul.f32 %v1652_v52, %v853_v53 }
 0x6a0   : > { %v855_v55 = vmul.f32 0.5, %v854_v54 }
 0x6a2   : > { %v856_v56 = vsub.f32 1.5, %v855_v55 }
 0x6a4   : > { %v857_v57 = vmul.f32 %v1652_v52, %v856_v56 }
 0x6a6   : > { %v861_v59 = vsel %vm860_vm9, %v1652_v52, %v857_v57 }
 0x6a7   : > { %v862_v60 = vmul.f32 %v861_v59, %v845_v38 }
 0x6a9   : > { %v866_v62 = vmul.f32 %v1619_v58, %v862_v60 }
 0x6ab   : > { %v870_v63 = vadd.f32 %v1620_v61, %v866_v62 }
 0x6ad   : > { %1545 = vmatmul.msk.f32.vlgmr.msrb.gmra.mxu3 %vm487_vm0, %v870_v63 }
 0x730   : > { %v899_v5 = vpop.f32.mrf.mxu3 }
 0x731   : > { %v900_v6 = vadd.f32 %v1621_v3, %v899_v5 }
 0x733   : > { %v902_v8 = vmax.f32 %v900_v6, 0.0 }
 0x735   : > { %1546 = vmatmul.msk.f32.vlgmr.msra.gmra.mxu0 %vm915_vm10, %v902_v8 }
 0x7b2   : > { %v936_v10 = vpop.f32.mrf.mxu0 }
 0x7b3   : > { %v937_v7 = vadd.f32 %v1622_v9, %v936_v10 }
 0x7b5   : > { %v939_v11 = vadd.f32 %v937_v7, %v870_v63 }
 0x7b7   : > { %v942_v12 = vsel %vm487_vm0, %v939_v11, 0.0 }
 0x7b8   : > { %943 = vadd.xlane.f32.xlu1 %v942_v12 }
 0x82b   : > { %v944_v13 = vpop.xlane.xlu1 %943 }
 0x82c   : > { %v945_v14 = vmul.f32 %v944_v13, %v1897_v35 }
 0x82e   : > { %v946_v15 = vsub.f32 %v939_v11, %v945_v14 }
 0x830   : > { %v947_v16 = vmul.f32 %v946_v15, %v946_v15 }
 0x832   : > { %v948_v17 = vsel %vm487_vm0, %v947_v16, 0.0 }
 0x833   : > { %949 = vadd.xlane.f32.xlu0 %v948_v17 }
 0x8a6   : > { %v950_v23 = vpop.xlane.xlu0 %949 }
 0x8a7   : > { %v951_v24 = vmul.f32 %v950_v23, %v1897_v35 }
 0x8a9   : > { %v952_v25 = vadd.f32 1e-12, %v951_v24 }
 0x8ab   : > { %1653 = vrsqrt.f32 %v952_v25  ;;  %vm959_vm12 = vweird.f32 %v952_v25 }
 0x8b1   : > { %v1654_v26 = vpop.eup %1653 }
 0x8b2   : > { %v954_v27 = vmul.f32 %v1654_v26, %v952_v25  ;;  %vm960_vm11 = vweird.f32 %v1654_v26 }
 0x8b3   : > { %vm961_vm13 = vmor %vm959_vm12, %vm960_vm11 }
 0x8b4   : > { %v955_v28 = vmul.f32 %v1654_v26, %v954_v27 }
 0x8b6   : > { %v956_v29 = vmul.f32 0.5, %v955_v28 }
 0x8b8   : > { %v957_v30 = vsub.f32 1.5, %v956_v29 }
 0x8ba   : > { %v958_v31 = vmul.f32 %v1654_v26, %v957_v30 }
 0x8bc   : > { %v962_v33 = vsel %vm961_vm13, %v1654_v26, %v958_v31 }
 0x8bd   : > { %v963_v34 = vmul.f32 %v962_v33, %v946_v15 }
 0x8bf   : > { %v967_v37 = vmul.f32 %v1623_v32, %v963_v34 }
 0x8c1   : > { %v1974_v38 = vadd.f32 %v1624_v36, %v967_v37 }
 0x8c3   : > { %1552 = vmatmul.msk.f32.vlgmr.msra.gmra.mxu2 %vm487_vm0, %v1974_v38 }
 0x946   : > { %v1002_v4 = vpop.f32.mrf.mxu2 }
 0x947   : > { %v1981_v40 = vadd.f32 %v1625_v39, %v1002_v4 }
 0x949   : > { %1045 = vrot.lane.b32.xlu0 %v1981_v40, %s1684_s16  ;;  %1006 = vrot.lane.b32.xlu2 %v1981_v40, %s1685_s17  ;;  %s2162_s16 = smov 88   ;;  %s2163_s17 = smov 112  }
 0x951   : > { %1071 = vrot.lane.b32.xlu2 %v1981_v40, %s1686_s18  ;;  %s2164_s18 = smov 72  }
 0x959   : > { %1140 = vrot.lane.b32.xlu2 %v1981_v40, %s1687_s19  ;;  %s2165_s19 = smov 56  }
 0x961   : > { %1205 = vrot.lane.b32.xlu2 %v1981_v40, %s2161_s23  ;;  %s2171_s23 = sshll.u32 %s2173_s30, 3 }
 0x9a3   : > { %v1007_v41 = vpop.permute.xlu2 %1006 }
 0x9a4   : > { %1553 = vmatpush.xpose.msk.msrb.mxu1 %vm514_vm1, %v1007_v41 }
 0x9a7   : > { %1554 = vmatmul.msk.f32.vlgmr.msrb.gmra.mxu1 %vm514_vm1, %v1981_v40 }
 0x9ab   : > { %v1072_v42 = vpop.permute.xlu2 %1071 }
 0x9b3   : > { %v1141_v44 = vpop.permute.xlu2 %1140 }
 0x9bb   : > { %v1046_v43 = vpop.permute.xlu0 %1045  ;;  %v1206_v60 = vpop.permute.xlu2 %1205 }
 0x9bc   : > { %1066 = vmatpush.msra.mxu3 %v1046_v43  ;;  %v1567_v43 = vld [vmem:[%s2137_s4 + $0x30] sm:$0xff] }
 0x9be   : > { %1559 = vmatpush.xpose.msk.msrb.mxu3 %vm514_vm1, %v1141_v44  ;;  %v1566_v44 = vld [vmem:[%s2137_s4 + $0x28] sm:$0xff] }
 0xa24   : > { %v1029_v45 = vpop.f32.mrf.mxu1 }
 0xa25   : > { %v1032_v46 = vmul.f32 0.35355338, %v1029_v45  ;;  %v1565_v45 = vld [vmem:[%s2137_s4 + $0x20] sm:$0xff] }
 0xa27   : > { %v1033_v47 = vsel %vm1836_vm3, -10000.0, %v1032_v46 }
 0xa28   : > { %v1034_v48 = vsel %vm514_vm1, %v1033_v47, -inf }
 0xa29   : > { %1035 = vmax.xlane.f32.xlu1 %v1034_v48 }
 0xa42   : > { %1073 = vrot.lane.b32.xlu1 %v1981_v40, %s2162_s16 }
 0xa4a   : > { %1138 = vrot.lane.b32.xlu1 %v1981_v40, %s2163_s17 }
 0xa9c   : > { %v1036_v49 = vpop.xlane.xlu1 %1035 }
 0xa9d   : > { %v1037_v50 = vsub.f32 %v1033_v47, %v1036_v49 }
 0xa9f   : > { %v1038_v51 = vmul.f32 1.442695, %v1037_v50 }
 0xaa1   : > { %1655 = vpow2.f32 %v1038_v51 }
 0xaa7   : > { %v1656_v52 = vpop.eup %1655 }
 0xaa8   : > { %v1040_v53 = vsel %vm514_vm1, %v1656_v52, 0.0 }
 0xaa9   : > { %1041 = vadd.xlane.f32.xlu0 %v1040_v53 }
 0xab4   : > { %v1074_v54 = vpop.permute.xlu1 %1073 }
 0xab5   : > { %1556 = vmatpush.xpose.msk.msrb.mxu2 %vm514_vm1, %v1074_v54 }
 0xab8   : > { %1557 = vmatmul.msk.f32.vlgmr.msrb.gmra.mxu2 %vm514_vm1, %v1072_v42  ;;  %v1568_v42 = vld [vmem:[%s2137_s4 + $0x38] sm:$0xff] }
 0xabc   : > { %v1139_v58 = vpop.permute.xlu1 %1138 }
 0xabd   : > { %1207 = vrot.lane.b32.xlu0 %v1981_v40, %s2164_s18  ;;  %s476_s18 = scalar_lea.vmem %s2147_s14, %s2171_s23 }
 0xb1c   : > { %v1042_v55 = vpop.xlane.xlu0 %1041 }
 0xb1d   : > { %1657 = vrcp.f32 %v1042_v55 }
 0xb23   : > { %v1658_v56 = vpop.eup %1657 }
 0xb24   : > { %v1044_v57 = vmul.f32 %v1658_v56, %v1656_v52  ;;  %v1626_v52 = vld [vmem:[%s2138_s5 + $0x1] ss:$0 sm:$0xff] }
 0xb26   : > { %1555 = vmatmul.msk.f32.vlgmr.msra.gmra.mxu3 %vm514_vm1, %v1044_v57 }
 0xb27   : > { %1312 = vmatpush.msra.mxu3 %v1568_v42 }
 0xb29   : > { %1313 = vmatpush.msra.mxu3 %v1567_v43 }
 0xb2b   : > { %1314 = vmatpush.msra.mxu3 %v1566_v44 }
 0xb2d   : > { %1315 = vmatpush.msra.mxu3 %v1565_v45 }
 0xb2e   : > { %1560 = vmatmul.msk.f32.vlgmr.msrb.gmra.mxu3 %vm514_vm1, %v1139_v58 }
 0xb2f   : > { %v1208_v59 = vpop.permute.xlu0 %1207 }
 0xb30   : > { %1562 = vmatpush.xpose.msk.msra.mxu2 %vm514_vm1, %v1208_v59 }
 0xb33   : > { %1563 = vmatmul.msk.f32.vlgmr.msra.gmra.mxu2 %vm514_vm1, %v1206_v60 }
 0xb3b   : > { %v1096_v61 = vpop.f32.mrf.mxu2 }
 0xb3c   : > { %v1099_v62 = vmul.f32 0.35355338, %v1096_v61 }
 0xb3e   : > { %v1100_v63 = vsel %vm1836_vm3, -10000.0, %v1099_v62  ;;  %v1576_v62 = vld [vmem:[%s2141_s8 + $0x38] sm:$0xff] }
 0xb3f   : > { %v1101_v0 = vsel %vm514_vm1, %v1100_v63, -inf }
 0xb40   : > { %1102 = vmax.xlane.f32.xlu0 %v1101_v0  ;;  %v1573_v0 = vld [vmem:[%s2141_s8 + $0x20] sm:$0xff] }
 0xba9   : > { %v2016_v1 = vpop.f32.mrf.mxu3 }
 0xbb1   : > { %v1163_v2 = vpop.f32.mrf.mxu3 }
 0xbb2   : > { %v1166_v3 = vmul.f32 0.35355338, %v1163_v2  ;;  %v1585_v2 = vld [vmem:[%s2143_s10 + $0x70] sm:$0xff] }
 0xbb3   : > { %v1103_v5 = vpop.xlane.xlu0 %1102 }
 0xbb4   : > { %v1104_v6 = vsub.f32 %v1100_v63, %v1103_v5  ;;  %v1167_v8 = vsel %vm1836_vm3, -10000.0, %v1166_v3  ;;  %v1574_v63 = vld [vmem:[%s2141_s8 + $0x28] sm:$0xff] }
 0xbb5   : > { %v1168_v9 = vsel %vm514_vm1, %v1167_v8, -inf  ;;  %v1584_v3 = vld [vmem:[%s2143_s10 + $0x68] sm:$0xff] }
 0xbb6   : > { %v1105_v10 = vmul.f32 1.442695, %v1104_v6  ;;  %1169 = vmax.xlane.f32.xlu1 %v1168_v9  ;;  %v1230_v7 = vpop.f32.mrf.mxu2 }
 0xbb7   : > { %v1233_v11 = vmul.f32 0.35355338, %v1230_v7 }
 0xbb8   : > { %1659 = vpow2.f32 %v1105_v10  ;;  %v1582_v10 = vld [vmem:[%s2143_s10 + $0x58] sm:$0xff] }
 0xbb9   : > { %v1234_v12 = vsel %vm1836_vm3, -10000.0, %v1233_v11 }
 0xbba   : > { %v1235_v13 = vsel %vm514_vm1, %v1234_v12, -inf }
 0xbbb   : > { %1236 = vmax.xlane.f32.xlu2 %v1235_v13 }
 0xbbe   : > { %v1660_v14 = vpop.eup %1659 }
 0xbbf   : > { %v1107_v15 = vsel %vm514_vm1, %v1660_v14, 0.0 }
 0xbc0   : > { %1108 = vadd.xlane.f32.xlu0 %v1107_v15 }
 0xbd4   : > { %1112 = vrot.lane.b32.xlu0 %v1981_v40, %s2165_s19 }
 0xc29   : > { %v1170_v16 = vpop.xlane.xlu1 %1169 }
 0xc2a   : > { %v1171_v17 = vsub.f32 %v1167_v8, %v1170_v16  ;;  %v1583_v8 = vld [vmem:[%s2143_s10 + $0x60] sm:$0xff] }
 0xc2b   : > { %v1627_v16 = vld [vmem:[%s2139_s6 + $0x1] ss:$0 sm:$0xff] }
 0xc2c   : > { %v1172_v18 = vmul.f32 1.442695, %v1171_v17 }
 0xc2e   : > { %1661 = vpow2.f32 %v1172_v18  ;;  %v1237_v20 = vpop.xlane.xlu2 %1236 }
 0xc2f   : > { %v1238_v21 = vsub.f32 %v1234_v12, %v1237_v20  ;;  %v1628_v20 = vld [vmem:[%s2140_s7 + $0x1] ss:$0 sm:$0xff] }
 0xc31   : > { %v1239_v22 = vmul.f32 1.442695, %v1238_v21 }
 0xc33   : > { %1663 = vpow2.f32 %v1239_v22  ;;  %v1109_v25 = vpop.xlane.xlu0 %1108 }
 0xc34   : > { %v1662_v19 = vpop.eup %1661  ;;  %1665 = vrcp.f32 %v1109_v25  ;;  %v1629_v25 = vld [vmem:[%s2142_s9 + $0x1] ss:$0 sm:$0xff] }
 0xc35   : > { %v1174_v23 = vsel %vm514_vm1, %v1662_v19, 0.0 }
 0xc36   : > { %1175 = vadd.xlane.f32.xlu1 %v1174_v23  ;;  %v1580_v23 = vld [vmem:[%s2143_s10 + $0x48] sm:$0xff] }
 0xc39   : > { %v1664_v24 = vpop.eup %1663 }
 0xc3a   : > { %v1241_v26 = vsel %vm514_vm1, %v1664_v24, 0.0  ;;  %v1666_v27 = vpop.eup %1665 }
 0xc3b   : > { %1242 = vadd.xlane.f32.xlu2 %v1241_v26  ;;  %v1111_v28 = vmul.f32 %v1666_v27, %v1660_v14 }
 0xc46   : > { %v1113_v29 = vpop.permute.xlu0 %1112 }
 0xc47   : > { %1133 = vmatpush.msra.mxu1 %v1113_v29  ;;  %v1630_v29 = vld [vmem:[%s2144_s11 + $0x1] ss:$0 sm:$0xff] }
 0xc48   : > { %1558 = vmatmul.msk.f32.vlgmr.msra.gmra.mxu1 %vm514_vm1, %v1111_v28 }
 0xc4f   : > { %1179 = vrot.lane.b32.xlu1 %v1981_v40, %s2166_s26 }
 0xc53   : > { %1246 = vrot.lane.b32.xlu2 %v1981_v40, %s2167_s15 }
 0xca9   : > { %v1176_v32 = vpop.xlane.xlu1 %1175 }
 0xcae   : > { %v1243_v30 = vpop.xlane.xlu2 %1242 }
 0xcaf   : > { %1667 = vrcp.f32 %v1243_v30 }
 0xcb0   : > { %1669 = vrcp.f32 %v1176_v32 }
 0xcb5   : > { %v1668_v31 = vpop.eup %1667 }
 0xcb6   : > { %v1245_v33 = vmul.f32 %v1668_v31, %v1664_v24  ;;  %v1247_v34 = vpop.permute.xlu2 %1246  ;;  %v1670_v36 = vpop.eup %1669  ;;  %v1579_v24 = vld [vmem:[%s2143_s10 + $0x40] sm:$0xff] }
 0xcb7   : > { %1267 = vmatpush.msrb.mxu1 %v1247_v34  ;;  %v1178_v37 = vmul.f32 %v1670_v36, %v1662_v19  ;;  %v1581_v19 = vld [vmem:[%s2143_s10 + $0x50] sm:$0xff] }
 0xcb8   : > { %1564 = vmatmul.msk.f32.vlgmr.msrb.gmra.mxu1 %vm514_vm1, %v1245_v33 }
 0xcc1   : > { %v1180_v39 = vpop.permute.xlu1 %1179 }
 0xcc2   : > { %1200 = vmatpush.msrb.mxu0 %v1180_v39 }
 0xcc3   : > { %1561 = vmatmul.msk.f32.vlgmr.msrb.gmra.mxu0 %vm514_vm1, %v1178_v37 }
 0xcc4   : > { %1380 = vmatpush.msra.mxu0 %v1576_v62 }
 0xcc5   : > { %v1135_v4 = vpop.f32.mrf.mxu1 }
 0xcc6   : > { %1273 = vrot.lane.b32.xlu0 %v1135_v4, %s2168_s20 }
 0xd35   : > { %v1269_v40 = vpop.f32.mrf.mxu1 }
 0xd36   : > { %1281 = vrot.lane.b32.xlu1 %v1269_v40, %s2169_s21 }
 0xd38   : > { %v1274_v46 = vpop.permute.xlu0 %1273 }
 0xd39   : > { %v1284_v47 = vsel %vm514_vm1, %v2016_v1, %v1274_v46  ;;  %v1586_v1 = vld [vmem:[%s2143_s10 + $0x78] sm:$0xff] }
 0xd3a   : > { %1414 = vmatpush.msrb.mxu2 %v1586_v1 }
 0xd3c   : > { %1415 = vmatpush.msrb.mxu2 %v1585_v2 }
 0xd3e   : > { %1416 = vmatpush.msrb.mxu2 %v1584_v3 }
 0xd40   : > { %v1202_v41 = vpop.f32.mrf.mxu0  ;;  %1417 = vmatpush.msrb.mxu2 %v1583_v8 }
 0xd41   : > { %1277 = vrot.lane.b32.xlu0 %v1202_v41, %s2170_s27 }
 0xd42   : > { %1418 = vmatpush.msrb.mxu2 %v1582_v10 }
 0xd44   : > { %1419 = vmatpush.msrb.mxu2 %v1581_v19 }
 0xd46   : > { %1420 = vmatpush.msrb.mxu2 %v1580_v23 }
 0xd48   : > { %1421 = vmatpush.msrb.mxu2 %v1579_v24 }
 0xda8   : > { %v1282_v49 = vpop.permute.xlu1 %1281 }
 0xdb3   : > { %v1278_v48 = vpop.permute.xlu0 %1277 }
 0xdb4   : > { %v1285_v50 = vsel %vm796_vm4, %v1284_v47, %v1278_v48 }
 0xdb5   : > { %v1286_v51 = vsel %vm798_vm5, %v1285_v50, %v1282_v49  ;;  %v1631_v49 = vld [vmem:[%s2145_s12 + $0x1] ss:$0 sm:$0xff] }
 0xdb6   : > { %1570 = vmatmul.msk.f32.vlgmr.msra.gmra.mxu3 %vm487_vm0, %v1286_v51 }
 0xe39   : > { %v1317_v53 = vpop.f32.mrf.mxu3 }
 0xe3a   : > { %v1318_v54 = vadd.f32 %v1626_v52, %v1317_v53 }
 0xe3c   : > { %v1320_v55 = vadd.f32 %v1318_v54, %v1974_v38  ;;  %v1575_v38 = vld [vmem:[%s2141_s8 + $0x30] sm:$0xff] }
 0xe3d   : > { %1381 = vmatpush.msra.mxu0 %v1575_v38 }
 0xe3e   : > { %v1325_v56 = vsel %vm487_vm0, %v1320_v55, 0.0 }
 0xe3f   : > { %1326 = vadd.xlane.f32.xlu2 %v1325_v56  ;;  %1382 = vmatpush.msra.mxu0 %v1574_v63 }
 0xe41   : > { %1383 = vmatpush.msra.mxu0 %v1573_v0 }
 0xeb2   : > { %v1327_v57 = vpop.xlane.xlu2 %1326 }
 0xeb3   : > { %v1328_v58 = vmul.f32 %v1327_v57, %v1897_v35 }
 0xeb5   : > { %v1329_v59 = vsub.f32 %v1320_v55, %v1328_v58 }
 0xeb7   : > { %v1330_v60 = vmul.f32 %v1329_v59, %v1329_v59 }
 0xeb9   : > { %v1331_v61 = vsel %vm487_vm0, %v1330_v60, 0.0 }
 0xeba   : > { %1332 = vadd.xlane.f32.xlu0 %v1331_v61 }
 0xf2d   : > { %v1333_v5 = vpop.xlane.xlu0 %1332 }
 0xf2e   : > { %v1334_v6 = vmul.f32 %v1333_v5, %v1897_v35 }
 0xf30   : > { %v1335_v9 = vadd.f32 1e-12, %v1334_v6 }
 0xf32   : > { %1671 = vrsqrt.f32 %v1335_v9  ;;  %vm1342_vm15 = vweird.f32 %v1335_v9 }
 0xf38   : > { %v1672_v7 = vpop.eup %1671 }
 0xf39   : > { %v1337_v11 = vmul.f32 %v1672_v7, %v1335_v9  ;;  %vm1343_vm14 = vweird.f32 %v1672_v7 }
 0xf3a   : > { %vm1344_vm1 = vmor %vm1342_vm15, %vm1343_vm14 }
 0xf3b   : > { %v1338_v12 = vmul.f32 %v1672_v7, %v1337_v11 }
 0xf3d   : > { %v1339_v13 = vmul.f32 0.5, %v1338_v12 }
 0xf3f   : > { %v1340_v14 = vsub.f32 1.5, %v1339_v13 }
 0xf41   : > { %v1341_v15 = vmul.f32 %v1672_v7, %v1340_v14 }
 0xf43   : > { %v1345_v17 = vsel %vm1344_vm1, %v1672_v7, %v1341_v15 }
 0xf44   : > { %v1346_v18 = vmul.f32 %v1345_v17, %v1329_v59 }
 0xf46   : > { %v1350_v21 = vmul.f32 %v1627_v16, %v1346_v18 }
 0xf48   : > { %v1354_v22 = vadd.f32 %v1628_v20, %v1350_v21 }
 0xf4a   : > { %1578 = vmatmul.msk.f32.vlgmr.msra.gmra.mxu0 %vm487_vm0, %v1354_v22 }
 0xfc7   : > { %v1385_v26 = vpop.f32.mrf.mxu0 }
 0xfc8   : > { %v1386_v27 = vadd.f32 %v1629_v25, %v1385_v26 }
 0xfca   : > { %v1388_v28 = vmax.f32 %v1386_v27, 0.0 }
 0xfcc   : > { %1588 = vmatmul.msk.f32.vlgmr.msrb.gmra.mxu2 %vm915_vm10, %v1388_v28 }
0x104f   : > { %v1423_v30 = vpop.f32.mrf.mxu2 }
0x1050   : > { %v1424_v31 = vadd.f32 %v1630_v29, %v1423_v30 }
0x1052   : > { %v1426_v32 = vadd.f32 %v1424_v31, %v1354_v22 }
0x1054   : > { %v1431_v33 = vsel %vm487_vm0, %v1426_v32, 0.0 }
0x1055   : > { %1432 = vadd.xlane.f32.xlu1 %v1431_v33 }
0x10c8   : > { %v1433_v34 = vpop.xlane.xlu1 %1432 }
0x10c9   : > { %v1434_v36 = vmul.f32 %v1433_v34, %v1897_v35 }
0x10cb   : > { %v1435_v37 = vsub.f32 %v1426_v32, %v1434_v36 }
0x10cd   : > { %v1436_v39 = vmul.f32 %v1435_v37, %v1435_v37 }
0x10cf   : > { %v1437_v4 = vsel %vm487_vm0, %v1436_v39, 0.0 }
0x10d0   : > { %1438 = vadd.xlane.f32.xlu2 %v1437_v4 }
0x1143   : > { %v1439_v40 = vpop.xlane.xlu2 %1438 }
0x1144   : > { %v1440_v41 = vmul.f32 %v1439_v40, %v1897_v35  ;;  %v1632_v35 = vld [vmem:[%s2146_s13 + $0x1] ss:$0 sm:$0xff] }
0x1146   : > { %v1441_v42 = vadd.f32 1e-12, %v1440_v41 }
0x1148   : > { %1673 = vrsqrt.f32 %v1441_v42  ;;  %vm1448_vm3 = vweird.f32 %v1441_v42 }
0x114e   : > { %v1674_v43 = vpop.eup %1673 }
0x114f   : > { %v1443_v44 = vmul.f32 %v1674_v43, %v1441_v42  ;;  %vm1449_vm2 = vweird.f32 %v1674_v43 }
0x1150   : > { %vm1450_vm4 = vmor %vm1448_vm3, %vm1449_vm2 }
0x1151   : > { %v1444_v45 = vmul.f32 %v1674_v43, %v1443_v44 }
0x1153   : > { %v1445_v46 = vmul.f32 0.5, %v1444_v45 }
0x1155   : > { %v1446_v47 = vsub.f32 1.5, %v1445_v46 }
0x1157   : > { %v1447_v48 = vmul.f32 %v1674_v43, %v1446_v47 }
0x1159   : > { %v1451_v50 = vsel %vm1450_vm4, %v1674_v43, %v1447_v48 }
0x115a   : > { %v1452_v51 = vmul.f32 %v1451_v50, %v1435_v37 }
0x115c   : > { %v1456_v52 = vmul.f32 %v1631_v49, %v1452_v51 }
0x115e   : > { %v1460_v53 = vadd.f32 %v1632_v35, %v1456_v52 }
0x1160   : > { %1461 = vst.msk [vmem:[%s476_s18] sm:$0xff] %vm487_vm0, %v1460_v53 }
0x1161 PF: > { %s24_s29 = sadd.s32 1, %s1681_s29  }
0x1162   : > { %p21_p4 = scmp.ge.s32.totalorder %s24_s29, 4  }
0x1164   :  { %23 = sbr.rel (!%p21_p4) target bundleno = 1 (0x1), region = 121 }

// kernel: transformer_forward.4
= control target key start
LH: loop header
LB: loop body
LE: loop exit
PB: predicated region body
PF: predicated region fallthrough
CT: control target
= control target key end

     0   :  { %s3672_s0 = inlined_call_operand.vmem [shape: f32[2,8,32], index: 0, kind: input, shape index: {}]   ;;  %s3673_s1 = inlined_call_operand.vmem [shape: f32[2,8,32], index: 1, kind: input, shape index: {}]   ;;  %s3674_s2 = inlined_call_operand.vmem [shape: f32[2,8,8], index: 2, kind: input, shape index: {}]   ;;  %s3675_s3 = inlined_call_operand.vmem [shape: f32[2,1,8], index: 3, kind: input, shape index: {}]   ;;  %s3676_s4 = inlined_call_operand.vmem [shape: f32[2,32,96], index: 4, kind: input, shape index: {}]   ;;  %s3677_s5 = inlined_call_operand.vmem [shape: f32[2,1,96], index: 5, kind: input, shape index: {}]   ;;  %s3678_s6 = inlined_call_operand.vmem [shape: f32[2,32,32], index: 6, kind: input, shape index: {}]   ;;  %s3679_s7 = inlined_call_operand.vmem [shape: f32[2,1,32], index: 7, kind: input, shape index: {}]   ;;  %s3680_s8 = inlined_call_operand.vmem [shape: f32[2,1,32], index: 8, kind: input, shape index: {}]   ;;  %s3681_s9 = inlined_call_operand.vmem [shape: f32[2,1,32], index: 9, kind: input, shape index: {}]   ;;  %s3682_s10 = inlined_call_operand.vmem [shape: f32[2,32,32], index: 10, kind: input, shape index: {}]   ;;  %s3683_s11 = inlined_call_operand.vmem [shape: f32[2,1,32], index: 11, kind: input, shape index: {}]   ;;  %s3684_s12 = inlined_call_operand.vmem [shape: f32[2,32,64], index: 12, kind: input, shape index: {}]   ;;  %s3685_s13 = inlined_call_operand.vmem [shape: f32[2,1,64], index: 13, kind: input, shape index: {}]   ;;  %s3686_s14 = inlined_call_operand.vmem [shape: f32[2,32,32], index: 14, kind: input, shape index: {}]   ;;  %s3687_s15 = inlined_call_operand.vmem [shape: f32[2,1,32], index: 15, kind: input, shape index: {}]   ;;  %s3688_s16 = inlined_call_operand.vmem [shape: f32[2,1,32], index: 16, kind: input, shape index: {}]   ;;  %s3689_s17 = inlined_call_operand.vmem [shape: f32[2,1,32], index: 17, kind: input, shape index: {}]   ;;  %s3690_s18 = inlined_call_operand.vmem [shape: f32[2,32,64], index: 18, kind: input, shape index: {}]   ;;  %s3691_s19 = inlined_call_operand.vmem [shape: f32[2,1,64], index: 19, kind: input, shape index: {}]   ;;  %s3692_s20 = inlined_call_operand.vmem [shape: f32[2,64,32], index: 20, kind: input, shape index: {}]   ;;  %s3693_s21 = inlined_call_operand.vmem [shape: f32[2,1,32], index: 21, kind: input, shape index: {}]   ;;  %s3694_s22 = inlined_call_operand.vmem [shape: f32[2,1,32], index: 22, kind: input, shape index: {}]   ;;  %s3695_s23 = inlined_call_operand.vmem [shape: f32[2,1,32], index: 23, kind: input, shape index: {}]   ;;  %s3696_s24 = inlined_call_operand.vmem [shape: f32[2,8,32], index: 24, kind: output, shape index: {}]  }
   0x1   :  { %3732 = sst [smem:[#allocation4_spill]] %s3672_s0 }
   0x2   :  { %3733 = sst [smem:[#allocation5_spill]] %s3673_s1 }
   0x3   :  { %3734 = sst [smem:[#allocation6_spill]] %s3674_s2 }
   0x4   :  { %3735 = sst [smem:[#allocation7_spill]] %s3675_s3 }
   0x5   :  { %3736 = sst [smem:[#allocation8_spill]] %s3676_s4 }
   0x6   :  { %3737 = sst [smem:[#allocation9_spill]] %s3677_s5  ;;  %s3069_s5 = smov 0  }
   0x7   :  { %3738 = sst [smem:[#allocation10_spill]] %s3678_s6 }
   0x8   :  { %3739 = sst [smem:[#allocation11_spill]] %s3679_s7 }
   0x9   :  { %3740 = sst [smem:[#allocation12_spill]] %s3680_s8 }
   0xa   :  { %3741 = sst [smem:[#allocation13_spill]] %s3681_s9 }
   0xb   :  { %3742 = sst [smem:[#allocation14_spill]] %s3682_s10 }
   0xc   :  { %3743 = sst [smem:[#allocation15_spill]] %s3683_s11 }
   0xd   :  { %3744 = sst [smem:[#allocation16_spill]] %s3684_s12 }
   0xe   :  { %3745 = sst [smem:[#allocation17_spill]] %s3685_s13 }
   0xf   :  { %3746 = sst [smem:[#allocation18_spill]] %s3686_s14 }
  0x10   :  { %3747 = sst [smem:[#allocation19_spill]] %s3687_s15 }
  0x11   :  { %3748 = sst [smem:[#allocation20_spill]] %s3696_s24 }
  0x12 LB: > { %3749 = sst [smem:[#allocation2_spill]] %s2926_s5  ;;  %s2674_s26 = sadd.s32 4294967295, %s2926_s5   ;;  %s2926_s5 = sphi %s3069_s5, %s34_s5  }
  0x13   : > { %p2678_p0 = scmp.ge.s32.totalorder %s2926_s5, 1  ;;  %p687_p1 = scmp.lt.s32.totalorder %s2926_s5, 3 }
  0x15   : > { %p688_p2 = pnand %p2678_p0, %p687_p1 }
  0x17   : > { %691 = sbr.rel (%p688_p2) target bundleno = 6736 (0x1a50), region = 116 }
  0x1c   : > { %s3750_s6 = sld [smem:[#allocation8_spill]]  ;;  %p762_p3 = scmp.lt.s32.totalorder %s2674_s26, 1  ;;  %vm793_vm0 = vcmask 261120   ;;  %vm820_vm1 = vcmask 64512   ;;  %vm1099_vm3 = vcmask 130048   ;;  %vm1101_vm4 = vcmask 195584  }
  0x1d   : > { %s3752_s1 = sld [smem:[#allocation4_spill]]  ;;  %s3708_s0 = smov 72   ;;  %vm1629_vm14 = vcmask 523264  }
  0x1e   : > { %s3796_s26 = smov (!%p762_p3, %s2674_s26), 1  ;;  %s3753_s29 = sld [smem:[#allocation9_spill]] }
  0x1f   : > { %s3092_s25 = sshll.u32 %s3796_s26, 3  ;;  %s3718_s7 = smov 120  }
  0x20   : > { %3751 = sst [smem:[#allocation3_spill]] %s3092_s25  ;;  %s3710_s30 = smov 96  }
  0x21   : > { %s3716_s3 = smov 112   ;;  %s3712_s8 = smov 80  }
  0x22   : > { %v788_v0 = vld [vmem:[%s3750_s6 + $0x18] sm:$0xff]  ;;  %v787_v1 = vld [vmem:[%s3750_s6 + $0x10] sm:$0xff]  ;;  %v786_v2 = vld [vmem:[%s3750_s6 + $0x8] sm:$0xff]  ;;  %s3702_s4 = smov 88   ;;  %s3754_s2 = sld [smem:[#allocation6_spill]] }
  0x23   : > { %809 = vmatpush.msra.mxu0 %v788_v0  ;;  %v785_v3 = vld [vmem:[%s3750_s6] sm:$0xff]  ;;  %s765_s27 = scalar_lea.vmem %s3752_s1, %s3092_s25  ;;  %s3714_s1 = smov 104  }
  0x24   : > { %v3098_v4 = vld [vmem:[%s765_s27] sm:$0xff]  ;;  %s3705_s27 = smov 40   ;;  %s3706_s28 = smov 56  }
  0x25   : > { %810 = vmatpush.msra.mxu0 %v787_v1  ;;  %v2816_v5 = vld [vmem:[%s3753_s29] ss:$0 sm:$0xff]  ;;  %s3757_s12 = sld [smem:[#allocation16_spill]] }
  0x26   : > { %s3758_s5 = sld [smem:[#allocation5_spill]] }
  0x27   : > { %811 = vmatpush.msra.mxu0 %v786_v2  ;;  %s3759_s10 = sld [smem:[#allocation14_spill]] }
  0x28   : > { %s3760_s13 = sld [smem:[#allocation17_spill]] }
  0x29   : > { %812 = vmatpush.msra.mxu0 %v785_v3  ;;  %s3765_s9 = sld [smem:[#allocation13_spill]] }
  0x2a   : > { %2683 = vmatmul.msk.f32.vlgmr.msra.gmra.mxu0 %vm793_vm0, %v3098_v4  ;;  %s3766_s11 = sld [smem:[#allocation15_spill]] }
  0x2b   : > { %s3777_s14 = sld [smem:[#allocation18_spill]] }
  0x2c   : > { %s769_s24 = scalar_lea.vmem %s3758_s5, %s3092_s25  ;;  %s3767_s5 = sld [smem:[#allocation7_spill]] }
  0x2d   : > { %s3778_s15 = sld [smem:[#allocation19_spill]] }
  0xa7   : > { %v814_v6 = vpop.f32.mrf.mxu0 }
  0xa8   : > { %v3105_v7 = vadd.f32 %v2816_v5, %v814_v6 }
  0xaa   : > { %1021 = vrot.lane.b32.xlu2 %v3105_v7, %s3708_s0  ;;  %885 = vrot.lane.b32.xlu1 %v3105_v7, %s3718_s7  ;;  %s3761_s0 = smov 120   ;;  %s3762_s7 = smov 112  }
  0xab   : > { %818 = vrot.lane.b32.xlu0 %v3105_v7, %s3710_s30  ;;  %s3755_s30 = sld [smem:[#allocation10_spill]] }
  0xb2   : > { %952 = vrot.lane.b32.xlu2 %v3105_v7, %s3716_s3  ;;  %954 = vrot.lane.b32.xlu1 %v3105_v7, %s3712_s8  ;;  %s3756_s3 = sld [smem:[#allocation11_spill]]  ;;  %s3772_s8 = smov 72  }
  0xb3   : > { %887 = vrot.lane.b32.xlu0 %v3105_v7, %s3702_s4  ;;  %s773_s4 = scalar_lea.vmem %s3754_s2, %s3092_s25  ;;  %s3704_s2 = smov 48  }
  0xb4   : > { %v3134_v15 = vld [vmem:[%s773_s4] sm:$0xff]  ;;  %s3707_s4 = smov 64   ;;  %s3783_s25 = sld [smem:[#allocation10_spill]] }
  0xb5   : > { %vm846_vm2 = vcmp.eq.f32.partialorder %v3134_v15, 0.0 }
  0xbb   : > { %1019 = vrot.lane.b32.xlu0 %v3105_v7, %s3714_s1  ;;  %s3773_s1 = smov 88  }
 0x104   : > { %v1022_v10 = vpop.permute.xlu2 %1021 }
 0x10c   : > { %v953_v13 = vpop.permute.xlu2 %952 }
 0x11c   : > { %v886_v8 = vpop.permute.xlu1 %885 }
 0x11d   : > { %v819_v9 = vpop.permute.xlu0 %818 }
 0x11e   : > { %2684 = vmatpush.xpose.msk.msra.mxu1 %vm820_vm1, %v819_v9  ;;  %v1106_v9 = vld [vmem:[%s3755_s30 + $0x18] sm:$0xff] }
 0x121   : > { %2685 = vmatmul.msk.f32.vlgmr.msra.gmra.mxu1 %vm820_vm1, %v3105_v7 }
 0x124   : > { %v955_v11 = vpop.permute.xlu1 %954 }
 0x125   : > { %v888_v12 = vpop.permute.xlu0 %887  ;;  %2690 = vmatpush.xpose.msk.msrb.mxu1 %vm820_vm1, %v955_v11  ;;  %v1104_v11 = vld [vmem:[%s3755_s30 + $0x8] sm:$0xff] }
 0x126   : > { %2687 = vmatpush.xpose.msk.msrb.mxu0 %vm820_vm1, %v888_v12  ;;  %v1103_v12 = vld [vmem:[%s3755_s30] sm:$0xff] }
 0x129   : > { %2688 = vmatmul.msk.f32.vlgmr.msrb.gmra.mxu0 %vm820_vm1, %v886_v8  ;;  %2691 = vmatmul.msk.f32.vlgmr.msrb.gmra.mxu1 %vm820_vm1, %v953_v13 }
 0x12a   : > { %2693 = vmatpush.xpose.msk.msra.mxu0 %vm820_vm1, %v1022_v10  ;;  %v1105_v10 = vld [vmem:[%s3755_s30 + $0x10] sm:$0xff]  ;;  %1126 = vmatpush.msra.mxu1 %v1106_v9  ;;  %s776_s30 = scalar_lea.vmem %s3767_s5, %s3796_s26  ;;  %s3770_s26 = smov 80  }
 0x12b   : > { %s3785_s5 = sld [smem:[#allocation14_spill]] }
 0x12c   : > { %1127 = vmatpush.msra.mxu1 %v1105_v10  ;;  %v2943_v10 = vmov 0  }
 0x12d   : > { %v1020_v14 = vpop.permute.xlu0 %1019 }
 0x12e   : > { %1128 = vmatpush.msra.mxu1 %v1104_v11 }
 0x130   : > { %1129 = vmatpush.msra.mxu1 %v1103_v12 }
 0x131   : > { %2694 = vmatmul.msk.f32.vlgmr.msra.gmra.mxu0 %vm820_vm1, %v1020_v14 }
 0x19e   : > { %v842_v16 = vpop.f32.mrf.mxu1 }
 0x19f   : > { %v845_v17 = vmul.f32 0.35355338, %v842_v16 }
 0x1a1   : > { %v847_v18 = vsel %vm846_vm2, -10000.0, %v845_v17 }
 0x1a2   : > { %v848_v19 = vsel %vm820_vm1, %v847_v18, -inf }
 0x1a3   : > { %849 = vmax.xlane.f32.xlu1 %v848_v19 }
 0x1a6   : > { %v910_v20 = vpop.f32.mrf.mxu0  ;;  %v977_v21 = vpop.f32.mrf.mxu1 }
 0x1a7   : > { %v913_v22 = vmul.f32 0.35355338, %v910_v20  ;;  %v980_v23 = vmul.f32 0.35355338, %v977_v21  ;;  %v2817_v20 = vld [vmem:[%s3756_s3] ss:$0 sm:$0xff] }
 0x1a8   : > { %s3771_s3 = smov 96  }
 0x1a9   : > { %v981_v24 = vsel %vm846_vm2, -10000.0, %v980_v23  ;;  %v914_v25 = vsel %vm846_vm2, -10000.0, %v913_v22 }
 0x1aa   : > { %v982_v26 = vsel %vm820_vm1, %v981_v24, -inf  ;;  %v915_v27 = vsel %vm820_vm1, %v914_v25, -inf }
 0x1ab   : > { %983 = vmax.xlane.f32.xlu0 %v982_v26  ;;  %916 = vmax.xlane.f32.xlu2 %v915_v27  ;;  %v1208_v26 = vld [vmem:[%s3757_s12 + $0x18] sm:$0xff]  ;;  %v1207_v27 = vld [vmem:[%s3757_s12 + $0x10] sm:$0xff] }
 0x1ac   : > { %1228 = vmatpush.msrb.mxu0 %v1208_v26 }
 0x1ae   : > { %v1044_v28 = vpop.f32.mrf.mxu0  ;;  %1229 = vmatpush.msrb.mxu0 %v1207_v27 }
 0x1af   : > { %v1047_v29 = vmul.f32 0.35355338, %v1044_v28  ;;  %v1206_v28 = vld [vmem:[%s3757_s12 + $0x8] sm:$0xff] }
 0x1b0   : > { %1230 = vmatpush.msrb.mxu0 %v1206_v28 }
 0x1b1   : > { %v1048_v30 = vsel %vm846_vm2, -10000.0, %v1047_v29  ;;  %v1205_v29 = vld [vmem:[%s3757_s12] sm:$0xff] }
 0x1b2   : > { %v1049_v31 = vsel %vm820_vm1, %v1048_v30, -inf  ;;  %1231 = vmatpush.msrb.mxu0 %v1205_v29 }
 0x1b3   : > { %1050 = vmax.xlane.f32.xlu2 %v1049_v31 }
 0x1bf   : > { %859 = vrot.lane.b32.xlu0 %v3105_v7, %s3707_s4  ;;  %s3774_s4 = smov 16  }
 0x1c7   : > { %1060 = vrot.lane.b32.xlu0 %v3105_v7, %s3705_s27  ;;  %s3720_s27 = smov 8  }
 0x216   : > { %v850_v32 = vpop.xlane.xlu1 %849 }
 0x217   : > { %v851_v33 = vsub.f32 %v847_v18, %v850_v32 }
 0x219   : > { %v852_v34 = vmul.f32 1.442695, %v851_v33 }
 0x21b   : > { %2842 = vpow2.f32 %v852_v34 }
 0x21e   : > { %v917_v35 = vpop.xlane.xlu2 %916  ;;  %v984_v36 = vpop.xlane.xlu0 %983 }
 0x21f   : > { %v918_v37 = vsub.f32 %v914_v25, %v917_v35  ;;  %v985_v38 = vsub.f32 %v981_v24, %v984_v36  ;;  %v2942_v25 = vmov 32.0  }
 0x221   : > { %v2843_v39 = vpop.eup %2842  ;;  %v919_v40 = vmul.f32 1.442695, %v918_v37  ;;  %v986_v41 = vmul.f32 1.442695, %v985_v38 }
 0x222   : > { %v854_v42 = vsel %vm820_vm1, %v2843_v39, 0.0 }
 0x223   : > { %2844 = vpow2.f32 %v919_v40  ;;  %855 = vadd.xlane.f32.xlu1 %v854_v42  ;;  %v1176_v42 = vld [vmem:[%s3759_s10 + $0x10] sm:$0xff] }
 0x224   : > { %2846 = vpow2.f32 %v986_v41  ;;  %v1177_v41 = vld [vmem:[%s3759_s10 + $0x18] sm:$0xff] }
 0x226   : > { %v1051_v43 = vpop.xlane.xlu2 %1050 }
 0x227   : > { %v1052_v44 = vsub.f32 %v1048_v30, %v1051_v43  ;;  %v3205_v30 = vld [vmem:[%s769_s24] sm:$0xff]  ;;  %v1175_v43 = vld [vmem:[%s3759_s10 + $0x8] sm:$0xff]  ;;  %s3763_s24 = smov 104  }
 0x228   : > { %2698 = vmatmul.msk.f32.vlgmr.msrb.gmra.mxu0 %vm793_vm0, %v3205_v30 }
 0x229   : > { %v2845_v45 = vpop.eup %2844  ;;  %v1053_v46 = vmul.f32 1.442695, %v1052_v44  ;;  %v1174_v44 = vld [vmem:[%s3759_s10] sm:$0xff] }
 0x22a   : > { %v2847_v47 = vpop.eup %2846  ;;  %v921_v48 = vsel %vm820_vm1, %v2845_v45, 0.0 }
 0x22b   : > { %2848 = vpow2.f32 %v1053_v46  ;;  %922 = vadd.xlane.f32.xlu2 %v921_v48  ;;  %v988_v49 = vsel %vm820_vm1, %v2847_v47, 0.0 }
 0x22c   : > { %989 = vadd.xlane.f32.xlu1 %v988_v49 }
 0x231   : > { %v2849_v50 = vpop.eup %2848  ;;  %v860_v51 = vpop.permute.xlu0 %859 }
 0x232   : > { %880 = vmatpush.msra.mxu2 %v860_v51  ;;  %v1055_v52 = vsel %vm820_vm1, %v2849_v50, 0.0 }
 0x233   : > { %1056 = vadd.xlane.f32.xlu2 %v1055_v52 }
 0x239   : > { %v1061_v1 = vpop.permute.xlu0 %1060 }
 0x245   : > { %926 = vrot.lane.b32.xlu1 %v3105_v7, %s3706_s28  ;;  %s3724_s28 = smov 24  }
 0x24b   : > { %993 = vrot.lane.b32.xlu2 %v3105_v7, %s3704_s2  ;;  %s3722_s2 = smov 16  }
 0x296   : > { %v856_v53 = vpop.xlane.xlu1 %855 }
 0x297   : > { %2850 = vrcp.f32 %v856_v53 }
 0x29d   : > { %v2851_v54 = vpop.eup %2850 }
 0x29e   : > { %v923_v55 = vpop.xlane.xlu2 %922  ;;  %v858_v56 = vmul.f32 %v2851_v54, %v2843_v39 }
 0x29f   : > { %v990_v57 = vpop.xlane.xlu1 %989 }
 0x2a0   : > { %2686 = vmatmul.msk.f32.vlgmr.msra.gmra.mxu2 %vm820_vm1, %v858_v56  ;;  %2852 = vrcp.f32 %v990_v57 }
 0x2a1   : > { %2854 = vrcp.f32 %v923_v55 }
 0x2a5   : > { %v1233_v46 = vpop.f32.mrf.mxu0 }
 0x2a6   : > { %v1057_v58 = vpop.xlane.xlu2 %1056  ;;  %v2853_v59 = vpop.eup %2852 }
 0x2a7   : > { %v992_v61 = vmul.f32 %v2853_v59, %v2847_v47  ;;  %v2855_v62 = vpop.eup %2854  ;;  %2856 = vrcp.f32 %v1057_v58 }
 0x2a8   : > { %v925_v0 = vmul.f32 %v2855_v62, %v2845_v45  ;;  %2858 = vrcp.f32 %v2942_v25  ;;  %v2820_v45 = vld [vmem:[%s3760_s13] ss:$0 sm:$0xff]  ;;  %s3784_s13 = sld [smem:[#allocation11_spill]] }
 0x2a9   : > { %v3228_v47 = vadd.f32 %v2820_v45, %v1233_v46 }
 0x2ad   : > { %v2857_v2 = vpop.eup %2856 }
 0x2ae   : > { %v994_v60 = vpop.permute.xlu2 %993  ;;  %v1059_v3 = vmul.f32 %v2857_v2, %v2849_v50 }
 0x2af   : > { %1014 = vmatpush.msra.mxu3 %v994_v60  ;;  %v2819_v60 = vld [vmem:[%s3765_s9] ss:$0 sm:$0xff]  ;;  %s3781_s9 = smov 40  }
 0x2b0   : > { %2692 = vmatmul.msk.f32.vlgmr.msra.gmra.mxu3 %vm820_vm1, %v992_v61 }
 0x2b1   : > { %1197 = vmatpush.msrb.mxu3 %v1177_v41 }
 0x2b3   : > { %1198 = vmatpush.msrb.mxu3 %v1176_v42 }
 0x2b5   : > { %1199 = vmatpush.msrb.mxu3 %v1175_v43 }
 0x2b7   : > { %v927_v63 = vpop.permute.xlu1 %926  ;;  %1200 = vmatpush.msrb.mxu3 %v1174_v44 }
 0x2b8   : > { %947 = vmatpush.msrb.mxu2 %v927_v63 }
 0x2b9   : > { %2689 = vmatmul.msk.f32.vlgmr.msrb.gmra.mxu2 %vm820_vm1, %v925_v0 }
 0x2ba   : > { %1081 = vmatpush.msra.mxu2 %v1061_v1  ;;  %v2821_v1 = vld [vmem:[%s3766_s11] ss:$0 sm:$0xff]  ;;  %s3782_s11 = smov 48  }
 0x2bc   : > { %2699 = vmatpush.xpose.msk.msrb.mxu2 %vm820_vm1, %v3228_v47 }
 0x2c1   : > { %2695 = vmatmul.msk.f32.vlgmr.msra.gmra.mxu2 %vm820_vm1, %v1059_v3 }
 0x323   : > { %v882_v6 = vpop.f32.mrf.mxu2 }
 0x333   : > { %v1016_v5 = vpop.f32.mrf.mxu3 }
 0x334   : > { %1091 = vrot.lane.b32.xlu1 %v1016_v5, %s3722_s2  ;;  %s3776_s2 = smov 24  }
 0x33c   : > { %v949_v7 = vpop.f32.mrf.mxu2 }
 0x33d   : > { %1087 = vrot.lane.b32.xlu0 %v949_v7, %s3720_s27  ;;  %v784_v7 = vld [vmem:[%s776_s30] sm:$0x1]  ;;  %s3775_s27 = smov 8  }
 0x33e   : > { %vm1263_vm9 = vcmp.eq.f32.partialorder %v784_v7, 0.0 }
 0x33f   : > { %v1264_v11 = vsel %vm1263_vm9, 1, %v2943_v10  ;;  %v1524_v10 = vld [vmem:[%s3777_s14 + $0x18] sm:$0xff] }
 0x340   : > { %v1265_v12 = vperm.slane %v1264_v11, 0  ;;  %v1523_v11 = vld [vmem:[%s3777_s14 + $0x10] sm:$0xff] }
 0x342   : > { %vm3266_vm10 = vcmp.eq.s32.totalorder %v1265_v12, 1  ;;  %v1522_v12 = vld [vmem:[%s3777_s14 + $0x8] sm:$0xff] }
 0x344   : > { %v1083_v8 = vpop.f32.mrf.mxu2 }
 0x345   : > { %1095 = vrot.lane.b32.xlu0 %v1083_v8, %s3724_s28  ;;  %s3764_s28 = sld [smem:[#allocation12_spill]] }
 0x34b   : > { %v2818_v57 = vld [vmem:[%s3764_s28] ss:$0 sm:$0xff]  ;;  %s3787_s28 = sld [smem:[#allocation12_spill]] }
 0x34d   : > { %1307 = vrot.lane.b32.xlu0 %v3228_v47, %s3761_s0 }
 0x355   : > { %1374 = vrot.lane.b32.xlu0 %v3228_v47, %s3762_s7 }
 0x35d   : > { %1441 = vrot.lane.b32.xlu0 %v3228_v47, %s3763_s24 }
 0x3a6   : > { %v1092_v16 = vpop.permute.xlu1 %1091 }
 0x3af   : > { %v1088_v13 = vpop.permute.xlu0 %1087 }
 0x3b0   : > { %v1098_v14 = vsel %vm820_vm1, %v882_v6, %v1088_v13 }
 0x3b1   : > { %v1100_v17 = vsel %vm1099_vm3, %v1098_v14, %v1092_v16 }
 0x3b7   : > { %v1096_v18 = vpop.permute.xlu0 %1095 }
 0x3b8   : > { %v1102_v19 = vsel %vm1101_vm4, %v1100_v17, %v1096_v18 }
 0x3b9   : > { %2696 = vmatmul.msk.f32.vlgmr.msra.gmra.mxu1 %vm793_vm0, %v1102_v19 }
 0x3bf   : > { %v1308_v63 = vpop.permute.xlu0 %1307 }
 0x3c0   : > { %2702 = vmatpush.xpose.msk.msra.mxu3 %vm820_vm1, %v1308_v63 }
 0x3c7   : > { %v1375_v0 = vpop.permute.xlu0 %1374 }
 0x3c8   : > { %2705 = vmatpush.xpose.msk.msra.mxu2 %vm820_vm1, %v1375_v0 }
 0x3cf   : > { %v1442_v5 = vpop.permute.xlu0 %1441 }
 0x436   : > { %v1131_v21 = vpop.f32.mrf.mxu1 }
 0x437   : > { %v1132_v22 = vadd.f32 %v2817_v20, %v1131_v21 }
 0x439   : > { %v1134_v23 = vadd.f32 %v1132_v22, %v3098_v4  ;;  %v2859_v4 = vpop.eup %2858 }
 0x43a   : > { %v1141_v31 = vmul.f32 32.0, %v2859_v4  ;;  %vm1145_vm5 = vweird.f32 %v2859_v4 }
 0x43b   : > { %v1137_v24 = vsel %vm793_vm0, %v1134_v23, 0.0 }
 0x43c   : > { %1138 = vadd.xlane.f32.xlu2 %v1137_v24  ;;  %v1142_v32 = vsub.f32 1.0, %v1141_v31 }
 0x43e   : > { %v1143_v33 = vmul.f32 %v2859_v4, %v1142_v32 }
 0x440   : > { %v1144_v34 = vadd.f32 %v2859_v4, %v1143_v33 }
 0x442   : > { %v3209_v35 = vsel %vm1145_vm5, %v2859_v4, %v1144_v34 }
 0x4af   : > { %v1139_v36 = vpop.xlane.xlu2 %1138 }
 0x4b0   : > { %v1147_v37 = vmul.f32 %v3209_v35, %v1139_v36 }
 0x4b2   : > { %v1148_v38 = vsub.f32 %v1134_v23, %v1147_v37 }
 0x4b4   : > { %v1149_v39 = vmul.f32 %v1148_v38, %v1148_v38 }
 0x4b6   : > { %v1150_v40 = vsel %vm793_vm0, %v1149_v39, 0.0 }
 0x4b7   : > { %1151 = vadd.xlane.f32.xlu1 %v1150_v40 }
 0x52a   : > { %v1152_v48 = vpop.xlane.xlu1 %1151 }
 0x52b   : > { %v1153_v49 = vmul.f32 %v1152_v48, %v3209_v35 }
 0x52d   : > { %v1154_v50 = vadd.f32 1e-12, %v1153_v49 }
 0x52f   : > { %2860 = vrsqrt.f32 %v1154_v50  ;;  %vm1161_vm7 = vweird.f32 %v1154_v50 }
 0x535   : > { %v2861_v51 = vpop.eup %2860 }
 0x536   : > { %v1156_v52 = vmul.f32 %v2861_v51, %v1154_v50  ;;  %vm1162_vm6 = vweird.f32 %v2861_v51 }
 0x537   : > { %vm1163_vm8 = vmor %vm1161_vm7, %vm1162_vm6 }
 0x538   : > { %v1157_v53 = vmul.f32 %v2861_v51, %v1156_v52 }
 0x53a   : > { %v1158_v54 = vmul.f32 0.5, %v1157_v53 }
 0x53c   : > { %v1159_v55 = vsub.f32 1.5, %v1158_v54 }
 0x53e   : > { %v1160_v56 = vmul.f32 %v2861_v51, %v1159_v55 }
 0x540   : > { %v1164_v58 = vsel %vm1163_vm8, %v2861_v51, %v1160_v56 }
 0x541   : > { %v1165_v59 = vmul.f32 %v1164_v58, %v1148_v38 }
 0x543   : > { %v1169_v61 = vmul.f32 %v2818_v57, %v1165_v59 }
 0x545   : > { %v3245_v62 = vadd.f32 %v2819_v60, %v1169_v61 }
 0x547   : > { %2697 = vmatmul.msk.f32.vlgmr.msrb.gmra.mxu3 %vm793_vm0, %v3245_v62 }
 0x548   : > { %2708 = vmatpush.xpose.msk.msrb.mxu3 %vm820_vm1, %v1442_v5 }
 0x5ca   : > { %v1202_v2 = vpop.f32.mrf.mxu3 }
 0x5cb   : > { %v1203_v3 = vadd.f32 %v2821_v1, %v1202_v2 }
 0x5cd   : > { %1439 = vrot.lane.b32.xlu2 %v1203_v3, %s3763_s24  ;;  %1305 = vrot.lane.b32.xlu0 %v1203_v3, %s3761_s0 }
 0x5ce   : > { %2700 = vmatmul.msk.f32.vlgmr.msrb.gmra.mxu2 %vm820_vm1, %v1203_v3 }
 0x5cf   : > { %1544 = vmatpush.msrb.mxu2 %v1524_v10 }
 0x5d1   : > { %1545 = vmatpush.msrb.mxu2 %v1523_v11  ;;  %v2717_v11 = vld [vmem:[%s3750_s6 + $0x38] sm:$0xff] }
 0x5d3   : > { %1546 = vmatpush.msrb.mxu2 %v1522_v12  ;;  %v2716_v12 = vld [vmem:[%s3750_s6 + $0x30] sm:$0xff] }
 0x5d5   : > { %1372 = vrot.lane.b32.xlu0 %v1203_v3, %s3762_s7 }
 0x627   : > { %v1440_v8 = vpop.permute.xlu2 %1439 }
 0x63f   : > { %v1306_v6 = vpop.permute.xlu0 %1305 }
 0x640   : > { %2703 = vmatmul.msk.f32.vlgmr.msra.gmra.mxu3 %vm820_vm1, %v1306_v6 }
 0x647   : > { %v1373_v9 = vpop.permute.xlu0 %1372 }
 0x648   : > { %2706 = vmatmul.msk.f32.vlgmr.msra.gmra.mxu2 %vm820_vm1, %v1373_v9  ;;  %2709 = vmatmul.msk.f32.vlgmr.msrb.gmra.mxu3 %vm820_vm1, %v1440_v8 }
 0x651   : > { %v1259_v14 = vpop.f32.mrf.mxu2 }
 0x652   : > { %v1262_v16 = vmul.f32 0.35355338, %v1259_v14  ;;  %v1521_v14 = vld [vmem:[%s3777_s14] sm:$0xff]  ;;  %s3779_s14 = smov 64  }
 0x653   : > { %1547 = vmatpush.msrb.mxu2 %v1521_v14  ;;  %v2715_v14 = vld [vmem:[%s3750_s6 + $0x28] sm:$0xff] }
 0x654   : > { %v1267_v17 = vsel %vm3266_vm10, -10000.0, %v1262_v16 }
 0x655   : > { %v1268_v18 = vsel %vm820_vm1, %v1267_v17, -inf }
 0x656   : > { %1269 = vmax.xlane.f32.xlu1 %v1268_v18 }
 0x6c3   : > { %v1330_v19 = vpop.f32.mrf.mxu3 }
 0x6c4   : > { %v1333_v20 = vmul.f32 0.35355338, %v1330_v19 }
 0x6c6   : > { %v1334_v21 = vsel %vm3266_vm10, -10000.0, %v1333_v20 }
 0x6c7   : > { %v1335_v22 = vsel %vm820_vm1, %v1334_v21, -inf }
 0x6c8   : > { %1336 = vmax.xlane.f32.xlu0 %v1335_v22  ;;  %v2822_v22 = vld [vmem:[%s3778_s15] ss:$0 sm:$0xff]  ;;  %s3780_s15 = smov 56  }
 0x6c9   : > { %v1270_v23 = vpop.xlane.xlu1 %1269 }
 0x6ca   : > { %v1271_v24 = vsub.f32 %v1267_v17, %v1270_v23 }
 0x6cb   : > { %v1397_v25 = vpop.f32.mrf.mxu2  ;;  %v1464_v28 = vpop.f32.mrf.mxu3 }
 0x6cc   : > { %v1272_v26 = vmul.f32 1.442695, %v1271_v24  ;;  %v1400_v27 = vmul.f32 0.35355338, %v1397_v25  ;;  %v1467_v31 = vmul.f32 0.35355338, %v1464_v28 }
 0x6ce   : > { %2862 = vpow2.f32 %v1272_v26  ;;  %v1401_v4 = vsel %vm3266_vm10, -10000.0, %v1400_v27  ;;  %v1468_v33 = vsel %vm3266_vm10, -10000.0, %v1467_v31 }
 0x6cf   : > { %v1402_v29 = vsel %vm820_vm1, %v1401_v4, -inf  ;;  %v1469_v36 = vsel %vm820_vm1, %v1468_v33, -inf }
 0x6d0   : > { %1403 = vmax.xlane.f32.xlu1 %v1402_v29 }
 0x6d4   : > { %v2863_v32 = vpop.eup %2862 }
 0x6d5   : > { %v1274_v34 = vsel %vm820_vm1, %v2863_v32, 0.0 }
 0x6d6   : > { %1275 = vadd.xlane.f32.xlu2 %v1274_v34  ;;  %v1585_v34 = vld [vmem:[%s3690_s18] sm:$0xff] }
 0x6d8   : > { %1470 = vmax.xlane.f32.xlu1 %v1469_v36  ;;  %v1624_v36 = vld [vmem:[%s3692_s20 + $0x38] sm:$0xff] }
 0x6d9   : > { %1641 = vmatpush.msra.mxu3 %v1624_v36 }
 0x6ee   : > { %1413 = vrot.lane.b32.xlu2 %v3228_v47, %s3770_s26 }
 0x6f1   : > { %1279 = vrot.lane.b32.xlu1 %v3228_v47, %s3771_s3 }
 0x73b   : > { %v1337_v37 = vpop.xlane.xlu0 %1336 }
 0x73c   : > { %v1338_v38 = vsub.f32 %v1334_v21, %v1337_v37  ;;  %v1623_v37 = vld [vmem:[%s3692_s20 + $0x30] sm:$0xff] }
 0x73d   : > { %1642 = vmatpush.msra.mxu3 %v1623_v37 }
 0x73e   : > { %v1339_v39 = vmul.f32 1.442695, %v1338_v38  ;;  %v1622_v38 = vld [vmem:[%s3692_s20 + $0x28] sm:$0xff] }
 0x73f   : > { %1643 = vmatpush.msra.mxu3 %v1622_v38 }
 0x740   : > { %2864 = vpow2.f32 %v1339_v39 }
 0x743   : > { %v1404_v40 = vpop.xlane.xlu1 %1403 }
 0x744   : > { %v1405_v41 = vsub.f32 %v1401_v4, %v1404_v40 }
 0x746   : > { %v2865_v42 = vpop.eup %2864  ;;  %v1406_v43 = vmul.f32 1.442695, %v1405_v41  ;;  %v1621_v41 = vld [vmem:[%s3692_s20 + $0x20] sm:$0xff] }
 0x747   : > { %v1341_v44 = vsel %vm820_vm1, %v2865_v42, 0.0  ;;  %1644 = vmatpush.msra.mxu3 %v1621_v41 }
 0x748   : > { %2866 = vpow2.f32 %v1406_v43  ;;  %1342 = vadd.xlane.f32.xlu1 %v1341_v44  ;;  %v1620_v43 = vld [vmem:[%s3692_s20 + $0x18] sm:$0xff] }
 0x749   : > { %v1276_v52 = vpop.xlane.xlu2 %1275  ;;  %1645 = vmatpush.msra.mxu3 %v1620_v43 }
 0x74b   : > { %v1471_v45 = vpop.xlane.xlu1 %1470 }
 0x74c   : > { %v1472_v46 = vsub.f32 %v1468_v33, %v1471_v45  ;;  %v1586_v33 = vld [vmem:[%s3690_s18 + $0x8] sm:$0xff] }
 0x74e   : > { %v2867_v48 = vpop.eup %2866  ;;  %v1473_v49 = vmul.f32 1.442695, %v1472_v46 }
 0x74f   : > { %v1408_v50 = vsel %vm820_vm1, %v2867_v48, 0.0 }
 0x750   : > { %2868 = vpow2.f32 %v1473_v49  ;;  %1409 = vadd.xlane.f32.xlu1 %v1408_v50 }
 0x751   : > { %2870 = vrcp.f32 %v1276_v52  ;;  %v1414_v57 = vpop.permute.xlu2 %1413 }
 0x756   : > { %v2869_v51 = vpop.eup %2868 }
 0x757   : > { %v1475_v53 = vsel %vm820_vm1, %v2869_v51, 0.0  ;;  %v2871_v54 = vpop.eup %2870 }
 0x758   : > { %1476 = vadd.xlane.f32.xlu0 %v1475_v53  ;;  %v1278_v55 = vmul.f32 %v2871_v54, %v2863_v32  ;;  %v1588_v32 = vld [vmem:[%s3690_s18 + $0x18] sm:$0xff]  ;;  %v2824_v54 = vld [vmem:[%s3689_s17] ss:$0 sm:$0xff] }
 0x763   : > { %v1280_v56 = vpop.permute.xlu1 %1279 }
 0x764   : > { %1300 = vmatpush.msrb.mxu1 %v1280_v56 }
 0x765   : > { %2701 = vmatmul.msk.f32.vlgmr.msrb.gmra.mxu1 %vm820_vm1, %v1278_v55 }
 0x766   : > { %1434 = vmatpush.msra.mxu1 %v1414_v57  ;;  %v1619_v57 = vld [vmem:[%s3692_s20 + $0x10] sm:$0xff] }
 0x767   : > { %1646 = vmatpush.msra.mxu3 %v1619_v57 }
 0x768   : > { %1608 = vmatpush.msrb.mxu1 %v1588_v32  ;;  %v2829_v32 = vld [vmem:[%s3753_s29 + $0x1] ss:$0 sm:$0xff] }
 0x769   : > { %1480 = vrot.lane.b32.xlu1 %v3228_v47, %s3772_s8 }
 0x76c   : > { %1346 = vrot.lane.b32.xlu0 %v3228_v47, %s3773_s1 }
 0x7bb   : > { %v1343_v58 = vpop.xlane.xlu1 %1342 }
 0x7c3   : > { %v1410_v59 = vpop.xlane.xlu1 %1409 }
 0x7c4   : > { %2872 = vrcp.f32 %v1410_v59  ;;  %v1617_v59 = vld [vmem:[%s3692_s20] sm:$0xff] }
 0x7c5   : > { %2874 = vrcp.f32 %v1343_v58  ;;  %v1618_v58 = vld [vmem:[%s3692_s20 + $0x8] sm:$0xff] }
 0x7c6   : > { %1647 = vmatpush.msra.mxu3 %v1618_v58 }
 0x7c8   : > { %1648 = vmatpush.msra.mxu3 %v1617_v59 }
 0x7ca   : > { %v2873_v60 = vpop.eup %2872 }
 0x7cb   : > { %v1412_v61 = vmul.f32 %v2873_v60, %v2867_v48  ;;  %v1477_v63 = vpop.xlane.xlu0 %1476  ;;  %v2875_v0 = vpop.eup %2874  ;;  %v2825_v60 = vld [vmem:[%s3691_s19] ss:$0 sm:$0xff] }
 0x7cc   : > { %2876 = vrcp.f32 %v1477_v63  ;;  %v1345_v1 = vmul.f32 %v2875_v0, %v2865_v42 }
 0x7cd   : > { %2707 = vmatmul.msk.f32.vlgmr.msra.gmra.mxu1 %vm820_vm1, %v1412_v61 }
 0x7d2   : > { %v2877_v5 = vpop.eup %2876 }
 0x7d3   : > { %v1479_v47 = vmul.f32 %v2877_v5, %v2869_v51  ;;  %v2823_v51 = vld [vmem:[%s3688_s16] ss:$0 sm:$0xff] }
 0x7db   : > { %v1481_v3 = vpop.permute.xlu1 %1480 }
 0x7de   : > { %v1347_v2 = vpop.permute.xlu0 %1346 }
 0x7df   : > { %1367 = vmatpush.msra.mxu0 %v1347_v2 }
 0x7e0   : > { %2704 = vmatmul.msk.f32.vlgmr.msra.gmra.mxu0 %vm820_vm1, %v1345_v1  ;;  %v2826_v1 = vld [vmem:[%s3693_s21] ss:$0 sm:$0xff] }
 0x7e1   : > { %1501 = vmatpush.msrb.mxu0 %v1481_v3 }
 0x7e2   : > { %v1302_v6 = vpop.f32.mrf.mxu1 }
 0x7e3   : > { %1711 = vmatpush.msra.mxu0 %v2717_v11 }
 0x7e5   : > { %1712 = vmatpush.msra.mxu0 %v2716_v12 }
 0x7e7   : > { %1713 = vmatpush.msra.mxu0 %v2715_v14 }
 0x7e8   : > { %2710 = vmatmul.msk.f32.vlgmr.msrb.gmra.mxu0 %vm820_vm1, %v1479_v47 }
 0x84a   : > { %v1436_v7 = vpop.f32.mrf.mxu1 }
 0x84b   : > { %1511 = vrot.lane.b32.xlu1 %v1436_v7, %s3774_s4 }
 0x85d   : > { %v1369_v8 = vpop.f32.mrf.mxu0 }
 0x85e   : > { %1507 = vrot.lane.b32.xlu0 %v1369_v8, %s3775_s27 }
 0x865   : > { %v1503_v9 = vpop.f32.mrf.mxu0 }
 0x866   : > { %1515 = vrot.lane.b32.xlu0 %v1503_v9, %s3776_s2 }
 0x8bd   : > { %v1512_v18 = vpop.permute.xlu1 %1511 }
 0x8d0   : > { %v1508_v16 = vpop.permute.xlu0 %1507 }
 0x8d1   : > { %v1518_v17 = vsel %vm820_vm1, %v1302_v6, %v1508_v16  ;;  %v2714_v16 = vld [vmem:[%s3750_s6 + $0x20] sm:$0xff] }
 0x8d2   : > { %v1519_v19 = vsel %vm1099_vm3, %v1518_v17, %v1512_v18  ;;  %1714 = vmatpush.msra.mxu0 %v2714_v16 }
 0x8d8   : > { %v1516_v20 = vpop.permute.xlu0 %1515 }
 0x8d9   : > { %v1520_v21 = vsel %vm1101_vm4, %v1519_v19, %v1516_v20 }
 0x8da   : > { %2711 = vmatmul.msk.f32.vlgmr.msrb.gmra.mxu2 %vm793_vm0, %v1520_v21 }
 0x95d   : > { %v1549_v23 = vpop.f32.mrf.mxu2 }
 0x95e   : > { %v1550_v24 = vadd.f32 %v2822_v22, %v1549_v23 }
 0x960   : > { %v1552_v25 = vadd.f32 %v1550_v24, %v3245_v62  ;;  %v1587_v62 = vld [vmem:[%s3690_s18 + $0x10] sm:$0xff] }
 0x961   : > { %1609 = vmatpush.msrb.mxu1 %v1587_v62 }
 0x962   : > { %v1555_v26 = vsel %vm793_vm0, %v1552_v25, 0.0 }
 0x963   : > { %1556 = vadd.xlane.f32.xlu1 %v1555_v26  ;;  %1610 = vmatpush.msrb.mxu1 %v1586_v33  ;;  %v2827_v26 = vld [vmem:[%s3694_s22] ss:$0 sm:$0xff] }
 0x965   : > { %1611 = vmatpush.msrb.mxu1 %v1585_v34 }
 0x9d6   : > { %v1557_v27 = vpop.xlane.xlu1 %1556 }
 0x9d7   : > { %v1558_v28 = vmul.f32 %v1557_v27, %v3209_v35 }
 0x9d9   : > { %v1559_v4 = vsub.f32 %v1552_v25, %v1558_v28 }
 0x9db   : > { %v1560_v29 = vmul.f32 %v1559_v4, %v1559_v4 }
 0x9dd   : > { %v1561_v31 = vsel %vm793_vm0, %v1560_v29, 0.0 }
 0x9de   : > { %1562 = vadd.xlane.f32.xlu2 %v1561_v31 }
 0xa51   : > { %v1563_v39 = vpop.xlane.xlu2 %1562 }
 0xa52   : > { %v1564_v40 = vmul.f32 %v1563_v39, %v3209_v35 }
 0xa54   : > { %v1565_v42 = vadd.f32 1e-12, %v1564_v40 }
 0xa56   : > { %2878 = vrsqrt.f32 %v1565_v42  ;;  %vm1572_vm12 = vweird.f32 %v1565_v42 }
 0xa5c   : > { %v2879_v44 = vpop.eup %2878 }
 0xa5d   : > { %v1567_v45 = vmul.f32 %v2879_v44, %v1565_v42  ;;  %vm1573_vm11 = vweird.f32 %v2879_v44 }
 0xa5e   : > { %vm1574_vm13 = vmor %vm1572_vm12, %vm1573_vm11 }
 0xa5f   : > { %v1568_v46 = vmul.f32 %v2879_v44, %v1567_v45 }
 0xa61   : > { %v1569_v48 = vmul.f32 0.5, %v1568_v46 }
 0xa63   : > { %v1570_v49 = vsub.f32 1.5, %v1569_v48 }
 0xa65   : > { %v1571_v50 = vmul.f32 %v2879_v44, %v1570_v49 }
 0xa67   : > { %v1575_v52 = vsel %vm1574_vm13, %v2879_v44, %v1571_v50 }
 0xa68   : > { %v1576_v53 = vmul.f32 %v1575_v52, %v1559_v4  ;;  %v2828_v4 = vld [vmem:[%s3695_s23] ss:$0 sm:$0xff] }
 0xa6a   : > { %v1580_v55 = vmul.f32 %v2823_v51, %v1576_v53 }
 0xa6c   : > { %v1584_v56 = vadd.f32 %v2824_v54, %v1580_v55 }
 0xa6e   : > { %2712 = vmatmul.msk.f32.vlgmr.msrb.gmra.mxu1 %vm793_vm0, %v1584_v56 }
 0xaeb   : > { %v1613_v61 = vpop.f32.mrf.mxu1 }
 0xaec   : > { %v1614_v63 = vadd.f32 %v2825_v60, %v1613_v61 }
 0xaee   : > { %v1616_v0 = vmax.f32 %v1614_v63, 0.0 }
 0xaf0   : > { %2713 = vmatmul.msk.f32.vlgmr.msra.gmra.mxu3 %vm1629_vm14, %v1616_v0 }
 0xb73   : > { %v1650_v2 = vpop.f32.mrf.mxu3 }
 0xb74   : > { %v1651_v3 = vadd.f32 %v2826_v1, %v1650_v2 }
 0xb76   : > { %v1653_v5 = vadd.f32 %v1651_v3, %v1584_v56 }
 0xb78   : > { %v1656_v47 = vsel %vm793_vm0, %v1653_v5, 0.0 }
 0xb79   : > { %1657 = vadd.xlane.f32.xlu0 %v1656_v47 }
 0xbec   : > { %v1658_v6 = vpop.xlane.xlu0 %1657 }
 0xbed   : > { %v1659_v7 = vmul.f32 %v1658_v6, %v3209_v35 }
 0xbef   : > { %v1660_v8 = vsub.f32 %v1653_v5, %v1659_v7 }
 0xbf1   : > { %v1661_v9 = vmul.f32 %v1660_v8, %v1660_v8 }
 0xbf3   : > { %v1662_v10 = vsel %vm793_vm0, %v1661_v9, 0.0 }
 0xbf4   : > { %1663 = vadd.xlane.f32.xlu1 %v1662_v10 }
 0xc67   : > { %v1664_v17 = vpop.xlane.xlu1 %1663 }
 0xc68   : > { %v1665_v18 = vmul.f32 %v1664_v17, %v3209_v35 }
 0xc6a   : > { %v1666_v19 = vadd.f32 1e-12, %v1665_v18 }
 0xc6c   : > { %2880 = vrsqrt.f32 %v1666_v19  ;;  %vm1673_vm5 = vweird.f32 %v1666_v19 }
 0xc72   : > { %v2881_v20 = vpop.eup %2880 }
 0xc73   : > { %v1668_v21 = vmul.f32 %v2881_v20, %v1666_v19  ;;  %vm1674_vm15 = vweird.f32 %v2881_v20 }
 0xc74   : > { %vm1675_vm6 = vmor %vm1673_vm5, %vm1674_vm15 }
 0xc75   : > { %v1669_v22 = vmul.f32 %v2881_v20, %v1668_v21 }
 0xc77   : > { %v1670_v23 = vmul.f32 0.5, %v1669_v22 }
 0xc79   : > { %v1671_v24 = vsub.f32 1.5, %v1670_v23 }
 0xc7b   : > { %v1672_v25 = vmul.f32 %v2881_v20, %v1671_v24 }
 0xc7d   : > { %v1676_v27 = vsel %vm1675_vm6, %v2881_v20, %v1672_v25 }
 0xc7e   : > { %v1677_v28 = vmul.f32 %v1676_v27, %v1660_v8 }
 0xc80   : > { %v1681_v29 = vmul.f32 %v2827_v26, %v1677_v28 }
 0xc82   : > { %v3397_v31 = vadd.f32 %v2828_v4, %v1681_v29 }
 0xc84   : > { %2719 = vmatmul.msk.f32.vlgmr.msra.gmra.mxu0 %vm793_vm0, %v3397_v31 }
 0xd01   : > { %v1716_v62 = vpop.f32.mrf.mxu0 }
 0xd02   : > { %v3404_v33 = vadd.f32 %v2829_v32, %v1716_v62 }
 0xd04   : > { %1759 = vrot.lane.b32.xlu1 %v3404_v33, %s3779_s14  ;;  %1720 = vrot.lane.b32.xlu2 %v3404_v33, %s3771_s3  ;;  %s3788_s14 = sld [smem:[#allocation13_spill]] }
 0xd0c   : > { %1785 = vrot.lane.b32.xlu2 %v3404_v33, %s3761_s0 }
 0xd14   : > { %1921 = vrot.lane.b32.xlu2 %v3404_v33, %s3772_s8 }
 0xd5e   : > { %v1721_v34 = vpop.permute.xlu2 %1720 }
 0xd5f   : > { %2720 = vmatpush.xpose.msk.msra.mxu2 %vm820_vm1, %v1721_v34 }
 0xd62   : > { %2721 = vmatmul.msk.f32.vlgmr.msra.gmra.mxu2 %vm820_vm1, %v3404_v33 }
 0xd66   : > { %v1786_v44 = vpop.permute.xlu2 %1785 }
 0xd6e   : > { %v1922_v49 = vpop.permute.xlu2 %1921 }
 0xd76   : > { %v1760_v36 = vpop.permute.xlu1 %1759 }
 0xd77   : > { %1780 = vmatpush.msra.mxu1 %v1760_v36 }
 0xde5   : > { %v1743_v37 = vpop.f32.mrf.mxu2 }
 0xde6   : > { %v1746_v38 = vmul.f32 0.35355338, %v1743_v37 }
 0xde8   : > { %v1747_v39 = vsel %vm846_vm2, -10000.0, %v1746_v38  ;;  %v2735_v38 = vld [vmem:[%s3783_s25 + $0x38] sm:$0xff] }
 0xde9   : > { %v1748_v40 = vsel %vm820_vm1, %v1747_v39, -inf }
 0xdea   : > { %1749 = vmax.xlane.f32.xlu0 %v1748_v40 }
 0xdfe   : > { %1787 = vrot.lane.b32.xlu0 %v3404_v33, %s3773_s1 }
 0xe06   : > { %1854 = vrot.lane.b32.xlu0 %v3404_v33, %s3770_s26 }
 0xe0e   : > { %1919 = vrot.lane.b32.xlu0 %v3404_v33, %s3763_s24 }
 0xe5d   : > { %v1750_v41 = vpop.xlane.xlu0 %1749 }
 0xe5e   : > { %v1751_v42 = vsub.f32 %v1747_v39, %v1750_v41  ;;  %v2733_v39 = vld [vmem:[%s3783_s25 + $0x28] sm:$0xff]  ;;  %v2732_v41 = vld [vmem:[%s3783_s25 + $0x20] sm:$0xff] }
 0xe60   : > { %v1752_v43 = vmul.f32 1.442695, %v1751_v42 }
 0xe62   : > { %2882 = vpow2.f32 %v1752_v43 }
 0xe68   : > { %v2883_v45 = vpop.eup %2882 }
 0xe69   : > { %v1754_v46 = vsel %vm820_vm1, %v2883_v45, 0.0 }
 0xe6a   : > { %1755 = vadd.xlane.f32.xlu1 %v1754_v46 }
 0xe70   : > { %v1788_v48 = vpop.permute.xlu0 %1787 }
 0xe71   : > { %2723 = vmatpush.xpose.msk.msrb.mxu0 %vm820_vm1, %v1788_v48 }
 0xe74   : > { %2724 = vmatmul.msk.f32.vlgmr.msrb.gmra.mxu0 %vm820_vm1, %v1786_v44 }
 0xe75   : > { %2729 = vmatpush.xpose.msk.msra.mxu0 %vm820_vm1, %v1922_v49  ;;  %v2830_v49 = vld [vmem:[%s3784_s13 + $0x1] ss:$0 sm:$0xff]  ;;  %s3786_s13 = sld [smem:[#allocation17_spill]] }
 0xe78   : > { %v1855_v50 = vpop.permute.xlu0 %1854 }
 0xe79   : > { %2726 = vmatpush.xpose.msk.msrb.mxu1 %vm820_vm1, %v1855_v50 }
 0xe80   : > { %v1920_v51 = vpop.permute.xlu0 %1919 }
 0xe81   : > { %2730 = vmatmul.msk.f32.vlgmr.msra.gmra.mxu0 %vm820_vm1, %v1920_v51 }
 0xe83   : > { %1852 = vrot.lane.b32.xlu1 %v3404_v33, %s3762_s7 }
 0xedd   : > { %v1756_v52 = vpop.xlane.xlu1 %1755 }
 0xede   : > { %2884 = vrcp.f32 %v1756_v52 }
 0xee4   : > { %v2885_v53 = vpop.eup %2884 }
 0xee5   : > { %v1758_v54 = vmul.f32 %v2885_v53, %v2883_v45 }
 0xee7   : > { %2722 = vmatmul.msk.f32.vlgmr.msra.gmra.mxu1 %vm820_vm1, %v1758_v54  ;;  %v2749_v54 = vld [vmem:[%s3757_s12 + $0x38] sm:$0xff] }
 0xee8   : > { %2026 = vmatpush.msra.mxu1 %v2735_v38  ;;  %2124 = vmatpush.msrb.mxu0 %v2749_v54 }
 0xef1   : > { %v1810_v55 = vpop.f32.mrf.mxu0 }
 0xef2   : > { %v1813_v56 = vmul.f32 0.35355338, %v1810_v55  ;;  %v2748_v55 = vld [vmem:[%s3757_s12 + $0x30] sm:$0xff] }
 0xef3   : > { %2125 = vmatpush.msrb.mxu0 %v2748_v55 }
 0xef4   : > { %v1814_v57 = vsel %vm846_vm2, -10000.0, %v1813_v56  ;;  %v2747_v56 = vld [vmem:[%s3757_s12 + $0x28] sm:$0xff] }
 0xef5   : > { %v1853_v58 = vpop.permute.xlu1 %1852  ;;  %v1815_v59 = vsel %vm820_vm1, %v1814_v57, -inf  ;;  %2126 = vmatpush.msrb.mxu0 %v2747_v56 }
 0xef6   : > { %2727 = vmatmul.msk.f32.vlgmr.msrb.gmra.mxu1 %vm820_vm1, %v1853_v58  ;;  %1816 = vmax.xlane.f32.xlu2 %v1815_v59 }
 0xefe   : > { %v1944_v60 = vpop.f32.mrf.mxu0 }
 0xeff   : > { %v1947_v61 = vmul.f32 0.35355338, %v1944_v60 }
 0xf01   : > { %v1948_v63 = vsel %vm846_vm2, -10000.0, %v1947_v61 }
 0xf02   : > { %v1949_v0 = vsel %vm820_vm1, %v1948_v63, -inf }
 0xf03   : > { %1950 = vmax.xlane.f32.xlu0 %v1949_v0  ;;  %v2742_v0 = vld [vmem:[%s3785_s5 + $0x30] sm:$0xff] }
 0xf64   : > { %v3442_v3 = vpop.f32.mrf.mxu1 }
 0xf69   : > { %v1817_v1 = vpop.xlane.xlu2 %1816 }
 0xf6a   : > { %v1818_v2 = vsub.f32 %v1814_v57, %v1817_v1  ;;  %v2740_v1 = vld [vmem:[%s3785_s5 + $0x20] sm:$0xff] }
 0xf6c   : > { %v1819_v5 = vmul.f32 1.442695, %v1818_v2  ;;  %v2833_v2 = vld [vmem:[%s3786_s13 + $0x1] ss:$0 sm:$0xff]  ;;  %s3791_s13 = sld [smem:[#allocation19_spill]] }
 0xf6e   : > { %2886 = vpow2.f32 %v1819_v5 }
 0xf73   : > { %v1877_v47 = vpop.f32.mrf.mxu1 }
 0xf74   : > { %v2887_v6 = vpop.eup %2886  ;;  %v1880_v7 = vmul.f32 0.35355338, %v1877_v47 }
 0xf75   : > { %v1821_v8 = vsel %vm820_vm1, %v2887_v6, 0.0 }
 0xf76   : > { %v1951_v9 = vpop.xlane.xlu0 %1950  ;;  %1822 = vadd.xlane.f32.xlu2 %v1821_v8  ;;  %v1881_v10 = vsel %vm846_vm2, -10000.0, %v1880_v7 }
 0xf77   : > { %v1952_v11 = vsub.f32 %v1948_v63, %v1951_v9  ;;  %v1882_v12 = vsel %vm820_vm1, %v1881_v10, -inf  ;;  %v2743_v63 = vld [vmem:[%s3785_s5 + $0x38] sm:$0xff] }
 0xf78   : > { %1883 = vmax.xlane.f32.xlu1 %v1882_v12 }
 0xf79   : > { %v1953_v14 = vmul.f32 1.442695, %v1952_v11 }
 0xf7b   : > { %2888 = vpow2.f32 %v1953_v14 }
 0xf81   : > { %v2889_v16 = vpop.eup %2888 }
 0xf82   : > { %v1955_v17 = vsel %vm820_vm1, %v2889_v16, 0.0 }
 0xf83   : > { %1956 = vadd.xlane.f32.xlu0 %v1955_v17 }
 0xf8e   : > { %1826 = vrot.lane.b32.xlu2 %v3404_v33, %s3780_s15 }
 0xf97   : > { %1960 = vrot.lane.b32.xlu0 %v3404_v33, %s3781_s9 }
 0xfe9   : > { %v1823_v18 = vpop.xlane.xlu2 %1822 }
 0xfea   : > { %2890 = vrcp.f32 %v1823_v18 }
 0xfeb   : > { %v1884_v15 = vpop.xlane.xlu1 %1883 }
 0xfec   : > { %v1885_v19 = vsub.f32 %v1881_v10, %v1884_v15  ;;  %v2832_v15 = vld [vmem:[%s3788_s14 + $0x1] ss:$0 sm:$0xff] }
 0xfee   : > { %v1886_v20 = vmul.f32 1.442695, %v1885_v19 }
 0xff0   : > { %v2891_v21 = vpop.eup %2890  ;;  %2892 = vpow2.f32 %v1886_v20 }
 0xff1   : > { %v1825_v22 = vmul.f32 %v2891_v21, %v2887_v6  ;;  %v1827_v23 = vpop.permute.xlu2 %1826 }
 0xff2   : > { %1847 = vmatpush.msrb.mxu2 %v1827_v23 }
 0xff3   : > { %2725 = vmatmul.msk.f32.vlgmr.msrb.gmra.mxu2 %vm820_vm1, %v1825_v22 }
 0xff6   : > { %v2893_v24 = vpop.eup %2892  ;;  %v1957_v26 = vpop.xlane.xlu0 %1956 }
 0xff7   : > { %v1888_v25 = vsel %vm820_vm1, %v2893_v24, 0.0  ;;  %2894 = vrcp.f32 %v1957_v26 }
 0xff8   : > { %1889 = vadd.xlane.f32.xlu1 %v1888_v25 }
 0xffd   : > { %v2895_v27 = vpop.eup %2894 }
 0xffe   : > { %v1959_v28 = vmul.f32 %v2895_v27, %v2889_v16  ;;  %v2831_v16 = vld [vmem:[%s3787_s28 + $0x1] ss:$0 sm:$0xff] }
0x1009   : > { %v1961_v4 = vpop.permute.xlu0 %1960 }
0x100a   : > { %1981 = vmatpush.msra.mxu2 %v1961_v4 }
0x100b   : > { %2731 = vmatmul.msk.f32.vlgmr.msra.gmra.mxu2 %vm820_vm1, %v1959_v28 }
0x1011   : > { %1893 = vrot.lane.b32.xlu1 %v3404_v33, %s3782_s11  ;;  %v2734_v33 = vld [vmem:[%s3783_s25 + $0x30] sm:$0xff]  ;;  %s3789_s11 = sld [smem:[#allocation15_spill]] }
0x1012   : > { %2027 = vmatpush.msra.mxu1 %v2734_v33 }
0x1014   : > { %2028 = vmatpush.msra.mxu1 %v2733_v39 }
0x1016   : > { %2029 = vmatpush.msra.mxu1 %v2732_v41 }
0x1017   : > { %v2834_v23 = vld [vmem:[%s3789_s11 + $0x1] ss:$0 sm:$0xff] }
0x106b   : > { %v1890_v32 = vpop.xlane.xlu1 %1889 }
0x106c   : > { %2896 = vrcp.f32 %v1890_v32 }
0x1072   : > { %v2897_v62 = vpop.eup %2896 }
0x1073   : > { %v1892_v34 = vmul.f32 %v2897_v62, %v2893_v24 }
0x1076   : > { %v1849_v29 = vpop.f32.mrf.mxu2 }
0x1077   : > { %1987 = vrot.lane.b32.xlu2 %v1849_v29, %s3775_s27 }
0x1083   : > { %v1894_v36 = vpop.permute.xlu1 %1893 }
0x1084   : > { %1914 = vmatpush.msrb.mxu3 %v1894_v36 }
0x1085   : > { %2728 = vmatmul.msk.f32.vlgmr.msrb.gmra.mxu3 %vm820_vm1, %v1892_v34 }
0x1086   : > { %2094 = vmatpush.msra.mxu3 %v2743_v63 }
0x1088   : > { %2095 = vmatpush.msra.mxu3 %v2742_v0 }
0x108e   : > { %v1983_v37 = vpop.f32.mrf.mxu2 }
0x108f   : > { %1995 = vrot.lane.b32.xlu1 %v1983_v37, %s3776_s2 }
0x10d1   : > { %v1988_v42 = vpop.permute.xlu2 %1987 }
0x10d2   : > { %v1998_v43 = vsel %vm820_vm1, %v3442_v3, %v1988_v42 }
0x1101   : > { %v1996_v45 = vpop.permute.xlu1 %1995 }
0x1108   : > { %v1916_v40 = vpop.f32.mrf.mxu3 }
0x1109   : > { %1991 = vrot.lane.b32.xlu0 %v1916_v40, %s3774_s4 }
0x117b   : > { %v1992_v44 = vpop.permute.xlu0 %1991 }
0x117c   : > { %v1999_v46 = vsel %vm1099_vm3, %v1998_v43, %v1992_v44 }
0x117d   : > { %v2000_v48 = vsel %vm1101_vm4, %v1999_v46, %v1996_v45 }
0x117e   : > { %2737 = vmatmul.msk.f32.vlgmr.msra.gmra.mxu1 %vm793_vm0, %v2000_v48 }
0x11fb   : > { %v2031_v50 = vpop.f32.mrf.mxu1 }
0x11fc   : > { %v2032_v51 = vadd.f32 %v2830_v49, %v2031_v50 }
0x11fe   : > { %v2034_v52 = vadd.f32 %v2032_v51, %v3397_v31  ;;  %v2746_v31 = vld [vmem:[%s3757_s12 + $0x20] sm:$0xff] }
0x11ff   : > { %2127 = vmatpush.msrb.mxu0 %v2746_v31 }
0x1200   : > { %v2039_v53 = vsel %vm793_vm0, %v2034_v52, 0.0  ;;  %2751 = vmatmul.msk.f32.vlgmr.msrb.gmra.mxu0 %vm793_vm0, %v3205_v30  ;;  %v2741_v30 = vld [vmem:[%s3785_s5 + $0x28] sm:$0xff] }
0x1201   : > { %2040 = vadd.xlane.f32.xlu2 %v2039_v53  ;;  %2096 = vmatpush.msra.mxu3 %v2741_v30 }
0x1203   : > { %2097 = vmatpush.msra.mxu3 %v2740_v1 }
0x1274   : > { %v2041_v57 = vpop.xlane.xlu2 %2040 }
0x1275   : > { %v2042_v58 = vmul.f32 %v2041_v57, %v3209_v35 }
0x1277   : > { %v2043_v59 = vsub.f32 %v2034_v52, %v2042_v58 }
0x1279   : > { %v2044_v60 = vmul.f32 %v2043_v59, %v2043_v59 }
0x127b   : > { %v2045_v61 = vsel %vm793_vm0, %v2044_v60, 0.0 }
0x127c   : > { %2046 = vadd.xlane.f32.xlu0 %v2045_v61 }
0x127d   : > { %v2129_v3 = vpop.f32.mrf.mxu0 }
0x127e   : > { %v3515_v5 = vadd.f32 %v2833_v2, %v2129_v3 }
0x1280   : > { %2199 = vrot.lane.b32.xlu1 %v3515_v5, %s3761_s0  ;;  %2752 = vmatpush.xpose.msk.msrb.mxu2 %vm820_vm1, %v3515_v5 }
0x1288   : > { %2266 = vrot.lane.b32.xlu1 %v3515_v5, %s3762_s7 }
0x1290   : > { %2333 = vrot.lane.b32.xlu1 %v3515_v5, %s3763_s24 }
0x12ef   : > { %v2047_v47 = vpop.xlane.xlu0 %2046 }
0x12f0   : > { %v2048_v6 = vmul.f32 %v2047_v47, %v3209_v35 }
0x12f2   : > { %v2049_v7 = vadd.f32 1e-12, %v2048_v6  ;;  %v2200_v21 = vpop.permute.xlu1 %2199 }
0x12f3   : > { %2755 = vmatpush.xpose.msk.msrb.mxu3 %vm820_vm1, %v2200_v21 }
0x12f4   : > { %2898 = vrsqrt.f32 %v2049_v7  ;;  %vm2056_vm7 = vweird.f32 %v2049_v7 }
0x12fa   : > { %v2899_v8 = vpop.eup %2898  ;;  %v2267_v22 = vpop.permute.xlu1 %2266 }
0x12fb   : > { %v2051_v9 = vmul.f32 %v2899_v8, %v2049_v7  ;;  %vm2057_vm2 = vweird.f32 %v2899_v8  ;;  %2758 = vmatpush.xpose.msk.msra.mxu2 %vm820_vm1, %v2267_v22 }
0x12fc   : > { %vm2058_vm8 = vmor %vm2056_vm7, %vm2057_vm2 }
0x12fd   : > { %v2052_v10 = vmul.f32 %v2899_v8, %v2051_v9 }
0x12ff   : > { %v2053_v11 = vmul.f32 0.5, %v2052_v10 }
0x1301   : > { %v2054_v12 = vsub.f32 1.5, %v2053_v11 }
0x1302   : > { %v2334_v26 = vpop.permute.xlu1 %2333 }
0x1303   : > { %v2055_v14 = vmul.f32 %v2899_v8, %v2054_v12 }
0x1305   : > { %v2059_v17 = vsel %vm2058_vm8, %v2899_v8, %v2055_v14 }
0x1306   : > { %v2060_v18 = vmul.f32 %v2059_v17, %v2043_v59 }
0x1308   : > { %v2064_v19 = vmul.f32 %v2831_v16, %v2060_v18 }
0x130a   : > { %v3532_v20 = vadd.f32 %v2832_v15, %v2064_v19 }
0x130c   : > { %2745 = vmatmul.msk.f32.vlgmr.msra.gmra.mxu3 %vm793_vm0, %v3532_v20 }
0x130d   : > { %2761 = vmatpush.xpose.msk.msra.mxu3 %vm820_vm1, %v2334_v26 }
0x138f   : > { %v2099_v24 = vpop.f32.mrf.mxu3 }
0x1390   : > { %v2100_v25 = vadd.f32 %v2834_v23, %v2099_v24 }
0x1392   : > { %2331 = vrot.lane.b32.xlu2 %v2100_v25, %s3763_s24  ;;  %2197 = vrot.lane.b32.xlu1 %v2100_v25, %s3761_s0  ;;  %s3790_s24 = sld [smem:[#allocation18_spill]] }
0x1393   : > { %2753 = vmatmul.msk.f32.vlgmr.msrb.gmra.mxu2 %vm820_vm1, %v2100_v25 }
0x1398   : > { %v2767_v24 = vld [vmem:[%s3790_s24 + $0x38] sm:$0xff]  ;;  %v2765_v26 = vld [vmem:[%s3790_s24 + $0x28] sm:$0xff] }
0x1399   : > { %2438 = vmatpush.msrb.mxu2 %v2767_v24 }
0x139a   : > { %2264 = vrot.lane.b32.xlu1 %v2100_v25, %s3762_s7  ;;  %v2766_v25 = vld [vmem:[%s3790_s24 + $0x30] sm:$0xff] }
0x139b   : > { %2439 = vmatpush.msrb.mxu2 %v2766_v25 }
0x139d   : > { %2440 = vmatpush.msrb.mxu2 %v2765_v26 }
0x13ec   : > { %v2332_v28 = vpop.permute.xlu2 %2331 }
0x1404   : > { %v2198_v27 = vpop.permute.xlu1 %2197 }
0x1405   : > { %2756 = vmatmul.msk.f32.vlgmr.msrb.gmra.mxu3 %vm820_vm1, %v2198_v27  ;;  %v2764_v27 = vld [vmem:[%s3790_s24 + $0x20] sm:$0xff]  ;;  %s3792_s24 = sld [smem:[#allocation3_spill]] }
0x1406   : > { %2441 = vmatpush.msrb.mxu2 %v2764_v27 }
0x140c   : > { %v2265_v4 = vpop.permute.xlu1 %2264 }
0x140d   : > { %2759 = vmatmul.msk.f32.vlgmr.msra.gmra.mxu2 %vm820_vm1, %v2265_v4  ;;  %2762 = vmatmul.msk.f32.vlgmr.msra.gmra.mxu3 %vm820_vm1, %v2332_v28 }
0x1416   : > { %v2155_v29 = vpop.f32.mrf.mxu2 }
0x1417   : > { %v2158_v32 = vmul.f32 0.35355338, %v2155_v29 }
0x1419   : > { %v2159_v62 = vsel %vm3266_vm10, -10000.0, %v2158_v32 }
0x141a   : > { %v2160_v34 = vsel %vm820_vm1, %v2159_v62, -inf }
0x141b   : > { %2161 = vmax.xlane.f32.xlu0 %v2160_v34 }
0x1488   : > { %v2222_v36 = vpop.f32.mrf.mxu3 }
0x1489   : > { %v2225_v37 = vmul.f32 0.35355338, %v2222_v36  ;;  %v2835_v36 = vld [vmem:[%s3791_s13 + $0x1] ss:$0 sm:$0xff] }
0x148b   : > { %v2226_v38 = vsel %vm3266_vm10, -10000.0, %v2225_v37 }
0x148c   : > { %v2227_v33 = vsel %vm820_vm1, %v2226_v38, -inf }
0x148d   : > { %2228 = vmax.xlane.f32.xlu1 %v2227_v33 }
0x148e   : > { %v2162_v39 = vpop.xlane.xlu0 %2161 }
0x148f   : > { %v2163_v40 = vsub.f32 %v2159_v62, %v2162_v39 }
0x1490   : > { %v2289_v41 = vpop.f32.mrf.mxu2  ;;  %v2356_v44 = vpop.f32.mrf.mxu3 }
0x1491   : > { %v2164_v42 = vmul.f32 1.442695, %v2163_v40  ;;  %v2292_v43 = vmul.f32 0.35355338, %v2289_v41  ;;  %v2359_v48 = vmul.f32 0.35355338, %v2356_v44 }
0x1493   : > { %2900 = vpow2.f32 %v2164_v42  ;;  %v2293_v45 = vsel %vm3266_vm10, -10000.0, %v2292_v43  ;;  %v2360_v50 = vsel %vm3266_vm10, -10000.0, %v2359_v48  ;;  %v2772_v48 = vld [vmem:[%s3690_s18 + $0x20] sm:$0xff] }
0x1494   : > { %v2294_v46 = vsel %vm820_vm1, %v2293_v45, -inf  ;;  %v2361_v52 = vsel %vm820_vm1, %v2360_v50, -inf }
0x1495   : > { %2295 = vmax.xlane.f32.xlu0 %v2294_v46  ;;  %v2773_v46 = vld [vmem:[%s3690_s18 + $0x28] sm:$0xff] }
0x1499   : > { %v2901_v49 = vpop.eup %2900 }
0x149a   : > { %v2166_v51 = vsel %vm820_vm1, %v2901_v49, 0.0 }
0x149b   : > { %2167 = vadd.xlane.f32.xlu2 %v2166_v51  ;;  %v2783_v51 = vld [vmem:[%s3692_s20 + $0x68] sm:$0xff] }
0x149d   : > { %2362 = vmax.xlane.f32.xlu0 %v2361_v52 }
0x14b1   : > { %2171 = vrot.lane.b32.xlu0 %v3515_v5, %s3771_s3 }
0x14b3   : > { %2372 = vrot.lane.b32.xlu2 %v3515_v5, %s3772_s8 }
0x1500   : > { %v2229_v53 = vpop.xlane.xlu1 %2228 }
0x1501   : > { %v2230_v54 = vsub.f32 %v2226_v38, %v2229_v53 }
0x1503   : > { %v2231_v55 = vmul.f32 1.442695, %v2230_v54  ;;  %v2782_v54 = vld [vmem:[%s3692_s20 + $0x60] sm:$0xff] }
0x1505   : > { %2902 = vpow2.f32 %v2231_v55 }
0x1508   : > { %v2296_v56 = vpop.xlane.xlu0 %2295 }
0x1509   : > { %v2297_v31 = vsub.f32 %v2293_v45, %v2296_v56  ;;  %v2775_v45 = vld [vmem:[%s3690_s18 + $0x38] sm:$0xff] }
0x150a   : > { %v2781_v56 = vld [vmem:[%s3692_s20 + $0x58] sm:$0xff] }
0x150b   : > { %v2903_v13 = vpop.eup %2902  ;;  %v2298_v57 = vmul.f32 1.442695, %v2297_v31 }
0x150c   : > { %v2233_v58 = vsel %vm820_vm1, %v2903_v13, 0.0 }
0x150d   : > { %2904 = vpow2.f32 %v2298_v57  ;;  %2234 = vadd.xlane.f32.xlu0 %v2233_v58 }
0x150e   : > { %v2168_v30 = vpop.xlane.xlu2 %2167 }
0x1510   : > { %v2363_v59 = vpop.xlane.xlu0 %2362 }
0x1511   : > { %v2364_v60 = vsub.f32 %v2360_v50, %v2363_v59  ;;  %v2784_v50 = vld [vmem:[%s3692_s20 + $0x70] sm:$0xff] }
0x1513   : > { %v2905_v61 = vpop.eup %2904  ;;  %v2365_v63 = vmul.f32 1.442695, %v2364_v60 }
0x1514   : > { %v2300_v0 = vsel %vm820_vm1, %v2905_v61, 0.0 }
0x1515   : > { %2906 = vpow2.f32 %v2365_v63  ;;  %2301 = vadd.xlane.f32.xlu0 %v2300_v0 }
0x1516   : > { %2908 = vrcp.f32 %v2168_v30  ;;  %v2373_v18 = vpop.permute.xlu2 %2372  ;;  %v2837_v30 = vld [vmem:[%s3689_s17 + $0x1] ss:$0 sm:$0xff] }
0x151b   : > { %v2907_v1 = vpop.eup %2906 }
0x151c   : > { %v2367_v2 = vsel %vm820_vm1, %v2907_v1, 0.0  ;;  %v2909_v3 = vpop.eup %2908 }
0x151d   : > { %2368 = vadd.xlane.f32.xlu1 %v2367_v2  ;;  %v2170_v47 = vmul.f32 %v2909_v3, %v2901_v49  ;;  %v2785_v49 = vld [vmem:[%s3692_s20 + $0x78] sm:$0xff]  ;;  %v2780_v3 = vld [vmem:[%s3692_s20 + $0x50] sm:$0xff] }
0x151e   : > { %2540 = vmatpush.msrb.mxu3 %v2785_v49 }
0x1520   : > { %2541 = vmatpush.msrb.mxu3 %v2784_v50 }
0x1522   : > { %2542 = vmatpush.msrb.mxu3 %v2783_v51 }
0x1523   : > { %v2172_v6 = vpop.permute.xlu0 %2171 }
0x1524   : > { %2192 = vmatpush.msrb.mxu1 %v2172_v6  ;;  %2543 = vmatpush.msrb.mxu3 %v2782_v54  ;;  %v2778_v6 = vld [vmem:[%s3692_s20 + $0x40] sm:$0xff] }
0x1525   : > { %2754 = vmatmul.msk.f32.vlgmr.msrb.gmra.mxu1 %vm820_vm1, %v2170_v47  ;;  %v2779_v47 = vld [vmem:[%s3692_s20 + $0x48] sm:$0xff] }
0x1526   : > { %2544 = vmatpush.msrb.mxu3 %v2781_v56 }
0x1528   : > { %2545 = vmatpush.msrb.mxu3 %v2780_v3 }
0x1529   : > { %2305 = vrot.lane.b32.xlu0 %v3515_v5, %s3770_s26 }
0x152a   : > { %2546 = vmatpush.msrb.mxu3 %v2779_v47 }
0x152c   : > { %2547 = vmatpush.msrb.mxu3 %v2778_v6 }
0x1536   : > { %2238 = vrot.lane.b32.xlu1 %v3515_v5, %s3773_s1 }
0x1580   : > { %v2235_v7 = vpop.xlane.xlu0 %2234 }
0x1588   : > { %v2302_v8 = vpop.xlane.xlu0 %2301 }
0x1589   : > { %2910 = vrcp.f32 %v2302_v8 }
0x158a   : > { %2912 = vrcp.f32 %v2235_v7  ;;  %v2838_v7 = vld [vmem:[%s3691_s19 + $0x1] ss:$0 sm:$0xff] }
0x158f   : > { %v2911_v9 = vpop.eup %2910 }
0x1590   : > { %v2304_v10 = vmul.f32 %v2911_v9, %v2905_v61  ;;  %v2369_v12 = vpop.xlane.xlu1 %2368  ;;  %v2913_v14 = vpop.eup %2912  ;;  %v2836_v61 = vld [vmem:[%s3688_s16 + $0x1] ss:$0 sm:$0xff] }
0x1591   : > { %2914 = vrcp.f32 %v2369_v12  ;;  %v2237_v16 = vmul.f32 %v2913_v14, %v2903_v13 }
0x1597   : > { %v2915_v5 = vpop.eup %2914 }
0x1598   : > { %v2371_v15 = vmul.f32 %v2915_v5, %v2907_v1 }
0x159b   : > { %v2306_v11 = vpop.permute.xlu0 %2305 }
0x159c   : > { %2326 = vmatpush.msra.mxu1 %v2306_v11  ;;  %v2839_v11 = vld [vmem:[%s3693_s21 + $0x1] ss:$0 sm:$0xff] }
0x159d   : > { %2760 = vmatmul.msk.f32.vlgmr.msra.gmra.mxu1 %vm820_vm1, %v2304_v10 }
0x159e   : > { %2506 = vmatpush.msrb.mxu1 %v2775_v45 }
0x15a2   : > { %v2194_v19 = vpop.f32.mrf.mxu1 }
0x15a8   : > { %v2239_v17 = vpop.permute.xlu1 %2238 }
0x15a9   : > { %2259 = vmatpush.msra.mxu0 %v2239_v17 }
0x15aa   : > { %2757 = vmatmul.msk.f32.vlgmr.msra.gmra.mxu0 %vm820_vm1, %v2237_v16 }
0x15ab   : > { %2393 = vmatpush.msrb.mxu0 %v2373_v18 }
0x15b2   : > { %2763 = vmatmul.msk.f32.vlgmr.msrb.gmra.mxu0 %vm820_vm1, %v2371_v15 }
0x161a   : > { %v2328_v22 = vpop.f32.mrf.mxu1 }
0x1627   : > { %v2261_v21 = vpop.f32.mrf.mxu0 }
0x1628   : > { %2399 = vrot.lane.b32.xlu0 %v2261_v21, %s3775_s27 }
0x162f   : > { %v2395_v23 = vpop.f32.mrf.mxu0 }
0x1630   : > { %2403 = vrot.lane.b32.xlu0 %v2328_v22, %s3774_s4  ;;  %2407 = vrot.lane.b32.xlu1 %v2395_v23, %s3776_s2  ;;  %s3793_s4 = sld [smem:[#allocation20_spill]] }
0x1636   : > { %s780_s2 = scalar_lea.vmem %s3793_s4, %s3792_s24 }
0x169a   : > { %v2400_v28 = vpop.permute.xlu0 %2399 }
0x169b   : > { %v2410_v4 = vsel %vm820_vm1, %v2194_v19, %v2400_v28 }
0x16a2   : > { %v2404_v29 = vpop.permute.xlu0 %2403  ;;  %v2408_v32 = vpop.permute.xlu1 %2407 }
0x16a3   : > { %v2411_v62 = vsel %vm1099_vm3, %v2410_v4, %v2404_v29 }
0x16a4   : > { %v2412_v34 = vsel %vm1101_vm4, %v2411_v62, %v2408_v32  ;;  %v2840_v32 = vld [vmem:[%s3694_s22 + $0x1] ss:$0 sm:$0xff] }
0x16a5   : > { %2769 = vmatmul.msk.f32.vlgmr.msrb.gmra.mxu2 %vm793_vm0, %v2412_v34 }
0x1728   : > { %v2443_v37 = vpop.f32.mrf.mxu2 }
0x1729   : > { %v2444_v38 = vadd.f32 %v2835_v36, %v2443_v37 }
0x172b   : > { %v2446_v33 = vadd.f32 %v2444_v38, %v3532_v20  ;;  %v2774_v20 = vld [vmem:[%s3690_s18 + $0x30] sm:$0xff] }
0x172c   : > { %2507 = vmatpush.msrb.mxu1 %v2774_v20 }
0x172d   : > { %v2451_v39 = vsel %vm793_vm0, %v2446_v33, 0.0 }
0x172e   : > { %2452 = vadd.xlane.f32.xlu0 %v2451_v39  ;;  %2508 = vmatpush.msrb.mxu1 %v2773_v46 }
0x1730   : > { %2509 = vmatpush.msrb.mxu1 %v2772_v48 }
0x17a1   : > { %v2453_v40 = vpop.xlane.xlu0 %2452 }
0x17a2   : > { %v2454_v41 = vmul.f32 %v2453_v40, %v3209_v35 }
0x17a4   : > { %v2455_v42 = vsub.f32 %v2446_v33, %v2454_v41 }
0x17a6   : > { %v2456_v43 = vmul.f32 %v2455_v42, %v2455_v42 }
0x17a8   : > { %v2457_v44 = vsel %vm793_vm0, %v2456_v43, 0.0 }
0x17a9   : > { %2458 = vadd.xlane.f32.xlu1 %v2457_v44 }
0x181c   : > { %v2459_v52 = vpop.xlane.xlu1 %2458 }
0x181d   : > { %v2460_v53 = vmul.f32 %v2459_v52, %v3209_v35 }
0x181f   : > { %v2461_v55 = vadd.f32 1e-12, %v2460_v53 }
0x1821   : > { %2916 = vrsqrt.f32 %v2461_v55  ;;  %vm2468_vm3 = vweird.f32 %v2461_v55 }
0x1827   : > { %v2917_v31 = vpop.eup %2916 }
0x1828   : > { %v2463_v13 = vmul.f32 %v2917_v31, %v2461_v55  ;;  %vm2469_vm1 = vweird.f32 %v2917_v31 }
0x1829   : > { %vm2470_vm4 = vmor %vm2468_vm3, %vm2469_vm1 }
0x182a   : > { %v2464_v57 = vmul.f32 %v2917_v31, %v2463_v13 }
0x182c   : > { %v2465_v58 = vmul.f32 0.5, %v2464_v57 }
0x182e   : > { %v2466_v59 = vsub.f32 1.5, %v2465_v58 }
0x1830   : > { %v2467_v60 = vmul.f32 %v2917_v31, %v2466_v59 }
0x1832   : > { %v2471_v63 = vsel %vm2470_vm4, %v2917_v31, %v2467_v60 }
0x1833   : > { %v2472_v0 = vmul.f32 %v2471_v63, %v2455_v42 }
0x1835   : > { %v2476_v1 = vmul.f32 %v2836_v61, %v2472_v0 }
0x1837   : > { %v2480_v2 = vadd.f32 %v2837_v30, %v2476_v1 }
0x1839   : > { %2777 = vmatmul.msk.f32.vlgmr.msrb.gmra.mxu1 %vm793_vm0, %v2480_v2 }
0x18b6   : > { %v2511_v8 = vpop.f32.mrf.mxu1 }
0x18b7   : > { %v2512_v9 = vadd.f32 %v2838_v7, %v2511_v8 }
0x18b9   : > { %v2514_v10 = vmax.f32 %v2512_v9, 0.0 }
0x18bb   : > { %2787 = vmatmul.msk.f32.vlgmr.msrb.gmra.mxu3 %vm1629_vm14, %v2514_v10 }
0x193e   : > { %v2549_v12 = vpop.f32.mrf.mxu3 }
0x193f   : > { %v2550_v14 = vadd.f32 %v2839_v11, %v2549_v12 }
0x1941   : > { %v2552_v16 = vadd.f32 %v2550_v14, %v2480_v2 }
0x1943   : > { %v2557_v17 = vsel %vm793_vm0, %v2552_v16, 0.0 }
0x1944   : > { %2558 = vadd.xlane.f32.xlu2 %v2557_v17 }
0x19b7   : > { %v2559_v18 = vpop.xlane.xlu2 %2558 }
0x19b8   : > { %v2560_v5 = vmul.f32 %v2559_v18, %v3209_v35 }
0x19ba   : > { %v2561_v15 = vsub.f32 %v2552_v16, %v2560_v5 }
0x19bc   : > { %v2562_v19 = vmul.f32 %v2561_v15, %v2561_v15 }
0x19be   : > { %v2563_v21 = vsel %vm793_vm0, %v2562_v19, 0.0 }
0x19bf   : > { %2564 = vadd.xlane.f32.xlu0 %v2563_v21 }
0x1a32   : > { %v2565_v22 = vpop.xlane.xlu0 %2564 }
0x1a33   : > { %v2566_v23 = vmul.f32 %v2565_v22, %v3209_v35  ;;  %v2841_v35 = vld [vmem:[%s3695_s23 + $0x1] ss:$0 sm:$0xff] }
0x1a35   : > { %v2567_v24 = vadd.f32 1e-12, %v2566_v23 }
0x1a37   : > { %2918 = vrsqrt.f32 %v2567_v24  ;;  %vm2574_vm10 = vweird.f32 %v2567_v24 }
0x1a3d   : > { %v2919_v25 = vpop.eup %2918 }
0x1a3e   : > { %v2569_v26 = vmul.f32 %v2919_v25, %v2567_v24  ;;  %vm2575_vm9 = vweird.f32 %v2919_v25 }
0x1a3f   : > { %vm2576_vm11 = vmor %vm2574_vm10, %vm2575_vm9 }
0x1a40   : > { %v2570_v27 = vmul.f32 %v2919_v25, %v2569_v26 }
0x1a42   : > { %v2571_v28 = vmul.f32 0.5, %v2570_v27 }
0x1a44   : > { %v2572_v4 = vsub.f32 1.5, %v2571_v28 }
0x1a46   : > { %v2573_v29 = vmul.f32 %v2919_v25, %v2572_v4 }
0x1a48   : > { %v2577_v62 = vsel %vm2576_vm11, %v2919_v25, %v2573_v29 }
0x1a49   : > { %v2578_v34 = vmul.f32 %v2577_v62, %v2561_v15 }
0x1a4b   : > { %v2582_v36 = vmul.f32 %v2840_v32, %v2578_v34 }
0x1a4d   : > { %v2586_v37 = vadd.f32 %v2841_v35, %v2582_v36 }
0x1a4f   : > { %2587 = vst.msk [vmem:[%s780_s2] sm:$0xff] %vm793_vm0, %v2586_v37 }
0x1a50 PF: > { %s3794_s13 = sld [smem:[#allocation2_spill]] }
0x1a56   : > { %s34_s5 = sadd.s32 1, %s3794_s13  }
0x1a57   : > { %p31_p4 = scmp.ge.s32.totalorder %s34_s5, 4  }
0x1a59   :  { %33 = sbr.rel (!%p31_p4) target bundleno = 18 (0x12), region = 175 }

</bundles_post_ra>
